<compile_context>
chip_gen: v5e
topology: v5e:2x2
jax: 0.10.0
libtpu: 0.0.40
codegen_flags: <defaults>
</compile_context>

<pallas_src>
import functools

import jax
import jax.numpy as jnp
from jax.experimental import pallas as pl
from jax.experimental.pallas import tpu as pltpu


# --------------------------- generation-aware tiling ---------------------------

def _tile_targets():
    try:
        kind = jax.devices()[0].device_kind.lower()
    except Exception:
        kind = ""
    if "v7" in kind:
        # v7x: 64 MiB VMEM / TC -> roughly half the block footprint of v5e/v6e.
        return dict(tm=256, tn=256, tk=512, ln_rows=512, tq=256, tkv=512,
                    vmem=48 * 1024 * 1024)
    return dict(tm=512, tn=512, tk=512, ln_rows=1024, tq=512, tkv=512,
                vmem=64 * 1024 * 1024)


_T = _tile_targets()


def _pick_tile(dim, target, align):
    """Largest divisor of `dim` that is <= target and a multiple of `align`,
    else the full dim (a full-extent block is always legal)."""
    if dim <= target:
        return dim
    t = (target // align) * align
    while t >= align:
        if dim % t == 0:
            return t
        t -= align
    return dim


# --------------------------------- kernels ------------------------------------

def _gelu_exact(x):
    # Exact (erf-based, like nn.GELU default) GELU; erf via Abramowitz&Stegun 7.1.26
    # (|err| < 1.5e-7) so it lowers with only mul/add/div/exp/select on the VPU/EUP.
    z = x * 0.7071067811865476
    s = jnp.where(z < 0, -1.0, 1.0)
    a = z * s
    t = 1.0 / (1.0 + 0.3275911 * a)
    poly = t * (0.254829592 + t * (-0.284496736 + t * (1.421413741
                + t * (-1.453152027 + t * 1.061405429))))
    erf = s * (1.0 - poly * jnp.exp(-a * a))
    return 0.5 * x * (1.0 + erf)


def _make_mm_kernel(has_bias, has_res, act):
    """Tiled matmul with f32 accumulator and fused bias / GELU / residual epilogue."""
    def kernel(*refs):
        i = 0
        x_ref = refs[i]; i += 1
        w_ref = refs[i]; i += 1
        b_ref = None
        r_ref = None
        if has_bias:
            b_ref = refs[i]; i += 1
        if has_res:
            r_ref = refs[i]; i += 1
        o_ref = refs[i]
        acc_ref = refs[i + 1]

        kk = pl.program_id(2)

        @pl.when(kk == 0)
        def _():
            acc_ref[...] = jnp.zeros_like(acc_ref)

        acc_ref[...] += jnp.dot(x_ref[...], w_ref[...],
                                preferred_element_type=jnp.float32)

        @pl.when(kk == pl.num_programs(2) - 1)
        def _():
            y = acc_ref[...]
            if has_bias:
                y = y + b_ref[...].astype(jnp.float32)
            if act == "gelu":
                y = _gelu_exact(y)
            if has_res:
                y = y + r_ref[...].astype(jnp.float32)
            o_ref[...] = y.astype(o_ref.dtype)

    return kernel


def _layernorm_kernel(x_ref, g_ref, b_ref, o_ref, *, eps):
    # Normalize over last axis (channel), biased variance — matches nn.LayerNorm
    # (eps=1e-5) and SAM's LayerNorm2d (eps=1e-6) when fed channel-last rows.
    x = x_ref[...].astype(jnp.float32)
    mu = jnp.mean(x, axis=-1, keepdims=True)
    xc = x - mu
    var = jnp.mean(xc * xc, axis=-1, keepdims=True)
    y = xc * jax.lax.rsqrt(var + eps)
    o_ref[...] = (y * g_ref[...].astype(jnp.float32)
                  + b_ref[...].astype(jnp.float32)).astype(o_ref.dtype)


def _flash_kernel(q_ref, k_ref, v_ref, o_ref, m_sc, l_sc, acc_sc, *, scale):
    # One (batch*head, q-tile) slice, streaming over kv tiles with online softmax.
    ki = pl.program_id(2)

    @pl.when(ki == 0)
    def _():
        m_sc[...] = jnp.full_like(m_sc, -jnp.inf)
        l_sc[...] = jnp.zeros_like(l_sc)
        acc_sc[...] = jnp.zeros_like(acc_sc)

    q = q_ref[0].astype(jnp.float32) * scale
    k = k_ref[0].astype(jnp.float32)
    v = v_ref[0].astype(jnp.float32)

    # (tq, tk) scores via dot_general contracting the head dim (no explicit k.T).
    s = jax.lax.dot_general(q, k, (((1,), (1,)), ((), ())),
                            preferred_element_type=jnp.float32)

    m_prev = m_sc[...]
    m_new = jnp.maximum(m_prev, jnp.max(s, axis=-1, keepdims=True))
    alpha = jnp.exp(m_prev - m_new)
    p = jnp.exp(s - m_new)
    l_sc[...] = alpha * l_sc[...] + jnp.sum(p, axis=-1, keepdims=True)
    acc_sc[...] = alpha * acc_sc[...] + jnp.dot(p, v, preferred_element_type=jnp.float32)
    m_sc[...] = m_new

    @pl.when(ki == pl.num_programs(2) - 1)
    def _():
        o_ref[0] = (acc_sc[...] * pl.reciprocal(l_sc[...], approx=True)
                    ).astype(o_ref.dtype)


# ------------------------------- kernel wrappers --------------------------------

def matmul_fused(x, w, b=None, residual=None, act=None):
    """y = act(x @ w + b) + residual, tiled over (M, N, K) with f32 accumulation."""
    M, K = x.shape
    Kw, N = w.shape
    assert K == Kw
    tm = _pick_tile(M, _T["tm"], 8)
    tn = _pick_tile(N, _T["tn"], 128)
    tk = _pick_tile(K, _T["tk"], 128)

    in_specs = [pl.BlockSpec((tm, tk), lambda i, j, k: (i, k)),
                pl.BlockSpec((tk, tn), lambda i, j, k: (k, j))]
    args = [x, w]
    if b is not None:
        in_specs.append(pl.BlockSpec((1, tn), lambda i, j, k: (0, j)))
        args.append(b.reshape(1, N))
    if residual is not None:
        in_specs.append(pl.BlockSpec((tm, tn), lambda i, j, k: (i, j)))
        args.append(residual)

    return pl.pallas_call(
        _make_mm_kernel(b is not None, residual is not None, act),
        grid=(M // tm, N // tn, K // tk),
        in_specs=in_specs,
        out_specs=pl.BlockSpec((tm, tn), lambda i, j, k: (i, j)),
        out_shape=jax.ShapeDtypeStruct((M, N), x.dtype),
        scratch_shapes=[pltpu.VMEM((tm, tn), jnp.float32)],
        compiler_params=pltpu.CompilerParams(
            dimension_semantics=("parallel", "parallel", "arbitrary"),
            vmem_limit_bytes=_T["vmem"]),
    )(*args)


def layernorm(x, g, b, eps):
    M, C = x.shape
    tm = _pick_tile(M, _T["ln_rows"], 8)
    return pl.pallas_call(
        functools.partial(_layernorm_kernel, eps=eps),
        grid=(M // tm,),
        in_specs=[pl.BlockSpec((tm, C), lambda i: (i, 0)),
                  pl.BlockSpec((1, C), lambda i: (0, 0)),
                  pl.BlockSpec((1, C), lambda i: (0, 0))],
        out_specs=pl.BlockSpec((tm, C), lambda i: (i, 0)),
        out_shape=jax.ShapeDtypeStruct((M, C), x.dtype),
        compiler_params=pltpu.CompilerParams(dimension_semantics=("parallel",)),
    )(x, g.reshape(1, C), b.reshape(1, C))


def flash_attention(q, k, v, scale):
    """q, k, v: (B*heads, T, Dh) -> (B*heads, T, Dh). Online-softmax over kv tiles."""
    BH, T, D = q.shape
    tq = _pick_tile(T, _T["tq"], 8)
    tk = _pick_tile(T, _T["tkv"], 8)
    return pl.pallas_call(
        functools.partial(_flash_kernel, scale=scale),
        grid=(BH, T // tq, T // tk),
        in_specs=[pl.BlockSpec((1, tq, D), lambda b, qi, ki: (b, qi, 0)),
                  pl.BlockSpec((1, tk, D), lambda b, qi, ki: (b, ki, 0)),
                  pl.BlockSpec((1, tk, D), lambda b, qi, ki: (b, ki, 0))],
        out_specs=pl.BlockSpec((1, tq, D), lambda b, qi, ki: (b, qi, 0)),
        out_shape=jax.ShapeDtypeStruct((BH, T, D), q.dtype),
        scratch_shapes=[pltpu.VMEM((tq, 1), jnp.float32),   # running max
                        pltpu.VMEM((tq, 1), jnp.float32),   # running sum
                        pltpu.VMEM((tq, D), jnp.float32)],  # output accumulator
        compiler_params=pltpu.CompilerParams(
            dimension_semantics=("parallel", "parallel", "arbitrary"),
            vmem_limit_bytes=_T["vmem"]),
    )(q, k, v)


# -------------------------------- model pieces ----------------------------------

def patch_embed(x, wf, b, patch_size):
    # x: (B, C, H, W); Conv2d(kernel=stride=patch, pad=0) == patch-flatten matmul.
    B, C, H, W = x.shape
    nH, nW = H // patch_size, W // patch_size
    xp = x.reshape(B, C, nH, patch_size, nW, patch_size)
    xp = xp.transpose(0, 2, 4, 1, 3, 5).reshape(B * nH * nW, C * patch_size * patch_size)
    y = matmul_fused(xp, wf, b)
    return y.reshape(B, nH, nW, wf.shape[1])           # NHWC (== .permute(0,2,3,1))


def attention(x, p, num_heads, residual):
    """Global attention; residual add fused into the proj matmul epilogue.
    x: (B, H, W, C) normalized input, residual: (B*H*W, C).  Returns (B*H*W, C)."""
    B, H, W, C = x.shape
    T = H * W
    hd = C // num_heads
    qkv = matmul_fused(x.reshape(B * T, C), p["qkv_w"], p["qkv_b"])        # (B*T, 3C)
    # TODO(synk): express the head split via BlockSpec index_maps on the (B,T,3C) buffer
    #             (needs head_dim multiple of 128 lanes) to avoid this XLA transpose.
    qkv = qkv.reshape(B, T, 3, num_heads, hd).transpose(2, 0, 3, 1, 4)
    qkv = qkv.reshape(3, B * num_heads, T, hd)
    o = flash_attention(qkv[0], qkv[1], qkv[2], scale=hd ** (-0.5))        # (B*nh, T, hd)
    o = o.reshape(B, num_heads, T, hd).transpose(0, 2, 1, 3).reshape(B * T, C)
    return matmul_fused(o, p["proj_w"], p["proj_b"], residual=residual)    # proj + residual


def block_forward(x, p, num_heads):
    B, H, W, C = x.shape
    x2 = x.reshape(-1, C)
    xn = layernorm(x2, p["ln1_g"], p["ln1_b"], 1e-5)
    # window_size == 0 -> global attention; shortcut fused into proj epilogue.
    x2 = attention(xn.reshape(B, H, W, C), p, num_heads, residual=x2)
    xn2 = layernorm(x2, p["ln2_g"], p["ln2_b"], 1e-5)
    h = matmul_fused(xn2, p["fc1_w"], p["fc1_b"], act="gelu")              # fc1 + erf-GELU
    out = matmul_fused(h, p["fc2_w"], p["fc2_b"], residual=x2)             # fc2 + residual
    return out.reshape(B, H, W, C)


def neck(x, p):
    # x: (B, H, W, embed_dim) NHWC
    B, H, W, C = x.shape
    oc = p["neck_w1"].shape[1]
    # 1x1 conv (no bias) == per-pixel matmul
    y = matmul_fused(x.reshape(-1, C), p["neck_w1"])
    y = layernorm(y, p["neck_ln1_g"], p["neck_ln1_b"], 1e-6)               # LayerNorm2d
    y = y.reshape(B, H, W, oc)
    # 3x3 conv, padding=1, no bias: im2col (XLA glue) + tiled matmul.
    # TODO(synk): accumulate the 9 taps inside the matmul kernel to avoid the im2col blowup.
    yp = jnp.pad(y, ((0, 0), (1, 1), (1, 1), (0, 0)))
    cols = jnp.stack([yp[:, kh:kh + H, kw:kw + W, :]
                      for kh in range(3) for kw in range(3)], axis=3)      # (B,H,W,9,oc)
    cols = cols.reshape(B * H * W, 9 * oc)
    z = matmul_fused(cols, p["neck_w2"])
    z = layernorm(z, p["neck_ln2_g"], p["neck_ln2_b"], 1e-6)               # LayerNorm2d
    return z.reshape(B, H, W, oc).transpose(0, 3, 1, 2)                    # NCHW output


def image_encoder_vit(x, params, *, patch_size, num_heads):
    dtype = params["patch_w"].dtype
    x = x.astype(dtype)
    x = patch_embed(x, params["patch_w"], params["patch_b"], patch_size)
    x = x + params["pos_embed"]                                            # use_abs_pos=True
    for bp in params["blocks"]:
        x = block_forward(x, bp, num_heads)
    return neck(x, params).astype(jnp.float32)


# ------------------------------- parameter init ----------------------------------

def init_params(key, *, img_size, patch_size, in_chans, embed_dim, depth,
                num_heads, mlp_ratio, out_chans):
    del num_heads
    keys = iter(jax.random.split(key, 8 + depth * 8))

    def nrm(shape, s=0.02):
        return (s * jax.random.normal(next(keys), shape)).astype(jnp.float32)

    n = img_size // patch_size
    mlp_dim = int(embed_dim * mlp_ratio)
    p = {
        "patch_w": nrm((embed_dim, in_chans, patch_size, patch_size)),   # PyTorch conv layout
        "patch_b": jnp.zeros((embed_dim,), jnp.float32),
        "pos_embed": nrm((1, n, n, embed_dim)),
        "neck_w1": nrm((out_chans, embed_dim, 1, 1)),
        "neck_ln1_g": jnp.ones((out_chans,), jnp.float32),
        "neck_ln1_b": jnp.zeros((out_chans,), jnp.float32),
        "neck_w2": nrm((out_chans, out_chans, 3, 3)),
        "neck_ln2_g": jnp.ones((out_chans,), jnp.float32),
        "neck_ln2_b": jnp.zeros((out_chans,), jnp.float32),
    }
    blocks = []
    for _ in range(depth):
        blocks.append(dict(
            ln1_g=jnp.ones((embed_dim,), jnp.float32),
            ln1_b=jnp.zeros((embed_dim,), jnp.float32),
            qkv_w=nrm((embed_dim, 3 * embed_dim)),
            qkv_b=jnp.zeros((3 * embed_dim,), jnp.float32),
            proj_w=nrm((embed_dim, embed_dim)),
            proj_b=jnp.zeros((embed_dim,), jnp.float32),
            ln2_g=jnp.ones((embed_dim,), jnp.float32),
            ln2_b=jnp.zeros((embed_dim,), jnp.float32),
            fc1_w=nrm((embed_dim, mlp_dim)),
            fc1_b=jnp.zeros((mlp_dim,), jnp.float32),
            fc2_w=nrm((mlp_dim, embed_dim)),
            fc2_b=jnp.zeros((embed_dim,), jnp.float32),
        ))
    p["blocks"] = blocks
    return p


def prepare_params(raw, dtype=jnp.float32):
    """One-time weight re-layout (done outside the jitted forward) + optional bf16 cast."""
    embed_dim = raw["patch_w"].shape[0]
    oc = raw["neck_w1"].shape[0]
    p = jax.tree_util.tree_map(lambda a: a.astype(dtype), raw)
    # Conv weights flattened/transposed into lane-contiguous GEMM RHS form.
    p["patch_w"] = raw["patch_w"].reshape(embed_dim, -1).T.astype(dtype)        # (C*p*p, E)
    p["neck_w1"] = raw["neck_w1"].reshape(oc, embed_dim).T.astype(dtype)        # (E, oc)
    p["neck_w2"] = raw["neck_w2"].transpose(2, 3, 1, 0).reshape(9 * oc, oc).astype(dtype)
    return p


# ------------------------------------ main ---------------------------------------

if __name__ == "__main__":
    cfg = dict(img_size=64, patch_size=16, in_chans=3, embed_dim=32, depth=2,
               num_heads=4, mlp_ratio=4.0, out_chans=32)
    key = jax.random.PRNGKey(0)
    kx, kp = jax.random.split(key)
    x = jax.random.normal(kx, (2, cfg["in_chans"], cfg["img_size"], cfg["img_size"]),
                          jnp.float32)
    raw_params = init_params(kp, **cfg)
    # Use dtype=jnp.bfloat16 here for bf16 activations/weights (LN/softmax stay f32 in-kernel).
    params = prepare_params(raw_params, dtype=jnp.float32)

    fwd = jax.jit(functools.partial(image_encoder_vit,
                                    patch_size=cfg["patch_size"],
                                    num_heads=cfg["num_heads"]))
    out = fwd(x, params)
    jax.block_until_ready(out)
    n = cfg["img_size"] // cfg["patch_size"]
    assert out.shape == (2, cfg["out_chans"], n, n), out.shape
    assert out.dtype == jnp.float32
    assert jnp.isfinite(out).all()
    print("KERNEL_OK")
</pallas_src>

<mosaic_0001>
module attributes {stable_mosaic.version = 11 : i64} {
  func.func @kernel(%arg0: i32, %arg1: i32, %arg2: i32, %arg3: memref<32x384xf32, #tpu.memory_space<vmem>>, %arg4: memref<384x32xf32, #tpu.memory_space<vmem>>, %arg5: memref<1x32xf32, #tpu.memory_space<vmem>>, %arg6: memref<32x32xf32, #tpu.memory_space<vmem>>, %arg7: memref<32x32xf32, #tpu.memory_space<vmem>>) attributes {dimension_semantics = [#tpu.dimension_semantics<parallel>, #tpu.dimension_semantics<parallel>, #tpu.dimension_semantics<arbitrary>], iteration_bounds = array<i64: 1, 1, 2>, scalar_prefetch = 0 : i64, scratch_operands = 1 : i64, tpu.core_type = #tpu.core_type<tc>, window_params = [{transform_indices = @transform_0, window_bounds = array<i64: 32, 384>}, {transform_indices = @transform_1, window_bounds = array<i64: 384, 32>}, {transform_indices = @transform_2, window_bounds = array<i64: 1, 32>}, {transform_indices = @transform_3, window_bounds = array<i64: 32, 32>}]} {
    %c0_i32 = arith.constant 0 : i32
    %0 = arith.cmpi eq, %arg2, %c0_i32 : i32
    %1 = arith.extui %0 : i1 to i32
    %c0_i32_0 = arith.constant 0 : i32
    %2 = arith.cmpi ne, %1, %c0_i32_0 : i32
    scf.if %2 {
      %cst_9 = arith.constant 0.000000e+00 : f32
      %12 = vector.broadcast %cst_9 : f32 to vector<32x32xf32>
      %c0_10 = arith.constant 0 : index
      %c0_11 = arith.constant 0 : index
      %13 = vector.load %arg7[%c0_10, %c0_11] : memref<32x32xf32, #tpu.memory_space<vmem>>, vector<32x32xf32>
      tpu.vector_store %arg7[%c0_10, %c0_11], %12 {strides = array<i32>} : memref<32x32xf32, #tpu.memory_space<vmem>>, vector<32x32xf32>,
    } else {
    }
    %c0 = arith.constant 0 : index
    %c0_1 = arith.constant 0 : index
    %3 = vector.load %arg7[%c0, %c0_1] : memref<32x32xf32, #tpu.memory_space<vmem>>, vector<32x32xf32>
    %c0_2 = arith.constant 0 : index
    %c0_3 = arith.constant 0 : index
    %4 = vector.load %arg3[%c0_2, %c0_3] : memref<32x384xf32, #tpu.memory_space<vmem>>, vector<32x384xf32>
    %c0_4 = arith.constant 0 : index
    %c0_5 = arith.constant 0 : index
    %5 = vector.load %arg4[%c0_4, %c0_5] : memref<384x32xf32, #tpu.memory_space<vmem>>, vector<384x32xf32>
    %cst = arith.constant dense<0.000000e+00> : vector<32x32xf32>
    %6 = tpu.matmul %4, %5, %cst {dimension_numbers = #tpu.dot_dimension_numbers<[1], [0], [0], [1], [0, 0, 1, 1], [], []>} : vector<32x384xf32>, vector<384x32xf32>, vector<32x32xf32> -> vector<32x32xf32>
    %7 = arith.addf %3, %6 : vector<32x32xf32>
    %c0_6 = arith.constant 0 : index
    %c0_7 = arith.constant 0 : index
    %8 = vector.load %arg7[%c0_6, %c0_7] : memref<32x32xf32, #tpu.memory_space<vmem>>, vector<32x32xf32>
    tpu.vector_store %arg7[%c0_6, %c0_7], %7 {strides = array<i32>} : memref<32x32xf32, #tpu.memory_space<vmem>>, vector<32x32xf32>,
    %c1_i32 = arith.constant 1 : i32
    %9 = arith.cmpi eq, %arg2, %c1_i32 : i32
    %10 = arith.extui %9 : i1 to i32
    %c0_i32_8 = arith.constant 0 : i32
    %11 = arith.cmpi ne, %10, %c0_i32_8 : i32
    scf.if %11 {
      %c0_9 = arith.constant 0 : index
      %c0_10 = arith.constant 0 : index
      %12 = vector.load %arg7[%c0_9, %c0_10] : memref<32x32xf32, #tpu.memory_space<vmem>>, vector<32x32xf32>
      %c0_11 = arith.constant 0 : index
      %c0_12 = arith.constant 0 : index
      %13 = vector.load %arg5[%c0_11, %c0_12] : memref<1x32xf32, #tpu.memory_space<vmem>>, vector<1x32xf32>
      %14 = vector.broadcast %13 : vector<1x32xf32> to vector<32x32xf32>
      %15 = arith.addf %12, %14 : vector<32x32xf32>
      %c0_13 = arith.constant 0 : index
      %c0_14 = arith.constant 0 : index
      %16 = vector.load %arg6[%c0_13, %c0_14] : memref<32x32xf32, #tpu.memory_space<vmem>>, vector<32x32xf32>
      tpu.vector_store %arg6[%c0_13, %c0_14], %15 {strides = array<i32>} : memref<32x32xf32, #tpu.memory_space<vmem>>, vector<32x32xf32>,
    } else {
    }
    return
  }
  func.func @transform_0(%arg0: i32, %arg1: i32, %arg2: i32) -> (i32, i32) {
    %c0_i32 = arith.constant 0 : i32
    return %arg0, %arg2 : i32, i32
  }
  func.func @transform_1(%arg0: i32, %arg1: i32, %arg2: i32) -> (i32, i32) {
    %c0_i32 = arith.constant 0 : i32
    return %arg2, %arg1 : i32, i32
  }
  func.func @transform_2(%arg0: i32, %arg1: i32, %arg2: i32) -> (i32, i32) {
    %c0_i32 = arith.constant 0 : i32
    %c0_i32_0 = arith.constant 0 : i32
    return %c0_i32, %arg1 : i32, i32
  }
  func.func @transform_3(%arg0: i32, %arg1: i32, %arg2: i32) -> (i32, i32) {
    %c0_i32 = arith.constant 0 : i32
    return %arg0, %arg1 : i32, i32
  }
}

module attributes {stable_mosaic.version = 11 : i64} {
  func.func @_layernorm_kernel(%arg0: i32, %arg1: memref<32x32xf32, #tpu.memory_space<vmem>>, %arg2: memref<1x32xf32, #tpu.memory_space<vmem>>, %arg3: memref<1x32xf32, #tpu.memory_space<vmem>>, %arg4: memref<32x32xf32, #tpu.memory_space<vmem>>) attributes {dimension_semantics = [#tpu.dimension_semantics<parallel>], iteration_bounds = array<i64: 1>, scalar_prefetch = 0 : i64, scratch_operands = 0 : i64, tpu.core_type = #tpu.core_type<tc>, window_params = [{transform_indices = @transform_0, window_bounds = array<i64: 32, 32>}, {pipeline_mode = #tpu.pipeline_mode<synchronous>, transform_indices = @transform_1, window_bounds = array<i64: 1, 32>}, {pipeline_mode = #tpu.pipeline_mode<synchronous>, transform_indices = @transform_2, window_bounds = array<i64: 1, 32>}, {transform_indices = @transform_3, window_bounds = array<i64: 32, 32>}]} {
    %c0 = arith.constant 0 : index
    %c0_0 = arith.constant 0 : index
    %0 = vector.load %arg1[%c0, %c0_0] : memref<32x32xf32, #tpu.memory_space<vmem>>, vector<32x32xf32>
    %cst = arith.constant dense<0.000000e+00> : vector<32xf32>
    %1 = vector.multi_reduction <add>, %0, %cst [1] : vector<32x32xf32> to vector<32xf32>
    %2 = vector.shape_cast %1 : vector<32xf32> to vector<32x1xf32>
    %cst_1 = arith.constant 3.200000e+01 : f32
    %3 = vector.broadcast %cst_1 : f32 to vector<32x1xf32>
    %4 = arith.divf %2, %3 : vector<32x1xf32>
    %5 = vector.broadcast %4 : vector<32x1xf32> to vector<32x32xf32>
    %6 = arith.subf %0, %5 : vector<32x32xf32>
    %7 = arith.mulf %6, %6 : vector<32x32xf32>
    %cst_2 = arith.constant dense<0.000000e+00> : vector<32xf32>
    %8 = vector.multi_reduction <add>, %7, %cst_2 [1] : vector<32x32xf32> to vector<32xf32>
    %9 = vector.shape_cast %8 : vector<32xf32> to vector<32x1xf32>
    %cst_3 = arith.constant 3.200000e+01 : f32
    %10 = vector.broadcast %cst_3 : f32 to vector<32x1xf32>
    %11 = arith.divf %9, %10 : vector<32x1xf32>
    %cst_4 = arith.constant 9.99999974E-6 : f32
    %12 = vector.broadcast %cst_4 : f32 to vector<32x1xf32>
    %13 = arith.addf %11, %12 : vector<32x1xf32>
    %14 = math.rsqrt %13 : vector<32x1xf32>
    %15 = vector.broadcast %14 : vector<32x1xf32> to vector<32x32xf32>
    %16 = arith.mulf %6, %15 : vector<32x32xf32>
    %c0_5 = arith.constant 0 : index
    %c0_6 = arith.constant 0 : index
    %17 = vector.load %arg2[%c0_5, %c0_6] : memref<1x32xf32, #tpu.memory_space<vmem>>, vector<1x32xf32>
    %18 = vector.broadcast %17 : vector<1x32xf32> to vector<32x32xf32>
    %19 = arith.mulf %16, %18 : vector<32x32xf32>
    %c0_7 = arith.constant 0 : index
    %c0_8 = arith.constant 0 : index
    %20 = vector.load %arg3[%c0_7, %c0_8] : memref<1x32xf32, #tpu.memory_space<vmem>>, vector<1x32xf32>
    %21 = vector.broadcast %20 : vector<1x32xf32> to vector<32x32xf32>
    %22 = arith.addf %19, %21 : vector<32x32xf32>
    %c0_9 = arith.constant 0 : index
    %c0_10 = arith.constant 0 : index
    %23 = vector.load %arg4[%c0_9, %c0_10] : memref<32x32xf32, #tpu.memory_space<vmem>>, vector<32x32xf32>
    tpu.vector_store %arg4[%c0_9, %c0_10], %22 {strides = array<i32>} : memref<32x32xf32, #tpu.memory_space<vmem>>, vector<32x32xf32>,
    return
  }
  func.func @transform_0(%arg0: i32) -> (i32, i32) {
    %c0_i32 = arith.constant 0 : i32
    %c0_i32_0 = arith.constant 0 : i32
    return %arg0, %c0_i32 : i32, i32
  }
  func.func @transform_1(%arg0: i32) -> (i32, i32) {
    %c0_i32 = arith.constant 0 : i32
    %c0_i32_0 = arith.constant 0 : i32
    %c0_i32_1 = arith.constant 0 : i32
    return %c0_i32, %c0_i32_0 : i32, i32
  }
  func.func @transform_2(%arg0: i32) -> (i32, i32) {
    %c0_i32 = arith.constant 0 : i32
    %c0_i32_0 = arith.constant 0 : i32
    %c0_i32_1 = arith.constant 0 : i32
    return %c0_i32, %c0_i32_0 : i32, i32
  }
  func.func @transform_3(%arg0: i32) -> (i32, i32) {
    %c0_i32 = arith.constant 0 : i32
    %c0_i32_0 = arith.constant 0 : i32
    return %arg0, %c0_i32 : i32, i32
  }
}

module attributes {stable_mosaic.version = 11 : i64} {
  func.func @kernel(%arg0: i32, %arg1: i32, %arg2: i32, %arg3: memref<32x32xf32, #tpu.memory_space<vmem>>, %arg4: memref<32x96xf32, #tpu.memory_space<vmem>>, %arg5: memref<1x96xf32, #tpu.memory_space<vmem>>, %arg6: memref<32x96xf32, #tpu.memory_space<vmem>>, %arg7: memref<32x96xf32, #tpu.memory_space<vmem>>) attributes {dimension_semantics = [#tpu.dimension_semantics<parallel>, #tpu.dimension_semantics<parallel>, #tpu.dimension_semantics<arbitrary>], iteration_bounds = array<i64: 1, 1, 1>, scalar_prefetch = 0 : i64, scratch_operands = 1 : i64, tpu.core_type = #tpu.core_type<tc>, window_params = [{transform_indices = @transform_0, window_bounds = array<i64: 32, 32>}, {transform_indices = @transform_1, window_bounds = array<i64: 32, 96>}, {transform_indices = @transform_2, window_bounds = array<i64: 1, 96>}, {transform_indices = @transform_3, window_bounds = array<i64: 32, 96>}]} {
    %c0_i32 = arith.constant 0 : i32
    %0 = arith.cmpi eq, %arg2, %c0_i32 : i32
    %1 = arith.extui %0 : i1 to i32
    %c0_i32_0 = arith.constant 0 : i32
    %2 = arith.cmpi ne, %1, %c0_i32_0 : i32
    scf.if %2 {
      %cst_10 = arith.constant 0.000000e+00 : f32
      %12 = vector.broadcast %cst_10 : f32 to vector<32x96xf32>
      %c0_11 = arith.constant 0 : index
      %c0_12 = arith.constant 0 : index
      %13 = vector.load %arg7[%c0_11, %c0_12] : memref<32x96xf32, #tpu.memory_space<vmem>>, vector<32x96xf32>
      tpu.vector_store %arg7[%c0_11, %c0_12], %12 {strides = array<i32>} : memref<32x96xf32, #tpu.memory_space<vmem>>, vector<32x96xf32>,
    } else {
    }
    %c0 = arith.constant 0 : index
    %c0_1 = arith.constant 0 : index
    %3 = vector.load %arg7[%c0, %c0_1] : memref<32x96xf32, #tpu.memory_space<vmem>>, vector<32x96xf32>
    %c0_2 = arith.constant 0 : index
    %c0_3 = arith.constant 0 : index
    %4 = vector.load %arg3[%c0_2, %c0_3] : memref<32x32xf32, #tpu.memory_space<vmem>>, vector<32x32xf32>
    %c0_4 = arith.constant 0 : index
    %c0_5 = arith.constant 0 : index
    %5 = vector.load %arg4[%c0_4, %c0_5] : memref<32x96xf32, #tpu.memory_space<vmem>>, vector<32x96xf32>
    %cst = arith.constant dense<0.000000e+00> : vector<32x96xf32>
    %6 = tpu.matmul %4, %5, %cst {dimension_numbers = #tpu.dot_dimension_numbers<[1], [0], [0], [1], [0, 0, 1, 1], [], []>} : vector<32x32xf32>, vector<32x96xf32>, vector<32x96xf32> -> vector<32x96xf32>
    %7 = arith.addf %3, %6 : vector<32x96xf32>
    %c0_6 = arith.constant 0 : index
    %c0_7 = arith.constant 0 : index
    %8 = vector.load %arg7[%c0_6, %c0_7] : memref<32x96xf32, #tpu.memory_space<vmem>>, vector<32x96xf32>
    tpu.vector_store %arg7[%c0_6, %c0_7], %7 {strides = array<i32>} : memref<32x96xf32, #tpu.memory_space<vmem>>, vector<32x96xf32>,
    %c0_i32_8 = arith.constant 0 : i32
    %9 = arith.cmpi eq, %arg2, %c0_i32_8 : i32
    %10 = arith.extui %9 : i1 to i32
    %c0_i32_9 = arith.constant 0 : i32
    %11 = arith.cmpi ne, %10, %c0_i32_9 : i32
    scf.if %11 {
      %c0_10 = arith.constant 0 : index
      %c0_11 = arith.constant 0 : index
      %12 = vector.load %arg7[%c0_10, %c0_11] : memref<32x96xf32, #tpu.memory_space<vmem>>, vector<32x96xf32>
      %c0_12 = arith.constant 0 : index
      %c0_13 = arith.constant 0 : index
      %13 = vector.load %arg5[%c0_12, %c0_13] : memref<1x96xf32, #tpu.memory_space<vmem>>, vector<1x96xf32>
      %14 = vector.broadcast %13 : vector<1x96xf32> to vector<32x96xf32>
      %15 = arith.addf %12, %14 : vector<32x96xf32>
      %c0_14 = arith.constant 0 : index
      %c0_15 = arith.constant 0 : index
      %16 = vector.load %arg6[%c0_14, %c0_15] : memref<32x96xf32, #tpu.memory_space<vmem>>, vector<32x96xf32>
      tpu.vector_store %arg6[%c0_14, %c0_15], %15 {strides = array<i32>} : memref<32x96xf32, #tpu.memory_space<vmem>>, vector<32x96xf32>,
    } else {
    }
    return
  }
  func.func @transform_0(%arg0: i32, %arg1: i32, %arg2: i32) -> (i32, i32) {
    %c0_i32 = arith.constant 0 : i32
    return %arg0, %arg2 : i32, i32
  }
  func.func @transform_1(%arg0: i32, %arg1: i32, %arg2: i32) -> (i32, i32) {
    %c0_i32 = arith.constant 0 : i32
    return %arg2, %arg1 : i32, i32
  }
  func.func @transform_2(%arg0: i32, %arg1: i32, %arg2: i32) -> (i32, i32) {
    %c0_i32 = arith.constant 0 : i32
    %c0_i32_0 = arith.constant 0 : i32
    return %c0_i32, %arg1 : i32, i32
  }
  func.func @transform_3(%arg0: i32, %arg1: i32, %arg2: i32) -> (i32, i32) {
    %c0_i32 = arith.constant 0 : i32
    return %arg0, %arg1 : i32, i32
  }
}

module attributes {stable_mosaic.version = 11 : i64} {
  func.func @kernel(%arg0: i32, %arg1: i32, %arg2: i32, %arg3: memref<32x32xf32, #tpu.memory_space<vmem>>, %arg4: memref<32x128xf32, #tpu.memory_space<vmem>>, %arg5: memref<1x128xf32, #tpu.memory_space<vmem>>, %arg6: memref<32x128xf32, #tpu.memory_space<vmem>>, %arg7: memref<32x128xf32, #tpu.memory_space<vmem>>) attributes {dimension_semantics = [#tpu.dimension_semantics<parallel>, #tpu.dimension_semantics<parallel>, #tpu.dimension_semantics<arbitrary>], iteration_bounds = array<i64: 1, 1, 1>, scalar_prefetch = 0 : i64, scratch_operands = 1 : i64, tpu.core_type = #tpu.core_type<tc>, window_params = [{transform_indices = @transform_0, window_bounds = array<i64: 32, 32>}, {transform_indices = @transform_1, window_bounds = array<i64: 32, 128>}, {transform_indices = @transform_2, window_bounds = array<i64: 1, 128>}, {transform_indices = @transform_3, window_bounds = array<i64: 32, 128>}]} {
    %c0_i32 = arith.constant 0 : i32
    %0 = arith.cmpi eq, %arg2, %c0_i32 : i32
    %1 = arith.extui %0 : i1 to i32
    %c0_i32_0 = arith.constant 0 : i32
    %2 = arith.cmpi ne, %1, %c0_i32_0 : i32
    scf.if %2 {
      %cst_10 = arith.constant 0.000000e+00 : f32
      %12 = vector.broadcast %cst_10 : f32 to vector<32x128xf32>
      %c0_11 = arith.constant 0 : index
      %c0_12 = arith.constant 0 : index
      %13 = vector.load %arg7[%c0_11, %c0_12] : memref<32x128xf32, #tpu.memory_space<vmem>>, vector<32x128xf32>
      tpu.vector_store %arg7[%c0_11, %c0_12], %12 {strides = array<i32>} : memref<32x128xf32, #tpu.memory_space<vmem>>, vector<32x128xf32>,
    } else {
    }
    %c0 = arith.constant 0 : index
    %c0_1 = arith.constant 0 : index
    %3 = vector.load %arg7[%c0, %c0_1] : memref<32x128xf32, #tpu.memory_space<vmem>>, vector<32x128xf32>
    %c0_2 = arith.constant 0 : index
    %c0_3 = arith.constant 0 : index
    %4 = vector.load %arg3[%c0_2, %c0_3] : memref<32x32xf32, #tpu.memory_space<vmem>>, vector<32x32xf32>
    %c0_4 = arith.constant 0 : index
    %c0_5 = arith.constant 0 : index
    %5 = vector.load %arg4[%c0_4, %c0_5] : memref<32x128xf32, #tpu.memory_space<vmem>>, vector<32x128xf32>
    %cst = arith.constant dense<0.000000e+00> : vector<32x128xf32>
    %6 = tpu.matmul %4, %5, %cst {dimension_numbers = #tpu.dot_dimension_numbers<[1], [0], [0], [1], [0, 0, 1, 1], [], []>} : vector<32x32xf32>, vector<32x128xf32>, vector<32x128xf32> -> vector<32x128xf32>
    %7 = arith.addf %3, %6 : vector<32x128xf32>
    %c0_6 = arith.constant 0 : index
    %c0_7 = arith.constant 0 : index
    %8 = vector.load %arg7[%c0_6, %c0_7] : memref<32x128xf32, #tpu.memory_space<vmem>>, vector<32x128xf32>
    tpu.vector_store %arg7[%c0_6, %c0_7], %7 {strides = array<i32>} : memref<32x128xf32, #tpu.memory_space<vmem>>, vector<32x128xf32>,
    %c0_i32_8 = arith.constant 0 : i32
    %9 = arith.cmpi eq, %arg2, %c0_i32_8 : i32
    %10 = arith.extui %9 : i1 to i32
    %c0_i32_9 = arith.constant 0 : i32
    %11 = arith.cmpi ne, %10, %c0_i32_9 : i32
    scf.if %11 {
      %c0_10 = arith.constant 0 : index
      %c0_11 = arith.constant 0 : index
      %12 = vector.load %arg7[%c0_10, %c0_11] : memref<32x128xf32, #tpu.memory_space<vmem>>, vector<32x128xf32>
      %c0_12 = arith.constant 0 : index
      %c0_13 = arith.constant 0 : index
      %13 = vector.load %arg5[%c0_12, %c0_13] : memref<1x128xf32, #tpu.memory_space<vmem>>, vector<1x128xf32>
      %14 = vector.broadcast %13 : vector<1x128xf32> to vector<32x128xf32>
      %15 = arith.addf %12, %14 : vector<32x128xf32>
      %cst_14 = arith.constant 0.707106769 : f32
      %16 = vector.broadcast %cst_14 : f32 to vector<32x128xf32>
      %17 = arith.mulf %15, %16 : vector<32x128xf32>
      %cst_15 = arith.constant 0.000000e+00 : f32
      %18 = vector.broadcast %cst_15 : f32 to vector<32x128xf32>
      %19 = arith.cmpf olt, %17, %18 : vector<32x128xf32>
      %cst_16 = arith.constant -1.000000e+00 : f32
      %cst_17 = arith.constant 1.000000e+00 : f32
      %20 = vector.broadcast %cst_16 : f32 to vector<32x128xf32>
      %21 = vector.broadcast %cst_17 : f32 to vector<32x128xf32>
      %22 = arith.select %19, %20, %21 : vector<32x128xi1>, vector<32x128xf32>
      %23 = arith.mulf %17, %22 : vector<32x128xf32>
      %cst_18 = arith.constant 0.327591091 : f32
      %24 = vector.broadcast %cst_18 : f32 to vector<32x128xf32>
      %25 = arith.mulf %24, %23 : vector<32x128xf32>
      %cst_19 = arith.constant 1.000000e+00 : f32
      %26 = vector.broadcast %cst_19 : f32 to vector<32x128xf32>
      %27 = arith.addf %26, %25 : vector<32x128xf32>
      %cst_20 = arith.constant 1.000000e+00 : f32
      %28 = vector.broadcast %cst_20 : f32 to vector<32x128xf32>
      %29 = arith.divf %28, %27 : vector<32x128xf32>
      %cst_21 = arith.constant 1.06140542 : f32
      %30 = vector.broadcast %cst_21 : f32 to vector<32x128xf32>
      %31 = arith.mulf %29, %30 : vector<32x128xf32>
      %cst_22 = arith.constant -1.45315206 : f32
      %32 = vector.broadcast %cst_22 : f32 to vector<32x128xf32>
      %33 = arith.addf %32, %31 : vector<32x128xf32>
      %34 = arith.mulf %29, %33 : vector<32x128xf32>
      %cst_23 = arith.constant 1.42141378 : f32
      %35 = vector.broadcast %cst_23 : f32 to vector<32x128xf32>
      %36 = arith.addf %35, %34 : vector<32x128xf32>
      %37 = arith.mulf %29, %36 : vector<32x128xf32>
      %cst_24 = arith.constant -0.284496725 : f32
      %38 = vector.broadcast %cst_24 : f32 to vector<32x128xf32>
      %39 = arith.addf %38, %37 : vector<32x128xf32>
      %40 = arith.mulf %29, %39 : vector<32x128xf32>
      %cst_25 = arith.constant 0.254829586 : f32
      %41 = vector.broadcast %cst_25 : f32 to vector<32x128xf32>
      %42 = arith.addf %41, %40 : vector<32x128xf32>
      %43 = arith.mulf %29, %42 : vector<32x128xf32>
      %cst_26 = arith.constant 0.000000e+00 : f32
      %44 = vector.broadcast %cst_26 : f32 to vector<32x128xf32>
      %45 = arith.subf %44, %23 : vector<32x128xf32>
      %46 = arith.mulf %45, %23 : vector<32x128xf32>
      %47 = math.exp %46 : vector<32x128xf32>
      %48 = arith.mulf %43, %47 : vector<32x128xf32>
      %cst_27 = arith.constant 1.000000e+00 : f32
      %49 = vector.broadcast %cst_27 : f32 to vector<32x128xf32>
      %50 = arith.subf %49, %48 : vector<32x128xf32>
      %51 = arith.mulf %22, %50 : vector<32x128xf32>
      %cst_28 = arith.constant 5.000000e-01 : f32
      %52 = vector.broadcast %cst_28 : f32 to vector<32x128xf32>
      %53 = arith.mulf %52, %15 : vector<32x128xf32>
      %cst_29 = arith.constant 1.000000e+00 : f32
      %54 = vector.broadcast %cst_29 : f32 to vector<32x128xf32>
      %55 = arith.addf %54, %51 : vector<32x128xf32>
      %56 = arith.mulf %53, %55 : vector<32x128xf32>
      %c0_30 = arith.constant 0 : index
      %c0_31 = arith.constant 0 : index
      %57 = vector.load %arg6[%c0_30, %c0_31] : memref<32x128xf32, #tpu.memory_space<vmem>>, vector<32x128xf32>
      tpu.vector_store %arg6[%c0_30, %c0_31], %56 {strides = array<i32>} : memref<32x128xf32, #tpu.memory_space<vmem>>, vector<32x128xf32>,
    } else {
    }
    return
  }
  func.func @transform_0(%arg0: i32, %arg1: i32, %arg2: i32) -> (i32, i32) {
    %c0_i32 = arith.constant 0 : i32
    return %arg0, %arg2 : i32, i32
  }
  func.func @transform_1(%arg0: i32, %arg1: i32, %arg2: i32) -> (i32, i32) {
    %c0_i32 = arith.constant 0 : i32
    return %arg2, %arg1 : i32, i32
  }
  func.func @transform_2(%arg0: i32, %arg1: i32, %arg2: i32) -> (i32, i32) {
    %c0_i32 = arith.constant 0 : i32
    %c0_i32_0 = arith.constant 0 : i32
    return %c0_i32, %arg1 : i32, i32
  }
  func.func @transform_3(%arg0: i32, %arg1: i32, %arg2: i32) -> (i32, i32) {
    %c0_i32 = arith.constant 0 : i32
    return %arg0, %arg1 : i32, i32
  }
}

module attributes {stable_mosaic.version = 11 : i64} {
  func.func @_flash_kernel(%arg0: i32, %arg1: i32, %arg2: i32, %arg3: memref<1x16x8xf32, #tpu.memory_space<vmem>>, %arg4: memref<1x16x8xf32, #tpu.memory_space<vmem>>, %arg5: memref<1x16x8xf32, #tpu.memory_space<vmem>>, %arg6: memref<1x16x8xf32, #tpu.memory_space<vmem>>, %arg7: memref<16x1xf32, #tpu.memory_space<vmem>>, %arg8: memref<16x1xf32, #tpu.memory_space<vmem>>, %arg9: memref<16x8xf32, #tpu.memory_space<vmem>>) attributes {dimension_semantics = [#tpu.dimension_semantics<parallel>, #tpu.dimension_semantics<parallel>, #tpu.dimension_semantics<arbitrary>], iteration_bounds = array<i64: 8, 1, 1>, scalar_prefetch = 0 : i64, scratch_operands = 3 : i64, tpu.core_type = #tpu.core_type<tc>, window_params = [{transform_indices = @transform_0, window_bounds = array<i64: 1, 16, 8>}, {transform_indices = @transform_1, window_bounds = array<i64: 1, 16, 8>}, {transform_indices = @transform_2, window_bounds = array<i64: 1, 16, 8>}, {transform_indices = @transform_3, window_bounds = array<i64: 1, 16, 8>}]} {
    %c0_i32 = arith.constant 0 : i32
    %0 = arith.cmpi eq, %arg2, %c0_i32 : i32
    %1 = arith.extui %0 : i1 to i32
    %c0_i32_0 = arith.constant 0 : i32
    %2 = arith.cmpi ne, %1, %c0_i32_0 : i32
    scf.if %2 {
      %cst_27 = arith.constant 0xFF800000 : f32
      %37 = vector.broadcast %cst_27 : f32 to vector<16x1xf32>
      %c0_28 = arith.constant 0 : index
      %c0_29 = arith.constant 0 : index
      %38 = vector.load %arg7[%c0_28, %c0_29] : memref<16x1xf32, #tpu.memory_space<vmem>>, vector<16x1xf32>
      tpu.vector_store %arg7[%c0_28, %c0_29], %37 {strides = array<i32>} : memref<16x1xf32, #tpu.memory_space<vmem>>, vector<16x1xf32>,
      %cst_30 = arith.constant 0.000000e+00 : f32
      %39 = vector.broadcast %cst_30 : f32 to vector<16x1xf32>
      %c0_31 = arith.constant 0 : index
      %c0_32 = arith.constant 0 : index
      %40 = vector.load %arg8[%c0_31, %c0_32] : memref<16x1xf32, #tpu.memory_space<vmem>>, vector<16x1xf32>
      tpu.vector_store %arg8[%c0_31, %c0_32], %39 {strides = array<i32>} : memref<16x1xf32, #tpu.memory_space<vmem>>, vector<16x1xf32>,
      %cst_33 = arith.constant 0.000000e+00 : f32
      %41 = vector.broadcast %cst_33 : f32 to vector<16x8xf32>
      %c0_34 = arith.constant 0 : index
      %c0_35 = arith.constant 0 : index
      %42 = vector.load %arg9[%c0_34, %c0_35] : memref<16x8xf32, #tpu.memory_space<vmem>>, vector<16x8xf32>
      tpu.vector_store %arg9[%c0_34, %c0_35], %41 {strides = array<i32>} : memref<16x8xf32, #tpu.memory_space<vmem>>, vector<16x8xf32>,
    } else {
    }
    %c0 = arith.constant 0 : index
    %c0_1 = arith.constant 0 : index
    %c0_2 = arith.constant 0 : index
    %3 = vector.load %arg3[%c0, %c0_1, %c0_2] : memref<1x16x8xf32, #tpu.memory_space<vmem>>, vector<1x16x8xf32>
    %4 = vector.shape_cast %3 : vector<1x16x8xf32> to vector<16x8xf32>
    %cst = arith.constant 0.353553385 : f32
    %5 = vector.broadcast %cst : f32 to vector<16x8xf32>
    %6 = arith.mulf %4, %5 : vector<16x8xf32>
    %c0_3 = arith.constant 0 : index
    %c0_4 = arith.constant 0 : index
    %c0_5 = arith.constant 0 : index
    %7 = vector.load %arg4[%c0_3, %c0_4, %c0_5] : memref<1x16x8xf32, #tpu.memory_space<vmem>>, vector<1x16x8xf32>
    %8 = vector.shape_cast %7 : vector<1x16x8xf32> to vector<16x8xf32>
    %c0_6 = arith.constant 0 : index
    %c0_7 = arith.constant 0 : index
    %c0_8 = arith.constant 0 : index
    %9 = vector.load %arg5[%c0_6, %c0_7, %c0_8] : memref<1x16x8xf32, #tpu.memory_space<vmem>>, vector<1x16x8xf32>
    %10 = vector.shape_cast %9 : vector<1x16x8xf32> to vector<16x8xf32>
    %cst_9 = arith.constant dense<0.000000e+00> : vector<16x16xf32>
    %11 = tpu.matmul %6, %8, %cst_9 {dimension_numbers = #tpu.dot_dimension_numbers<[1], [1], [0], [0], [0, 0, 1, 0], [], []>} : vector<16x8xf32>, vector<16x8xf32>, vector<16x16xf32> -> vector<16x16xf32>
    %c0_10 = arith.constant 0 : index
    %c0_11 = arith.constant 0 : index
    %12 = vector.load %arg7[%c0_10, %c0_11] : memref<16x1xf32, #tpu.memory_space<vmem>>, vector<16x1xf32>
    %cst_12 = arith.constant dense<0xFF800000> : vector<16xf32>
    %13 = vector.multi_reduction <maximumf>, %11, %cst_12 [1] : vector<16x16xf32> to vector<16xf32>
    %14 = vector.shape_cast %13 : vector<16xf32> to vector<16x1xf32>
    %15 = arith.maximumf %12, %14 : vector<16x1xf32>
    %16 = arith.subf %12, %15 : vector<16x1xf32>
    %17 = math.exp %16 : vector<16x1xf32>
    %18 = vector.broadcast %15 : vector<16x1xf32> to vector<16x16xf32>
    %19 = arith.subf %11, %18 : vector<16x16xf32>
    %20 = math.exp %19 : vector<16x16xf32>
    %c0_13 = arith.constant 0 : index
    %c0_14 = arith.constant 0 : index
    %21 = vector.load %arg8[%c0_13, %c0_14] : memref<16x1xf32, #tpu.memory_space<vmem>>, vector<16x1xf32>
    %22 = arith.mulf %17, %21 : vector<16x1xf32>
    %cst_15 = arith.constant dense<0.000000e+00> : vector<16xf32>
    %23 = vector.multi_reduction <add>, %20, %cst_15 [1] : vector<16x16xf32> to vector<16xf32>
    %24 = vector.shape_cast %23 : vector<16xf32> to vector<16x1xf32>
    %25 = arith.addf %22, %24 : vector<16x1xf32>
    %c0_16 = arith.constant 0 : index
    %c0_17 = arith.constant 0 : index
    %26 = vector.load %arg8[%c0_16, %c0_17] : memref<16x1xf32, #tpu.memory_space<vmem>>, vector<16x1xf32>
    tpu.vector_store %arg8[%c0_16, %c0_17], %25 {strides = array<i32>} : memref<16x1xf32, #tpu.memory_space<vmem>>, vector<16x1xf32>,
    %c0_18 = arith.constant 0 : index
    %c0_19 = arith.constant 0 : index
    %27 = vector.load %arg9[%c0_18, %c0_19] : memref<16x8xf32, #tpu.memory_space<vmem>>, vector<16x8xf32>
    %28 = vector.broadcast %17 : vector<16x1xf32> to vector<16x8xf32>
    %29 = arith.mulf %28, %27 : vector<16x8xf32>
    %cst_20 = arith.constant dense<0.000000e+00> : vector<16x8xf32>
    %30 = tpu.matmul %20, %10, %cst_20 {dimension_numbers = #tpu.dot_dimension_numbers<[1], [0], [0], [1], [0, 0, 1, 1], [], []>} : vector<16x16xf32>, vector<16x8xf32>, vector<16x8xf32> -> vector<16x8xf32>
    %31 = arith.addf %29, %30 : vector<16x8xf32>
    %c0_21 = arith.constant 0 : index
    %c0_22 = arith.constant 0 : index
    %32 = vector.load %arg9[%c0_21, %c0_22] : memref<16x8xf32, #tpu.memory_space<vmem>>, vector<16x8xf32>
    tpu.vector_store %arg9[%c0_21, %c0_22], %31 {strides = array<i32>} : memref<16x8xf32, #tpu.memory_space<vmem>>, vector<16x8xf32>,
    %c0_23 = arith.constant 0 : index
    %c0_24 = arith.constant 0 : index
    %33 = vector.load %arg7[%c0_23, %c0_24] : memref<16x1xf32, #tpu.memory_space<vmem>>, vector<16x1xf32>
    tpu.vector_store %arg7[%c0_23, %c0_24], %15 {strides = array<i32>} : memref<16x1xf32, #tpu.memory_space<vmem>>, vector<16x1xf32>,
    %c0_i32_25 = arith.constant 0 : i32
    %34 = arith.cmpi eq, %arg2, %c0_i32_25 : i32
    %35 = arith.extui %34 : i1 to i32
    %c0_i32_26 = arith.constant 0 : i32
    %36 = arith.cmpi ne, %35, %c0_i32_26 : i32
    scf.if %36 {
      %c0_27 = arith.constant 0 : index
      %c0_28 = arith.constant 0 : index
      %37 = vector.load %arg9[%c0_27, %c0_28] : memref<16x8xf32, #tpu.memory_space<vmem>>, vector<16x8xf32>
      %c0_29 = arith.constant 0 : index
      %c0_30 = arith.constant 0 : index
      %38 = vector.load %arg8[%c0_29, %c0_30] : memref<16x1xf32, #tpu.memory_space<vmem>>, vector<16x1xf32>
      %39 = tpu.reciprocal %38 {approx = true} : vector<16x1xf32> -> vector<16x1xf32>
      %40 = vector.broadcast %39 : vector<16x1xf32> to vector<16x8xf32>
      %41 = arith.mulf %37, %40 : vector<16x8xf32>
      %c0_31 = arith.constant 0 : index
      %c0_32 = arith.constant 0 : index
      %c0_33 = arith.constant 0 : index
      %42 = vector.load %arg6[%c0_31, %c0_32, %c0_33] : memref<1x16x8xf32, #tpu.memory_space<vmem>>, vector<1x16x8xf32>
      %43 = vector.shape_cast %42 : vector<1x16x8xf32> to vector<16x8xf32>
      %44 = vector.shape_cast %41 : vector<16x8xf32> to vector<1x16x8xf32>
      tpu.vector_store %arg6[%c0_31, %c0_32, %c0_33], %44 {strides = array<i32>} : memref<1x16x8xf32, #tpu.memory_space<vmem>>, vector<1x16x8xf32>,
    } else {
    }
    return
  }
  func.func @transform_0(%arg0: i32, %arg1: i32, %arg2: i32) -> (i32, i32, i32) {
    %c0_i32 = arith.constant 0 : i32
    %c0_i32_0 = arith.constant 0 : i32
    return %arg0, %arg1, %c0_i32 : i32, i32, i32
  }
  func.func @transform_1(%arg0: i32, %arg1: i32, %arg2: i32) -> (i32, i32, i32) {
    %c0_i32 = arith.constant 0 : i32
    %c0_i32_0 = arith.constant 0 : i32
    return %arg0, %arg2, %c0_i32 : i32, i32, i32
  }
  func.func @transform_2(%arg0: i32, %arg1: i32, %arg2: i32) -> (i32, i32, i32) {
    %c0_i32 = arith.constant 0 : i32
    %c0_i32_0 = arith.constant 0 : i32
    return %arg0, %arg2, %c0_i32 : i32, i32, i32
  }
  func.func @transform_3(%arg0: i32, %arg1: i32, %arg2: i32) -> (i32, i32, i32) {
    %c0_i32 = arith.constant 0 : i32
    %c0_i32_0 = arith.constant 0 : i32
    return %arg0, %arg1, %c0_i32 : i32, i32, i32
  }
}

module attributes {stable_mosaic.version = 11 : i64} {
  func.func @kernel(%arg0: i32, %arg1: i32, %arg2: i32, %arg3: memref<32x128xf32, #tpu.memory_space<vmem>>, %arg4: memref<128x32xf32, #tpu.memory_space<vmem>>, %arg5: memref<1x32xf32, #tpu.memory_space<vmem>>, %arg6: memref<32x32xf32, #tpu.memory_space<vmem>>, %arg7: memref<32x32xf32, #tpu.memory_space<vmem>>, %arg8: memref<32x32xf32, #tpu.memory_space<vmem>>) attributes {dimension_semantics = [#tpu.dimension_semantics<parallel>, #tpu.dimension_semantics<parallel>, #tpu.dimension_semantics<arbitrary>], iteration_bounds = array<i64: 1, 1, 1>, scalar_prefetch = 0 : i64, scratch_operands = 1 : i64, tpu.core_type = #tpu.core_type<tc>, window_params = [{transform_indices = @transform_0, window_bounds = array<i64: 32, 128>}, {transform_indices = @transform_1, window_bounds = array<i64: 128, 32>}, {transform_indices = @transform_2, window_bounds = array<i64: 1, 32>}, {transform_indices = @transform_3, window_bounds = array<i64: 32, 32>}, {transform_indices = @transform_4, window_bounds = array<i64: 32, 32>}]} {
    %c0_i32 = arith.constant 0 : i32
    %0 = arith.cmpi eq, %arg2, %c0_i32 : i32
    %1 = arith.extui %0 : i1 to i32
    %c0_i32_0 = arith.constant 0 : i32
    %2 = arith.cmpi ne, %1, %c0_i32_0 : i32
    scf.if %2 {
      %cst_10 = arith.constant 0.000000e+00 : f32
      %12 = vector.broadcast %cst_10 : f32 to vector<32x32xf32>
      %c0_11 = arith.constant 0 : index
      %c0_12 = arith.constant 0 : index
      %13 = vector.load %arg8[%c0_11, %c0_12] : memref<32x32xf32, #tpu.memory_space<vmem>>, vector<32x32xf32>
      tpu.vector_store %arg8[%c0_11, %c0_12], %12 {strides = array<i32>} : memref<32x32xf32, #tpu.memory_space<vmem>>, vector<32x32xf32>,
    } else {
    }
    %c0 = arith.constant 0 : index
    %c0_1 = arith.constant 0 : index
    %3 = vector.load %arg8[%c0, %c0_1] : memref<32x32xf32, #tpu.memory_space<vmem>>, vector<32x32xf32>
    %c0_2 = arith.constant 0 : index
    %c0_3 = arith.constant 0 : index
    %4 = vector.load %arg3[%c0_2, %c0_3] : memref<32x128xf32, #tpu.memory_space<vmem>>, vector<32x128xf32>
    %c0_4 = arith.constant 0 : index
    %c0_5 = arith.constant 0 : index
    %5 = vector.load %arg4[%c0_4, %c0_5] : memref<128x32xf32, #tpu.memory_space<vmem>>, vector<128x32xf32>
    %cst = arith.constant dense<0.000000e+00> : vector<32x32xf32>
    %6 = tpu.matmul %4, %5, %cst {dimension_numbers = #tpu.dot_dimension_numbers<[1], [0], [0], [1], [0, 0, 1, 1], [], []>} : vector<32x128xf32>, vector<128x32xf32>, vector<32x32xf32> -> vector<32x32xf32>
    %7 = arith.addf %3, %6 : vector<32x32xf32>
    %c0_6 = arith.constant 0 : index
    %c0_7 = arith.constant 0 : index
    %8 = vector.load %arg8[%c0_6, %c0_7] : memref<32x32xf32, #tpu.memory_space<vmem>>, vector<32x32xf32>
    tpu.vector_store %arg8[%c0_6, %c0_7], %7 {strides = array<i32>} : memref<32x32xf32, #tpu.memory_space<vmem>>, vector<32x32xf32>,
    %c0_i32_8 = arith.constant 0 : i32
    %9 = arith.cmpi eq, %arg2, %c0_i32_8 : i32
    %10 = arith.extui %9 : i1 to i32
    %c0_i32_9 = arith.constant 0 : i32
    %11 = arith.cmpi ne, %10, %c0_i32_9 : i32
    scf.if %11 {
      %c0_10 = arith.constant 0 : index
      %c0_11 = arith.constant 0 : index
      %12 = vector.load %arg8[%c0_10, %c0_11] : memref<32x32xf32, #tpu.memory_space<vmem>>, vector<32x32xf32>
      %c0_12 = arith.constant 0 : index
      %c0_13 = arith.constant 0 : index
      %13 = vector.load %arg5[%c0_12, %c0_13] : memref<1x32xf32, #tpu.memory_space<vmem>>, vector<1x32xf32>
      %14 = vector.broadcast %13 : vector<1x32xf32> to vector<32x32xf32>
      %15 = arith.addf %12, %14 : vector<32x32xf32>
      %c0_14 = arith.constant 0 : index
      %c0_15 = arith.constant 0 : index
      %16 = vector.load %arg6[%c0_14, %c0_15] : memref<32x32xf32, #tpu.memory_space<vmem>>, vector<32x32xf32>
      %17 = arith.addf %15, %16 : vector<32x32xf32>
      %c0_16 = arith.constant 0 : index
      %c0_17 = arith.constant 0 : index
      %18 = vector.load %arg7[%c0_16, %c0_17] : memref<32x32xf32, #tpu.memory_space<vmem>>, vector<32x32xf32>
      tpu.vector_store %arg7[%c0_16, %c0_17], %17 {strides = array<i32>} : memref<32x32xf32, #tpu.memory_space<vmem>>, vector<32x32xf32>,
    } else {
    }
    return
  }
  func.func @transform_0(%arg0: i32, %arg1: i32, %arg2: i32) -> (i32, i32) {
    %c0_i32 = arith.constant 0 : i32
    return %arg0, %arg2 : i32, i32
  }
  func.func @transform_1(%arg0: i32, %arg1: i32, %arg2: i32) -> (i32, i32) {
    %c0_i32 = arith.constant 0 : i32
    return %arg2, %arg1 : i32, i32
  }
  func.func @transform_2(%arg0: i32, %arg1: i32, %arg2: i32) -> (i32, i32) {
    %c0_i32 = arith.constant 0 : i32
    %c0_i32_0 = arith.constant 0 : i32
    return %c0_i32, %arg1 : i32, i32
  }
  func.func @transform_3(%arg0: i32, %arg1: i32, %arg2: i32) -> (i32, i32) {
    %c0_i32 = arith.constant 0 : i32
    return %arg0, %arg1 : i32, i32
  }
  func.func @transform_4(%arg0: i32, %arg1: i32, %arg2: i32) -> (i32, i32) {
    %c0_i32 = arith.constant 0 : i32
    return %arg0, %arg1 : i32, i32
  }
}

module attributes {stable_mosaic.version = 11 : i64} {
  func.func @kernel(%arg0: i32, %arg1: i32, %arg2: i32, %arg3: memref<32x32xf32, #tpu.memory_space<vmem>>, %arg4: memref<32x32xf32, #tpu.memory_space<vmem>>, %arg5: memref<1x32xf32, #tpu.memory_space<vmem>>, %arg6: memref<32x32xf32, #tpu.memory_space<vmem>>, %arg7: memref<32x32xf32, #tpu.memory_space<vmem>>, %arg8: memref<32x32xf32, #tpu.memory_space<vmem>>) attributes {dimension_semantics = [#tpu.dimension_semantics<parallel>, #tpu.dimension_semantics<parallel>, #tpu.dimension_semantics<arbitrary>], iteration_bounds = array<i64: 1, 1, 1>, scalar_prefetch = 0 : i64, scratch_operands = 1 : i64, tpu.core_type = #tpu.core_type<tc>, window_params = [{transform_indices = @transform_0, window_bounds = array<i64: 32, 32>}, {transform_indices = @transform_1, window_bounds = array<i64: 32, 32>}, {transform_indices = @transform_2, window_bounds = array<i64: 1, 32>}, {transform_indices = @transform_3, window_bounds = array<i64: 32, 32>}, {transform_indices = @transform_4, window_bounds = array<i64: 32, 32>}]} {
    %c0_i32 = arith.constant 0 : i32
    %0 = arith.cmpi eq, %arg2, %c0_i32 : i32
    %1 = arith.extui %0 : i1 to i32
    %c0_i32_0 = arith.constant 0 : i32
    %2 = arith.cmpi ne, %1, %c0_i32_0 : i32
    scf.if %2 {
      %cst_10 = arith.constant 0.000000e+00 : f32
      %12 = vector.broadcast %cst_10 : f32 to vector<32x32xf32>
      %c0_11 = arith.constant 0 : index
      %c0_12 = arith.constant 0 : index
      %13 = vector.load %arg8[%c0_11, %c0_12] : memref<32x32xf32, #tpu.memory_space<vmem>>, vector<32x32xf32>
      tpu.vector_store %arg8[%c0_11, %c0_12], %12 {strides = array<i32>} : memref<32x32xf32, #tpu.memory_space<vmem>>, vector<32x32xf32>,
    } else {
    }
    %c0 = arith.constant 0 : index
    %c0_1 = arith.constant 0 : index
    %3 = vector.load %arg8[%c0, %c0_1] : memref<32x32xf32, #tpu.memory_space<vmem>>, vector<32x32xf32>
    %c0_2 = arith.constant 0 : index
    %c0_3 = arith.constant 0 : index
    %4 = vector.load %arg3[%c0_2, %c0_3] : memref<32x32xf32, #tpu.memory_space<vmem>>, vector<32x32xf32>
    %c0_4 = arith.constant 0 : index
    %c0_5 = arith.constant 0 : index
    %5 = vector.load %arg4[%c0_4, %c0_5] : memref<32x32xf32, #tpu.memory_space<vmem>>, vector<32x32xf32>
    %cst = arith.constant dense<0.000000e+00> : vector<32x32xf32>
    %6 = tpu.matmul %4, %5, %cst {dimension_numbers = #tpu.dot_dimension_numbers<[1], [0], [0], [1], [0, 0, 1, 1], [], []>} : vector<32x32xf32>, vector<32x32xf32>, vector<32x32xf32> -> vector<32x32xf32>
    %7 = arith.addf %3, %6 : vector<32x32xf32>
    %c0_6 = arith.constant 0 : index
    %c0_7 = arith.constant 0 : index
    %8 = vector.load %arg8[%c0_6, %c0_7] : memref<32x32xf32, #tpu.memory_space<vmem>>, vector<32x32xf32>
    tpu.vector_store %arg8[%c0_6, %c0_7], %7 {strides = array<i32>} : memref<32x32xf32, #tpu.memory_space<vmem>>, vector<32x32xf32>,
    %c0_i32_8 = arith.constant 0 : i32
    %9 = arith.cmpi eq, %arg2, %c0_i32_8 : i32
    %10 = arith.extui %9 : i1 to i32
    %c0_i32_9 = arith.constant 0 : i32
    %11 = arith.cmpi ne, %10, %c0_i32_9 : i32
    scf.if %11 {
      %c0_10 = arith.constant 0 : index
      %c0_11 = arith.constant 0 : index
      %12 = vector.load %arg8[%c0_10, %c0_11] : memref<32x32xf32, #tpu.memory_space<vmem>>, vector<32x32xf32>
      %c0_12 = arith.constant 0 : index
      %c0_13 = arith.constant 0 : index
      %13 = vector.load %arg5[%c0_12, %c0_13] : memref<1x32xf32, #tpu.memory_space<vmem>>, vector<1x32xf32>
      %14 = vector.broadcast %13 : vector<1x32xf32> to vector<32x32xf32>
      %15 = arith.addf %12, %14 : vector<32x32xf32>
      %c0_14 = arith.constant 0 : index
      %c0_15 = arith.constant 0 : index
      %16 = vector.load %arg6[%c0_14, %c0_15] : memref<32x32xf32, #tpu.memory_space<vmem>>, vector<32x32xf32>
      %17 = arith.addf %15, %16 : vector<32x32xf32>
      %c0_16 = arith.constant 0 : index
      %c0_17 = arith.constant 0 : index
      %18 = vector.load %arg7[%c0_16, %c0_17] : memref<32x32xf32, #tpu.memory_space<vmem>>, vector<32x32xf32>
      tpu.vector_store %arg7[%c0_16, %c0_17], %17 {strides = array<i32>} : memref<32x32xf32, #tpu.memory_space<vmem>>, vector<32x32xf32>,
    } else {
    }
    return
  }
  func.func @transform_0(%arg0: i32, %arg1: i32, %arg2: i32) -> (i32, i32) {
    %c0_i32 = arith.constant 0 : i32
    return %arg0, %arg2 : i32, i32
  }
  func.func @transform_1(%arg0: i32, %arg1: i32, %arg2: i32) -> (i32, i32) {
    %c0_i32 = arith.constant 0 : i32
    return %arg2, %arg1 : i32, i32
  }
  func.func @transform_2(%arg0: i32, %arg1: i32, %arg2: i32) -> (i32, i32) {
    %c0_i32 = arith.constant 0 : i32
    %c0_i32_0 = arith.constant 0 : i32
    return %c0_i32, %arg1 : i32, i32
  }
  func.func @transform_3(%arg0: i32, %arg1: i32, %arg2: i32) -> (i32, i32) {
    %c0_i32 = arith.constant 0 : i32
    return %arg0, %arg1 : i32, i32
  }
  func.func @transform_4(%arg0: i32, %arg1: i32, %arg2: i32) -> (i32, i32) {
    %c0_i32 = arith.constant 0 : i32
    return %arg0, %arg1 : i32, i32
  }
}

module attributes {stable_mosaic.version = 11 : i64} {
  func.func @kernel(%arg0: i32, %arg1: i32, %arg2: i32, %arg3: memref<32x32xf32, #tpu.memory_space<vmem>>, %arg4: memref<32x32xf32, #tpu.memory_space<vmem>>, %arg5: memref<32x32xf32, #tpu.memory_space<vmem>>, %arg6: memref<32x32xf32, #tpu.memory_space<vmem>>) attributes {dimension_semantics = [#tpu.dimension_semantics<parallel>, #tpu.dimension_semantics<parallel>, #tpu.dimension_semantics<arbitrary>], iteration_bounds = array<i64: 1, 1, 1>, scalar_prefetch = 0 : i64, scratch_operands = 1 : i64, tpu.core_type = #tpu.core_type<tc>, window_params = [{transform_indices = @transform_0, window_bounds = array<i64: 32, 32>}, {transform_indices = @transform_1, window_bounds = array<i64: 32, 32>}, {transform_indices = @transform_2, window_bounds = array<i64: 32, 32>}]} {
    %c0_i32 = arith.constant 0 : i32
    %0 = arith.cmpi eq, %arg2, %c0_i32 : i32
    %1 = arith.extui %0 : i1 to i32
    %c0_i32_0 = arith.constant 0 : i32
    %2 = arith.cmpi ne, %1, %c0_i32_0 : i32
    scf.if %2 {
      %cst_10 = arith.constant 0.000000e+00 : f32
      %12 = vector.broadcast %cst_10 : f32 to vector<32x32xf32>
      %c0_11 = arith.constant 0 : index
      %c0_12 = arith.constant 0 : index
      %13 = vector.load %arg6[%c0_11, %c0_12] : memref<32x32xf32, #tpu.memory_space<vmem>>, vector<32x32xf32>
      tpu.vector_store %arg6[%c0_11, %c0_12], %12 {strides = array<i32>} : memref<32x32xf32, #tpu.memory_space<vmem>>, vector<32x32xf32>,
    } else {
    }
    %c0 = arith.constant 0 : index
    %c0_1 = arith.constant 0 : index
    %3 = vector.load %arg6[%c0, %c0_1] : memref<32x32xf32, #tpu.memory_space<vmem>>, vector<32x32xf32>
    %c0_2 = arith.constant 0 : index
    %c0_3 = arith.constant 0 : index
    %4 = vector.load %arg3[%c0_2, %c0_3] : memref<32x32xf32, #tpu.memory_space<vmem>>, vector<32x32xf32>
    %c0_4 = arith.constant 0 : index
    %c0_5 = arith.constant 0 : index
    %5 = vector.load %arg4[%c0_4, %c0_5] : memref<32x32xf32, #tpu.memory_space<vmem>>, vector<32x32xf32>
    %cst = arith.constant dense<0.000000e+00> : vector<32x32xf32>
    %6 = tpu.matmul %4, %5, %cst {dimension_numbers = #tpu.dot_dimension_numbers<[1], [0], [0], [1], [0, 0, 1, 1], [], []>} : vector<32x32xf32>, vector<32x32xf32>, vector<32x32xf32> -> vector<32x32xf32>
    %7 = arith.addf %3, %6 : vector<32x32xf32>
    %c0_6 = arith.constant 0 : index
    %c0_7 = arith.constant 0 : index
    %8 = vector.load %arg6[%c0_6, %c0_7] : memref<32x32xf32, #tpu.memory_space<vmem>>, vector<32x32xf32>
    tpu.vector_store %arg6[%c0_6, %c0_7], %7 {strides = array<i32>} : memref<32x32xf32, #tpu.memory_space<vmem>>, vector<32x32xf32>,
    %c0_i32_8 = arith.constant 0 : i32
    %9 = arith.cmpi eq, %arg2, %c0_i32_8 : i32
    %10 = arith.extui %9 : i1 to i32
    %c0_i32_9 = arith.constant 0 : i32
    %11 = arith.cmpi ne, %10, %c0_i32_9 : i32
    scf.if %11 {
      %c0_10 = arith.constant 0 : index
      %c0_11 = arith.constant 0 : index
      %12 = vector.load %arg6[%c0_10, %c0_11] : memref<32x32xf32, #tpu.memory_space<vmem>>, vector<32x32xf32>
      %c0_12 = arith.constant 0 : index
      %c0_13 = arith.constant 0 : index
      %13 = vector.load %arg5[%c0_12, %c0_13] : memref<32x32xf32, #tpu.memory_space<vmem>>, vector<32x32xf32>
      tpu.vector_store %arg5[%c0_12, %c0_13], %12 {strides = array<i32>} : memref<32x32xf32, #tpu.memory_space<vmem>>, vector<32x32xf32>,
    } else {
    }
    return
  }
  func.func @transform_0(%arg0: i32, %arg1: i32, %arg2: i32) -> (i32, i32) {
    %c0_i32 = arith.constant 0 : i32
    return %arg0, %arg2 : i32, i32
  }
  func.func @transform_1(%arg0: i32, %arg1: i32, %arg2: i32) -> (i32, i32) {
    %c0_i32 = arith.constant 0 : i32
    return %arg2, %arg1 : i32, i32
  }
  func.func @transform_2(%arg0: i32, %arg1: i32, %arg2: i32) -> (i32, i32) {
    %c0_i32 = arith.constant 0 : i32
    return %arg0, %arg1 : i32, i32
  }
}

module attributes {stable_mosaic.version = 11 : i64} {
  func.func @_layernorm_kernel(%arg0: i32, %arg1: memref<32x32xf32, #tpu.memory_space<vmem>>, %arg2: memref<1x32xf32, #tpu.memory_space<vmem>>, %arg3: memref<1x32xf32, #tpu.memory_space<vmem>>, %arg4: memref<32x32xf32, #tpu.memory_space<vmem>>) attributes {dimension_semantics = [#tpu.dimension_semantics<parallel>], iteration_bounds = array<i64: 1>, scalar_prefetch = 0 : i64, scratch_operands = 0 : i64, tpu.core_type = #tpu.core_type<tc>, window_params = [{transform_indices = @transform_0, window_bounds = array<i64: 32, 32>}, {pipeline_mode = #tpu.pipeline_mode<synchronous>, transform_indices = @transform_1, window_bounds = array<i64: 1, 32>}, {pipeline_mode = #tpu.pipeline_mode<synchronous>, transform_indices = @transform_2, window_bounds = array<i64: 1, 32>}, {transform_indices = @transform_3, window_bounds = array<i64: 32, 32>}]} {
    %c0 = arith.constant 0 : index
    %c0_0 = arith.constant 0 : index
    %0 = vector.load %arg1[%c0, %c0_0] : memref<32x32xf32, #tpu.memory_space<vmem>>, vector<32x32xf32>
    %cst = arith.constant dense<0.000000e+00> : vector<32xf32>
    %1 = vector.multi_reduction <add>, %0, %cst [1] : vector<32x32xf32> to vector<32xf32>
    %2 = vector.shape_cast %1 : vector<32xf32> to vector<32x1xf32>
    %cst_1 = arith.constant 3.200000e+01 : f32
    %3 = vector.broadcast %cst_1 : f32 to vector<32x1xf32>
    %4 = arith.divf %2, %3 : vector<32x1xf32>
    %5 = vector.broadcast %4 : vector<32x1xf32> to vector<32x32xf32>
    %6 = arith.subf %0, %5 : vector<32x32xf32>
    %7 = arith.mulf %6, %6 : vector<32x32xf32>
    %cst_2 = arith.constant dense<0.000000e+00> : vector<32xf32>
    %8 = vector.multi_reduction <add>, %7, %cst_2 [1] : vector<32x32xf32> to vector<32xf32>
    %9 = vector.shape_cast %8 : vector<32xf32> to vector<32x1xf32>
    %cst_3 = arith.constant 3.200000e+01 : f32
    %10 = vector.broadcast %cst_3 : f32 to vector<32x1xf32>
    %11 = arith.divf %9, %10 : vector<32x1xf32>
    %cst_4 = arith.constant 9.99999997E-7 : f32
    %12 = vector.broadcast %cst_4 : f32 to vector<32x1xf32>
    %13 = arith.addf %11, %12 : vector<32x1xf32>
    %14 = math.rsqrt %13 : vector<32x1xf32>
    %15 = vector.broadcast %14 : vector<32x1xf32> to vector<32x32xf32>
    %16 = arith.mulf %6, %15 : vector<32x32xf32>
    %c0_5 = arith.constant 0 : index
    %c0_6 = arith.constant 0 : index
    %17 = vector.load %arg2[%c0_5, %c0_6] : memref<1x32xf32, #tpu.memory_space<vmem>>, vector<1x32xf32>
    %18 = vector.broadcast %17 : vector<1x32xf32> to vector<32x32xf32>
    %19 = arith.mulf %16, %18 : vector<32x32xf32>
    %c0_7 = arith.constant 0 : index
    %c0_8 = arith.constant 0 : index
    %20 = vector.load %arg3[%c0_7, %c0_8] : memref<1x32xf32, #tpu.memory_space<vmem>>, vector<1x32xf32>
    %21 = vector.broadcast %20 : vector<1x32xf32> to vector<32x32xf32>
    %22 = arith.addf %19, %21 : vector<32x32xf32>
    %c0_9 = arith.constant 0 : index
    %c0_10 = arith.constant 0 : index
    %23 = vector.load %arg4[%c0_9, %c0_10] : memref<32x32xf32, #tpu.memory_space<vmem>>, vector<32x32xf32>
    tpu.vector_store %arg4[%c0_9, %c0_10], %22 {strides = array<i32>} : memref<32x32xf32, #tpu.memory_space<vmem>>, vector<32x32xf32>,
    return
  }
  func.func @transform_0(%arg0: i32) -> (i32, i32) {
    %c0_i32 = arith.constant 0 : i32
    %c0_i32_0 = arith.constant 0 : i32
    return %arg0, %c0_i32 : i32, i32
  }
  func.func @transform_1(%arg0: i32) -> (i32, i32) {
    %c0_i32 = arith.constant 0 : i32
    %c0_i32_0 = arith.constant 0 : i32
    %c0_i32_1 = arith.constant 0 : i32
    return %c0_i32, %c0_i32_0 : i32, i32
  }
  func.func @transform_2(%arg0: i32) -> (i32, i32) {
    %c0_i32 = arith.constant 0 : i32
    %c0_i32_0 = arith.constant 0 : i32
    %c0_i32_1 = arith.constant 0 : i32
    return %c0_i32, %c0_i32_0 : i32, i32
  }
  func.func @transform_3(%arg0: i32) -> (i32, i32) {
    %c0_i32 = arith.constant 0 : i32
    %c0_i32_0 = arith.constant 0 : i32
    return %arg0, %c0_i32 : i32, i32
  }
}

module attributes {stable_mosaic.version = 11 : i64} {
  func.func @kernel(%arg0: i32, %arg1: i32, %arg2: i32, %arg3: memref<32x288xf32, #tpu.memory_space<vmem>>, %arg4: memref<288x32xf32, #tpu.memory_space<vmem>>, %arg5: memref<32x32xf32, #tpu.memory_space<vmem>>, %arg6: memref<32x32xf32, #tpu.memory_space<vmem>>) attributes {dimension_semantics = [#tpu.dimension_semantics<parallel>, #tpu.dimension_semantics<parallel>, #tpu.dimension_semantics<arbitrary>], iteration_bounds = array<i64: 1, 1, 1>, scalar_prefetch = 0 : i64, scratch_operands = 1 : i64, tpu.core_type = #tpu.core_type<tc>, window_params = [{transform_indices = @transform_0, window_bounds = array<i64: 32, 288>}, {transform_indices = @transform_1, window_bounds = array<i64: 288, 32>}, {transform_indices = @transform_2, window_bounds = array<i64: 32, 32>}]} {
    %c0_i32 = arith.constant 0 : i32
    %0 = arith.cmpi eq, %arg2, %c0_i32 : i32
    %1 = arith.extui %0 : i1 to i32
    %c0_i32_0 = arith.constant 0 : i32
    %2 = arith.cmpi ne, %1, %c0_i32_0 : i32
    scf.if %2 {
      %cst_10 = arith.constant 0.000000e+00 : f32
      %12 = vector.broadcast %cst_10 : f32 to vector<32x32xf32>
      %c0_11 = arith.constant 0 : index
      %c0_12 = arith.constant 0 : index
      %13 = vector.load %arg6[%c0_11, %c0_12] : memref<32x32xf32, #tpu.memory_space<vmem>>, vector<32x32xf32>
      tpu.vector_store %arg6[%c0_11, %c0_12], %12 {strides = array<i32>} : memref<32x32xf32, #tpu.memory_space<vmem>>, vector<32x32xf32>,
    } else {
    }
    %c0 = arith.constant 0 : index
    %c0_1 = arith.constant 0 : index
    %3 = vector.load %arg6[%c0, %c0_1] : memref<32x32xf32, #tpu.memory_space<vmem>>, vector<32x32xf32>
    %c0_2 = arith.constant 0 : index
    %c0_3 = arith.constant 0 : index
    %4 = vector.load %arg3[%c0_2, %c0_3] : memref<32x288xf32, #tpu.memory_space<vmem>>, vector<32x288xf32>
    %c0_4 = arith.constant 0 : index
    %c0_5 = arith.constant 0 : index
    %5 = vector.load %arg4[%c0_4, %c0_5] : memref<288x32xf32, #tpu.memory_space<vmem>>, vector<288x32xf32>
    %cst = arith.constant dense<0.000000e+00> : vector<32x32xf32>
    %6 = tpu.matmul %4, %5, %cst {dimension_numbers = #tpu.dot_dimension_numbers<[1], [0], [0], [1], [0, 0, 1, 1], [], []>} : vector<32x288xf32>, vector<288x32xf32>, vector<32x32xf32> -> vector<32x32xf32>
    %7 = arith.addf %3, %6 : vector<32x32xf32>
    %c0_6 = arith.constant 0 : index
    %c0_7 = arith.constant 0 : index
    %8 = vector.load %arg6[%c0_6, %c0_7] : memref<32x32xf32, #tpu.memory_space<vmem>>, vector<32x32xf32>
    tpu.vector_store %arg6[%c0_6, %c0_7], %7 {strides = array<i32>} : memref<32x32xf32, #tpu.memory_space<vmem>>, vector<32x32xf32>,
    %c0_i32_8 = arith.constant 0 : i32
    %9 = arith.cmpi eq, %arg2, %c0_i32_8 : i32
    %10 = arith.extui %9 : i1 to i32
    %c0_i32_9 = arith.constant 0 : i32
    %11 = arith.cmpi ne, %10, %c0_i32_9 : i32
    scf.if %11 {
      %c0_10 = arith.constant 0 : index
      %c0_11 = arith.constant 0 : index
      %12 = vector.load %arg6[%c0_10, %c0_11] : memref<32x32xf32, #tpu.memory_space<vmem>>, vector<32x32xf32>
      %c0_12 = arith.constant 0 : index
      %c0_13 = arith.constant 0 : index
      %13 = vector.load %arg5[%c0_12, %c0_13] : memref<32x32xf32, #tpu.memory_space<vmem>>, vector<32x32xf32>
      tpu.vector_store %arg5[%c0_12, %c0_13], %12 {strides = array<i32>} : memref<32x32xf32, #tpu.memory_space<vmem>>, vector<32x32xf32>,
    } else {
    }
    return
  }
  func.func @transform_0(%arg0: i32, %arg1: i32, %arg2: i32) -> (i32, i32) {
    %c0_i32 = arith.constant 0 : i32
    return %arg0, %arg2 : i32, i32
  }
  func.func @transform_1(%arg0: i32, %arg1: i32, %arg2: i32) -> (i32, i32) {
    %c0_i32 = arith.constant 0 : i32
    return %arg2, %arg1 : i32, i32
  }
  func.func @transform_2(%arg0: i32, %arg1: i32, %arg2: i32) -> (i32, i32) {
    %c0_i32 = arith.constant 0 : i32
    return %arg0, %arg1 : i32, i32
  }
}

module attributes {stable_mosaic.version = 11 : i64} {
  func.func @_layernorm_kernel(%arg0: i32, %arg1: memref<32x32xf32, #tpu.memory_space<vmem>>, %arg2: memref<1x32xf32, #tpu.memory_space<vmem>>, %arg3: memref<1x32xf32, #tpu.memory_space<vmem>>, %arg4: memref<32x32xf32, #tpu.memory_space<vmem>>) attributes {dimension_semantics = [#tpu.dimension_semantics<parallel>], iteration_bounds = array<i64: 1>, scalar_prefetch = 0 : i64, scratch_operands = 0 : i64, tpu.core_type = #tpu.core_type<tc>, window_params = [{transform_indices = @transform_0, window_bounds = array<i64: 32, 32>}, {pipeline_mode = #tpu.pipeline_mode<synchronous>, transform_indices = @transform_1, window_bounds = array<i64: 1, 32>}, {pipeline_mode = #tpu.pipeline_mode<synchronous>, transform_indices = @transform_2, window_bounds = array<i64: 1, 32>}, {transform_indices = @transform_3, window_bounds = array<i64: 32, 32>}]} {
    %c0 = arith.constant 0 : index
    %c0_0 = arith.constant 0 : index
    %0 = vector.load %arg1[%c0, %c0_0] : memref<32x32xf32, #tpu.memory_space<vmem>>, vector<32x32xf32>
    %cst = arith.constant dense<0.000000e+00> : vector<32xf32>
    %1 = vector.multi_reduction <add>, %0, %cst [1] : vector<32x32xf32> to vector<32xf32>
    %2 = vector.shape_cast %1 : vector<32xf32> to vector<32x1xf32>
    %cst_1 = arith.constant 3.200000e+01 : f32
    %3 = vector.broadcast %cst_1 : f32 to vector<32x1xf32>
    %4 = arith.divf %2, %3 : vector<32x1xf32>
    %5 = vector.broadcast %4 : vector<32x1xf32> to vector<32x32xf32>
    %6 = arith.subf %0, %5 : vector<32x32xf32>
    %7 = arith.mulf %6, %6 : vector<32x32xf32>
    %cst_2 = arith.constant dense<0.000000e+00> : vector<32xf32>
    %8 = vector.multi_reduction <add>, %7, %cst_2 [1] : vector<32x32xf32> to vector<32xf32>
    %9 = vector.shape_cast %8 : vector<32xf32> to vector<32x1xf32>
    %cst_3 = arith.constant 3.200000e+01 : f32
    %10 = vector.broadcast %cst_3 : f32 to vector<32x1xf32>
    %11 = arith.divf %9, %10 : vector<32x1xf32>
    %cst_4 = arith.constant 9.99999997E-7 : f32
    %12 = vector.broadcast %cst_4 : f32 to vector<32x1xf32>
    %13 = arith.addf %11, %12 : vector<32x1xf32>
    %14 = math.rsqrt %13 : vector<32x1xf32>
    %15 = vector.broadcast %14 : vector<32x1xf32> to vector<32x32xf32>
    %16 = arith.mulf %6, %15 : vector<32x32xf32>
    %c0_5 = arith.constant 0 : index
    %c0_6 = arith.constant 0 : index
    %17 = vector.load %arg2[%c0_5, %c0_6] : memref<1x32xf32, #tpu.memory_space<vmem>>, vector<1x32xf32>
    %18 = vector.broadcast %17 : vector<1x32xf32> to vector<32x32xf32>
    %19 = arith.mulf %16, %18 : vector<32x32xf32>
    %c0_7 = arith.constant 0 : index
    %c0_8 = arith.constant 0 : index
    %20 = vector.load %arg3[%c0_7, %c0_8] : memref<1x32xf32, #tpu.memory_space<vmem>>, vector<1x32xf32>
    %21 = vector.broadcast %20 : vector<1x32xf32> to vector<32x32xf32>
    %22 = arith.addf %19, %21 : vector<32x32xf32>
    %c0_9 = arith.constant 0 : index
    %c0_10 = arith.constant 0 : index
    %23 = vector.load %arg4[%c0_9, %c0_10] : memref<32x32xf32, #tpu.memory_space<vmem>>, vector<32x32xf32>
    tpu.vector_store %arg4[%c0_9, %c0_10], %22 {strides = array<i32>} : memref<32x32xf32, #tpu.memory_space<vmem>>, vector<32x32xf32>,
    return
  }
  func.func @transform_0(%arg0: i32) -> (i32, i32) {
    %c0_i32 = arith.constant 0 : i32
    %c0_i32_0 = arith.constant 0 : i32
    return %arg0, %c0_i32 : i32, i32
  }
  func.func @transform_1(%arg0: i32) -> (i32, i32) {
    %c0_i32 = arith.constant 0 : i32
    %c0_i32_0 = arith.constant 0 : i32
    %c0_i32_1 = arith.constant 0 : i32
    return %c0_i32, %c0_i32_0 : i32, i32
  }
  func.func @transform_2(%arg0: i32) -> (i32, i32) {
    %c0_i32 = arith.constant 0 : i32
    %c0_i32_0 = arith.constant 0 : i32
    %c0_i32_1 = arith.constant 0 : i32
    return %c0_i32, %c0_i32_0 : i32, i32
  }
  func.func @transform_3(%arg0: i32) -> (i32, i32) {
    %c0_i32 = arith.constant 0 : i32
    %c0_i32_0 = arith.constant 0 : i32
    return %arg0, %c0_i32 : i32, i32
  }
}

</mosaic_0001>

<bundles_post_ra>
// kernel: image_encoder_vit.20
= control target key start
LH: loop header
LB: loop body
LE: loop exit
PB: predicated region body
PF: predicated region fallthrough
CT: control target
= control target key end

     0   :  { %vm18_vm0 = vcmask 261120   ;;  %v151_v8 = vmov 32.0   ;;  %s229_s0 = inlined_call_operand.vmem [shape: f32[32,32], index: 0, kind: input, shape index: {}]   ;;  %s230_s1 = inlined_call_operand.vmem [shape: f32[1,32], index: 1, kind: input, shape index: {}]   ;;  %s231_s2 = inlined_call_operand.vmem [shape: f32[1,32], index: 2, kind: input, shape index: {}]   ;;  %s232_s3 = inlined_call_operand.vmem [shape: f32[32,32], index: 3, kind: output, shape index: {}]  }
   0x1   :  { %v16_v0 = vld [vmem:[%s229_s0 + $0x10] sm:$0xff]  ;;  %v14_v1 = vld [vmem:[%s229_s0] sm:$0xff]  ;;  %v17_v4 = vld [vmem:[%s229_s0 + $0x18] sm:$0xff]  ;;  %141 = vrcp.f32 %v151_v8 }
   0x2   :  { %v25_v2 = vsel %vm18_vm0, %v16_v0, 0.0  ;;  %v19_v3 = vsel %vm18_vm0, %v14_v1, 0.0  ;;  %v15_v5 = vld [vmem:[%s229_s0 + $0x8] sm:$0xff]  ;;  %v28_v6 = vsel %vm18_vm0, %v17_v4, 0.0  ;;  %v139_v61 = vld [vmem:[%s230_s1] ss:$0 sm:$0xff] }
   0x3   :  { %26 = vadd.xlane.f32.xlu1 %v25_v2  ;;  %20 = vadd.xlane.f32.xlu0 %v19_v3  ;;  %v22_v7 = vsel %vm18_vm0, %v15_v5, 0.0  ;;  %v140_v2 = vld [vmem:[%s231_s2] ss:$0 sm:$0xff] }
   0x7   :  { %v142_v9 = vpop.eup %141 }
   0x8   :  { %v32_v10 = vmul.f32 32.0, %v142_v9  ;;  %vm36_vm1 = vweird.f32 %v142_v9 }
   0xa   :  { %v33_v11 = vsub.f32 1.0, %v32_v10 }
   0xb   :  { %29 = vadd.xlane.f32.xlu1 %v28_v6  ;;  %23 = vadd.xlane.f32.xlu0 %v22_v7 }
   0xc   :  { %v34_v12 = vmul.f32 %v142_v9, %v33_v11 }
   0xe   :  { %v35_v13 = vadd.f32 %v142_v9, %v34_v12 }
  0x10   :  { %v37_v14 = vsel %vm36_vm1, %v142_v9, %v35_v13 }
  0x76   :  { %v27_v15 = vpop.xlane.xlu1 %26  ;;  %v21_v16 = vpop.xlane.xlu0 %20 }
  0x77   :  { %v40_v17 = vmul.f32 %v37_v14, %v27_v15  ;;  %v38_v18 = vmul.f32 %v37_v14, %v21_v16 }
  0x79   :  { %v188_v19 = vsub.f32 %v16_v0, %v40_v17  ;;  %v42_v20 = vsub.f32 %v14_v1, %v38_v18 }
  0x7b   :  { %v48_v21 = vmul.f32 %v188_v19, %v188_v19  ;;  %v46_v22 = vmul.f32 %v42_v20, %v42_v20 }
  0x7d   :  { %v56_v23 = vsel %vm18_vm0, %v48_v21, 0.0  ;;  %v50_v24 = vsel %vm18_vm0, %v46_v22, 0.0 }
  0x7e   :  { %v30_v25 = vpop.xlane.xlu1 %29  ;;  %57 = vadd.xlane.f32.xlu0 %v56_v23  ;;  %51 = vadd.xlane.f32.xlu2 %v50_v24  ;;  %v24_v26 = vpop.xlane.xlu0 %23 }
  0x7f   :  { %v41_v27 = vmul.f32 %v37_v14, %v30_v25  ;;  %v39_v28 = vmul.f32 %v37_v14, %v24_v26 }
  0x81   :  { %v194_v29 = vsub.f32 %v17_v4, %v41_v27  ;;  %v196_v30 = vsub.f32 %v15_v5, %v39_v28 }
  0x83   :  { %v49_v31 = vmul.f32 %v194_v29, %v194_v29  ;;  %v47_v32 = vmul.f32 %v196_v30, %v196_v30 }
  0x85   :  { %v59_v33 = vsel %vm18_vm0, %v49_v31, 0.0  ;;  %v53_v34 = vsel %vm18_vm0, %v47_v32, 0.0 }
  0x86   :  { %60 = vadd.xlane.f32.xlu1 %v59_v33  ;;  %54 = vadd.xlane.f32.xlu2 %v53_v34 }
  0xf1   :  { %v52_v35 = vpop.xlane.xlu2 %51  ;;  %v58_v36 = vpop.xlane.xlu0 %57 }
  0xf2   :  { %v62_v37 = vmul.f32 %v52_v35, %v37_v14  ;;  %v64_v38 = vmul.f32 %v58_v36, %v37_v14 }
  0xf4   :  { %v66_v39 = vadd.f32 1e-05, %v62_v37  ;;  %v68_v40 = vadd.f32 1e-05, %v64_v38 }
  0xf6   :  { %143 = vrsqrt.f32 %v66_v39  ;;  %vm76_vm4 = vweird.f32 %v66_v39  ;;  %vm96_vm6 = vweird.f32 %v68_v40 }
  0xf7   :  { %145 = vrsqrt.f32 %v68_v40 }
  0xf9   :  { %v61_v41 = vpop.xlane.xlu1 %60  ;;  %v55_v42 = vpop.xlane.xlu2 %54 }
  0xfa   :  { %v65_v43 = vmul.f32 %v61_v41, %v37_v14  ;;  %v63_v44 = vmul.f32 %v55_v42, %v37_v14 }
  0xfc   :  { %v144_v45 = vpop.eup %143  ;;  %v69_v46 = vadd.f32 1e-05, %v65_v43  ;;  %v67_v47 = vadd.f32 1e-05, %v63_v44 }
  0xfd   :  { %v146_v48 = vpop.eup %145  ;;  %v71_v49 = vmul.f32 %v144_v45, %v66_v39  ;;  %vm77_vm2 = vweird.f32 %v144_v45 }
  0xfe   :  { %v91_v50 = vmul.f32 %v146_v48, %v68_v40  ;;  %147 = vrsqrt.f32 %v69_v46  ;;  %vm97_vm3 = vweird.f32 %v146_v48  ;;  %vm78_vm5 = vmor %vm76_vm4, %vm77_vm2  ;;  %vm106_vm10 = vweird.f32 %v69_v46 }
  0xff   :  { %v72_v51 = vmul.f32 %v144_v45, %v71_v49  ;;  %149 = vrsqrt.f32 %v67_v47  ;;  %vm98_vm7 = vmor %vm96_vm6, %vm97_vm3  ;;  %vm86_vm12 = vweird.f32 %v67_v47 }
 0x100   :  { %v92_v52 = vmul.f32 %v146_v48, %v91_v50 }
 0x101   :  { %v73_v53 = vmul.f32 0.5, %v72_v51 }
 0x102   :  { %v93_v54 = vmul.f32 0.5, %v92_v52 }
 0x103   :  { %v74_v55 = vsub.f32 1.5, %v73_v53 }
 0x104   :  { %v148_v56 = vpop.eup %147  ;;  %v94_v57 = vsub.f32 1.5, %v93_v54 }
 0x105   :  { %v150_v58 = vpop.eup %149  ;;  %v75_v59 = vmul.f32 %v144_v45, %v74_v55  ;;  %v101_v60 = vmul.f32 %v148_v56, %v69_v46  ;;  %vm107_vm8 = vweird.f32 %v148_v56 }
 0x106   :  { %v95_v62 = vmul.f32 %v146_v48, %v94_v57  ;;  %v81_v63 = vmul.f32 %v150_v58, %v67_v47  ;;  %vm87_vm9 = vweird.f32 %v150_v58  ;;  %vm108_vm11 = vmor %vm106_vm10, %vm107_vm8 }
 0x107   :  { %v79_v0 = vsel %vm78_vm5, %v144_v45, %v75_v59  ;;  %v102_v1 = vmul.f32 %v148_v56, %v101_v60  ;;  %vm88_vm13 = vmor %vm86_vm12, %vm87_vm9 }
 0x108   :  { %v110_v3 = vmul.f32 %v79_v0, %v42_v20  ;;  %v99_v4 = vsel %vm98_vm7, %v146_v48, %v95_v62  ;;  %v82_v5 = vmul.f32 %v150_v58, %v81_v63 }
 0x109   :  { %v112_v6 = vmul.f32 %v99_v4, %v188_v19  ;;  %v103_v7 = vmul.f32 0.5, %v102_v1 }
 0x10a   :  { %v118_v8 = vmul.f32 %v139_v61, %v110_v3  ;;  %v83_v9 = vmul.f32 0.5, %v82_v5 }
 0x10b   :  { %v120_v10 = vmul.f32 %v139_v61, %v112_v6  ;;  %v104_v11 = vsub.f32 1.5, %v103_v7 }
 0x10c   :  { %v126_v12 = vadd.f32 %v140_v2, %v118_v8  ;;  %v84_v13 = vsub.f32 1.5, %v83_v9 }
 0x10d   :  { %v128_v14 = vadd.f32 %v140_v2, %v120_v10  ;;  %v105_v15 = vmul.f32 %v148_v56, %v104_v11 }
 0x10e   :  { %130 = vst.msk [vmem:[%s232_s3] sm:$0xff] %vm18_vm0, %v126_v12  ;;  %v85_v16 = vmul.f32 %v150_v58, %v84_v13 }
 0x10f   :  { %132 = vst.msk [vmem:[%s232_s3 + $0x10] sm:$0xff] %vm18_vm0, %v128_v14  ;;  %v109_v17 = vsel %vm108_vm11, %v148_v56, %v105_v15 }
 0x110   :  { %v113_v18 = vmul.f32 %v109_v17, %v194_v29  ;;  %v89_v19 = vsel %vm88_vm13, %v150_v58, %v85_v16 }
 0x111   :  { %v111_v20 = vmul.f32 %v89_v19, %v196_v30 }
 0x112   :  { %v121_v21 = vmul.f32 %v139_v61, %v113_v18 }
 0x113   :  { %v119_v22 = vmul.f32 %v139_v61, %v111_v20 }
 0x114   :  { %v129_v23 = vadd.f32 %v140_v2, %v121_v21 }
 0x115   :  { %v127_v24 = vadd.f32 %v140_v2, %v119_v22 }
 0x116   :  { %133 = vst.msk [vmem:[%s232_s3 + $0x18] sm:$0xff] %vm18_vm0, %v129_v23 }
 0x117   :  { %131 = vst.msk [vmem:[%s232_s3 + $0x8] sm:$0xff] %vm18_vm0, %v127_v24 }

// kernel: image_encoder_vit.19
= control target key start
LH: loop header
LB: loop body
LE: loop exit
PB: predicated region body
PF: predicated region fallthrough
CT: control target
= control target key end

     0   :  { %s730_s12 = smov 0   ;;  %s732_s13 = smov 0   ;;  %s884_s0 = inlined_call_operand.vmem [shape: f32[32,768], index: 0, kind: input, shape index: {}]   ;;  %s885_s1 = inlined_call_operand.vmem [shape: f32[768,32], index: 1, kind: input, shape index: {}]   ;;  %s886_s2 = inlined_call_operand.vmem [shape: f32[1,32], index: 2, kind: input, shape index: {}]   ;;  %s887_s3 = inlined_call_operand.vmem [shape: f32[32,32], index: 3, kind: output, shape index: {}]  }
   0x1   :  { %s734_s14 = smov 0   ;;  %s736_s15 = smov 0  }
   0x2   :  { %s738_s16 = smov 0  }
   0x3 LB: > { %s25_s17 = sadd.s32 1, %s703_s15  ;;  %p48_p1 = scmp.ne.s32.totalorder %s695_s13, %s691_s12  ;;  %s707_s16 = sphi %s738_s16, %s13_s16   ;;  %s703_s15 = sphi %s736_s15, %s891_s15   ;;  %s699_s14 = sphi %s734_s14, %s890_s14   ;;  %s695_s13 = sphi %s732_s13, %s889_s13   ;;  %s691_s12 = sphi %s730_s12, %s888_s12  }
   0x4   : > { %p26_p0 = scmp.ge.s32.totalorder %s25_s17, 2  ;;  %p49_p2 = scmp.eq.s32.totalorder %s707_s16, 0 }
   0x5   : > { %s41_s19 = sadd.s32 1, %s695_s13  ;;  %p598_p5 = scmp.ge.s32.totalorder %s707_s16, 2 }
   0x6   : > { %s893_s17 = smov (%p26_p0, %s25_s17), 0  ;;  %p50_p3 = por %p49_p2, %p48_p1 }
   0x7   : > { %s37_s18 = ssub.s32 %s703_s15, %s893_s17  ;;  %162 = sbr.rel (%p598_p5) target bundleno = 29 (0x1d), region = 20 }
   0x8   : > { %p39_p4 = scmp.eq.s32.totalorder %s37_s18, 0 }
   0xa   : > { %s765_s20 = scalar_select %p39_p4, %s695_s13, %s41_s19  }
   0xc   : > { %165 = sbr.rel (!%p50_p3) target bundleno = 29 (0x1d), region = 24  ;;  %s167_s21 = sand.u32 (%p50_p3), 1, %s695_s13  }
   0xd   : > { %s608_s22 = smul.u32 (%p50_p3), 24, %s703_s15 }
   0xe   : > { %s625_s23 = smul.u32 (%p50_p3), 96, %s167_s21 }
   0xf   : > { %s175_s26 = scalar_lea.vmem (%p50_p3), %s884_s0, %s608_s22 }
  0x10   : > { %v188_v0 = vld [vmem:[%s175_s26] sm:$0xff] (%p50_p3)  ;;  %v190_v1 = vld [vmem:[%s175_s26 + $0x8] sm:$0xff] (%p50_p3)  ;;  %v192_v2 = vld [vmem:[%s175_s26 + $0x10] sm:$0xff] (%p50_p3)  ;;  %s169_s27 = scalar_lea.vmem (%p50_p3), [#allocation3], %s625_s23 }
  0x11   : > { %189 = vst [vmem:[%s169_s27] sm:$0xff] %v188_v0  ;;  %v194_v3 = vld [vmem:[%s175_s26 + $0x30] sm:$0xff]  ;;  %v196_v4 = vld [vmem:[%s175_s26 + $0x38] sm:$0xff]  ;;  %v198_v5 = vld [vmem:[%s175_s26 + $0x40] sm:$0xff] }
  0x12   : > { %191 = vst [vmem:[%s169_s27 + $0x8] sm:$0xff] %v190_v1  ;;  %v200_v6 = vld [vmem:[%s175_s26 + $0x60] sm:$0xff]  ;;  %v202_v7 = vld [vmem:[%s175_s26 + $0x68] sm:$0xff]  ;;  %v204_v8 = vld [vmem:[%s175_s26 + $0x70] sm:$0xff] }
  0x13   : > { %193 = vst [vmem:[%s169_s27 + $0x10] sm:$0xff] %v192_v2  ;;  %v206_v9 = vld [vmem:[%s175_s26 + $0x90] sm:$0xff]  ;;  %v208_v10 = vld [vmem:[%s175_s26 + $0x98] sm:$0xff]  ;;  %v210_v11 = vld [vmem:[%s175_s26 + $0xa0] sm:$0xff] }
  0x14   : > { %195 = vst [vmem:[%s169_s27 + $0x18] sm:$0xff] %v194_v3 }
  0x15   : > { %197 = vst [vmem:[%s169_s27 + $0x20] sm:$0xff] %v196_v4 }
  0x16   : > { %199 = vst [vmem:[%s169_s27 + $0x28] sm:$0xff] %v198_v5 }
  0x17   : > { %201 = vst [vmem:[%s169_s27 + $0x30] sm:$0xff] %v200_v6 }
  0x18   : > { %203 = vst [vmem:[%s169_s27 + $0x38] sm:$0xff] %v202_v7 }
  0x19   : > { %205 = vst [vmem:[%s169_s27 + $0x40] sm:$0xff] %v204_v8 }
  0x1a   : > { %207 = vst [vmem:[%s169_s27 + $0x48] sm:$0xff] %v206_v9 }
  0x1b   : > { %209 = vst [vmem:[%s169_s27 + $0x50] sm:$0xff] %v208_v10 }
  0x1c   : > { %211 = vst [vmem:[%s169_s27 + $0x58] sm:$0xff] %v210_v11 }
  0x1d PF: > { %p600_p6 = scmp.ge.s32.totalorder %s707_s16, 1  ;;  %p228_p7 = scmp.lt.s32.totalorder %s707_s16, 3 }
  0x1f   : > { %p229_p8 = pnand %p600_p6, %p228_p7 }
  0x20   : > { %s235_s28 = sand.u32 (!%p229_p8), 1, %s691_s12   ;;  %s274_s29 = smul.u32 (!%p229_p8), 48, %s699_s14 }
  0x21   : > { %232 = sbr.rel (%p229_p8) target bundleno = 251 (0xfb), region = 51  ;;  %p602_p10 = scmp.ne.s32.totalorder (!%p229_p8), %s699_s14, 0 }
  0x22   : > { %s626_s30 = smul.u32 (!%p229_p8), 96, %s235_s28  ;;  %p275_p9 = scmp.lt.s32.totalorder (!%p229_p8), %s274_s29, 95 }
  0x24   : > { %s782_s8 = scalar_lea.vmem (!%p229_p8), [#allocation3], %s626_s30 }
  0x26   : > { %s895_s29 = smov (!%p275_p9, %s274_s29), 95  ;;  %298 = sbr.rel (%p602_p10) target bundleno = 48 (0x30), region = 59 }
  0x27   : > { %s601_s4 = sshll.u32 %s895_s29, 3 }
  0x28   : > { %s780_s7 = scalar_lea.vmem %s885_s1, %s601_s4 }
  0x2b   : > { %vm299_vm0 = vcmask 261120   ;;  %v709_v12 = vmov 0.0  }
  0x2c   : > { %300 = vst.msk [vmem:[#allocation2] sm:$0xff] %vm299_vm0, %v709_v12 }
  0x2d   : > { %301 = vst.msk [vmem:[#allocation2 + $0x8] sm:$0xff] %vm299_vm0, %v709_v12 }
  0x2e   : > { %302 = vst.msk [vmem:[#allocation2 + $0x10] sm:$0xff] %vm299_vm0, %v709_v12 }
  0x2f   : > { %303 = vst.msk [vmem:[#allocation2 + $0x18] sm:$0xff] %vm299_vm0, %v709_v12 }
  0x30 PF: > { %v367_v13 = vld [vmem:[%s780_s7 + $0x178] sm:$0xff]  ;;  %v366_v14 = vld [vmem:[%s780_s7 + $0x170] sm:$0xff]  ;;  %v365_v18 = vld [vmem:[%s780_s7 + $0x168] sm:$0xff]  ;;  %vm459_vm1 = vcmask 261120   ;;  %p603_p11 = scmp.ne.s32.totalorder %s699_s14, 1 }
  0x31   : > { %v335_v15 = vld [vmem:[%s780_s7 + $0x78] sm:$0xff]  ;;  %426 = vmatpush.msra.mxu2 %v367_v13  ;;  %v334_v17 = vld [vmem:[%s780_s7 + $0x70] sm:$0xff]  ;;  %v333_v20 = vld [vmem:[%s780_s7 + $0x68] sm:$0xff] }
  0x32   : > { %368 = vmatpush.msra.mxu0 %v335_v15  ;;  %v351_v16 = vld [vmem:[%s780_s7 + $0xf8] sm:$0xff]  ;;  %609 = vmatpush.msra.mxu3 %v335_v15  ;;  %v350_v19 = vld [vmem:[%s780_s7 + $0xf0] sm:$0xff]  ;;  %v349_v21 = vld [vmem:[%s780_s7 + $0xe8] sm:$0xff] }
  0x33   : > { %397 = vmatpush.msra.mxu1 %v351_v16  ;;  %427 = vmatpush.msra.mxu2 %v366_v14  ;;  %v364_v22 = vld [vmem:[%s780_s7 + $0x160] sm:$0xff]  ;;  %v363_v25 = vld [vmem:[%s780_s7 + $0x158] sm:$0xff]  ;;  %v362_v28 = vld [vmem:[%s780_s7 + $0x150] sm:$0xff] }
  0x34   : > { %369 = vmatpush.msra.mxu0 %v334_v17  ;;  %610 = vmatpush.msra.mxu3 %v334_v17  ;;  %v332_v23 = vld [vmem:[%s780_s7 + $0x60] sm:$0xff]  ;;  %v331_v26 = vld [vmem:[%s780_s7 + $0x58] sm:$0xff]  ;;  %v330_v29 = vld [vmem:[%s780_s7 + $0x50] sm:$0xff] }
  0x35   : > { %398 = vmatpush.msra.mxu1 %v350_v19  ;;  %428 = vmatpush.msra.mxu2 %v365_v18  ;;  %v348_v24 = vld [vmem:[%s780_s7 + $0xe0] sm:$0xff]  ;;  %v347_v27 = vld [vmem:[%s780_s7 + $0xd8] sm:$0xff]  ;;  %v346_v30 = vld [vmem:[%s780_s7 + $0xd0] sm:$0xff] }
  0x36   : > { %370 = vmatpush.msra.mxu0 %v333_v20  ;;  %611 = vmatpush.msra.mxu3 %v333_v20  ;;  %v361_v31 = vld [vmem:[%s780_s7 + $0x148] sm:$0xff]  ;;  %v360_v34 = vld [vmem:[%s780_s7 + $0x140] sm:$0xff]  ;;  %v359_v37 = vld [vmem:[%s780_s7 + $0x138] sm:$0xff] }
  0x37   : > { %399 = vmatpush.msra.mxu1 %v349_v21  ;;  %429 = vmatpush.msra.mxu2 %v364_v22  ;;  %v329_v32 = vld [vmem:[%s780_s7 + $0x48] sm:$0xff]  ;;  %v328_v35 = vld [vmem:[%s780_s7 + $0x40] sm:$0xff]  ;;  %v327_v38 = vld [vmem:[%s780_s7 + $0x38] sm:$0xff] }
  0x38   : > { %371 = vmatpush.msra.mxu0 %v332_v23  ;;  %612 = vmatpush.msra.mxu3 %v332_v23  ;;  %v345_v33 = vld [vmem:[%s780_s7 + $0xc8] sm:$0xff]  ;;  %v344_v36 = vld [vmem:[%s780_s7 + $0xc0] sm:$0xff]  ;;  %v343_v39 = vld [vmem:[%s780_s7 + $0xb8] sm:$0xff] }
  0x39   : > { %400 = vmatpush.msra.mxu1 %v348_v24  ;;  %430 = vmatpush.msra.mxu2 %v363_v25  ;;  %v358_v40 = vld [vmem:[%s780_s7 + $0x130] sm:$0xff]  ;;  %v357_v43 = vld [vmem:[%s780_s7 + $0x128] sm:$0xff]  ;;  %v356_v46 = vld [vmem:[%s780_s7 + $0x120] sm:$0xff] }
  0x3a   : > { %372 = vmatpush.msra.mxu0 %v331_v26  ;;  %613 = vmatpush.msra.mxu3 %v331_v26  ;;  %v326_v41 = vld [vmem:[%s780_s7 + $0x30] sm:$0xff]  ;;  %v325_v44 = vld [vmem:[%s780_s7 + $0x28] sm:$0xff]  ;;  %v324_v47 = vld [vmem:[%s780_s7 + $0x20] sm:$0xff] }
  0x3b   : > { %401 = vmatpush.msra.mxu1 %v347_v27  ;;  %431 = vmatpush.msra.mxu2 %v362_v28  ;;  %v342_v42 = vld [vmem:[%s780_s7 + $0xb0] sm:$0xff]  ;;  %v341_v45 = vld [vmem:[%s780_s7 + $0xa8] sm:$0xff]  ;;  %v340_v48 = vld [vmem:[%s780_s7 + $0xa0] sm:$0xff] }
  0x3c   : > { %373 = vmatpush.msra.mxu0 %v330_v29  ;;  %614 = vmatpush.msra.mxu3 %v330_v29  ;;  %v355_v49 = vld [vmem:[%s780_s7 + $0x118] sm:$0xff]  ;;  %v354_v52 = vld [vmem:[%s780_s7 + $0x110] sm:$0xff]  ;;  %v353_v55 = vld [vmem:[%s780_s7 + $0x108] sm:$0xff] }
  0x3d   : > { %402 = vmatpush.msra.mxu1 %v346_v30  ;;  %432 = vmatpush.msra.mxu2 %v361_v31  ;;  %v323_v50 = vld [vmem:[%s780_s7 + $0x18] sm:$0xff]  ;;  %v322_v53 = vld [vmem:[%s780_s7 + $0x10] sm:$0xff]  ;;  %v321_v56 = vld [vmem:[%s780_s7 + $0x8] sm:$0xff] }
  0x3e   : > { %374 = vmatpush.msra.mxu0 %v329_v32  ;;  %615 = vmatpush.msra.mxu3 %v329_v32  ;;  %v339_v51 = vld [vmem:[%s780_s7 + $0x98] sm:$0xff]  ;;  %v338_v54 = vld [vmem:[%s780_s7 + $0x90] sm:$0xff]  ;;  %v337_v57 = vld [vmem:[%s780_s7 + $0x88] sm:$0xff] }
  0x3f   : > { %403 = vmatpush.msra.mxu1 %v345_v33  ;;  %433 = vmatpush.msra.mxu2 %v360_v34  ;;  %v352_v58 = vld [vmem:[%s780_s7 + $0x100] sm:$0xff]  ;;  %v310_v60 = vld [vmem:[%s782_s8 + $0x10] sm:$0xff]  ;;  %v309_v63 = vld [vmem:[%s782_s8 + $0x8] sm:$0xff] }
  0x40   : > { %375 = vmatpush.msra.mxu0 %v328_v35  ;;  %616 = vmatpush.msra.mxu3 %v328_v35  ;;  %v320_v59 = vld [vmem:[%s780_s7] sm:$0xff]  ;;  %v311_v0 = vld [vmem:[%s782_s8 + $0x18] sm:$0xff]  ;;  %v313_v1 = vld [vmem:[%s782_s8 + $0x28] sm:$0xff] }
  0x41   : > { %404 = vmatpush.msra.mxu1 %v344_v36  ;;  %434 = vmatpush.msra.mxu2 %v359_v37  ;;  %v336_v61 = vld [vmem:[%s780_s7 + $0x80] sm:$0xff]  ;;  %v314_v3 = vld [vmem:[%s782_s8 + $0x30] sm:$0xff]  ;;  %v315_v5 = vld [vmem:[%s782_s8 + $0x38] sm:$0xff] }
  0x42   : > { %376 = vmatpush.msra.mxu0 %v327_v38  ;;  %617 = vmatpush.msra.mxu3 %v327_v38  ;;  %v308_v62 = vld [vmem:[%s782_s8] sm:$0xff]  ;;  %v317_v6 = vld [vmem:[%s782_s8 + $0x48] sm:$0xff]  ;;  %v319_v7 = vld [vmem:[%s782_s8 + $0x58] sm:$0xff] }
  0x43   : > { %405 = vmatpush.msra.mxu1 %v343_v39  ;;  %435 = vmatpush.msra.mxu2 %v358_v40  ;;  %v312_v2 = vld [vmem:[%s782_s8 + $0x20] sm:$0xff]  ;;  %v318_v8 = vld [vmem:[%s782_s8 + $0x50] sm:$0xff]  ;;  %v305_v19 = vld [vmem:[#allocation2 + $0x8] sm:$0xff] }
  0x44   : > { %377 = vmatpush.msra.mxu0 %v326_v41  ;;  %618 = vmatpush.msra.mxu3 %v326_v41  ;;  %v316_v4 = vld [vmem:[%s782_s8 + $0x40] sm:$0xff]  ;;  %v306_v26 = vld [vmem:[#allocation2 + $0x10] sm:$0xff]  ;;  %v307_v33 = vld [vmem:[#allocation2 + $0x18] sm:$0xff] }
  0x45   : > { %406 = vmatpush.msra.mxu1 %v342_v42  ;;  %436 = vmatpush.msra.mxu2 %v357_v43  ;;  %v304_v12 = vld [vmem:[#allocation2] sm:$0xff] }
  0x46   : > { %378 = vmatpush.msra.mxu0 %v325_v44  ;;  %619 = vmatpush.msra.mxu3 %v325_v44 }
  0x47   : > { %407 = vmatpush.msra.mxu1 %v341_v45  ;;  %437 = vmatpush.msra.mxu2 %v356_v46 }
  0x48   : > { %379 = vmatpush.msra.mxu0 %v324_v47  ;;  %620 = vmatpush.msra.mxu3 %v324_v47 }
  0x49   : > { %408 = vmatpush.msra.mxu1 %v340_v48  ;;  %438 = vmatpush.msra.mxu2 %v355_v49 }
  0x4a   : > { %380 = vmatpush.msra.mxu0 %v323_v50  ;;  %621 = vmatpush.msra.mxu3 %v323_v50 }
  0x4b   : > { %409 = vmatpush.msra.mxu1 %v339_v51  ;;  %439 = vmatpush.msra.mxu2 %v354_v52 }
  0x4c   : > { %381 = vmatpush.msra.mxu0 %v322_v53  ;;  %622 = vmatpush.msra.mxu3 %v322_v53 }
  0x4d   : > { %410 = vmatpush.msra.mxu1 %v338_v54  ;;  %440 = vmatpush.msra.mxu2 %v353_v55 }
  0x4e   : > { %382 = vmatpush.msra.mxu0 %v321_v56  ;;  %623 = vmatpush.msra.mxu3 %v321_v56 }
  0x4f   : > { %411 = vmatpush.msra.mxu1 %v337_v57  ;;  %441 = vmatpush.msra.mxu2 %v352_v58 }
  0x50   : > { %383 = vmatpush.msra.mxu0 %v320_v59  ;;  %442 = vmatmul.f32.vlgmr.msra.gmra.mxu2 %v310_v60 }
  0x51   : > { %412 = vmatpush.msra.mxu1 %v336_v61  ;;  %384 = vmatmul.f32.vlgmr.msra.gmra.mxu0 %v308_v62 }
  0x52   : > { %413 = vmatmul.f32.vlgmr.msra.gmra.mxu1 %v309_v63  ;;  %624 = vmatpush.msra.mxu3 %v320_v59 }
  0x53   : > { %387 = vmatmul.f32.vlgmr.msra.gmra.mxu3 %v311_v0 }
  0x58   : > { %445 = vmatmul.f32.gmra.mxu2 %v313_v1 }
  0x5a   : > { %416 = vmatmul.f32.gmra.mxu1 %v312_v2 }
  0x5b   : > { %390 = vmatmul.f32.gmra.mxu3 %v314_v3 }
  0x60   : > { %448 = vmatmul.f32.gmra.mxu2 %v316_v4 }
  0x62   : > { %419 = vmatmul.f32.gmra.mxu1 %v315_v5 }
  0x63   : > { %393 = vmatmul.f32.gmra.mxu3 %v317_v6 }
  0x68   : > { %451 = vmatmul.f32.gmra.mxu2 %v319_v7 }
  0x6a   : > { %422 = vmatmul.f32.gmra.mxu1 %v318_v8 }
  0xce   : > { %v385_v9 = vpop.f32.mrf.mxu0 }
  0xcf   : > { %v414_v10 = vpop.f32.mrf.mxu1 }
  0xd0   : > { %v415_v11 = vadd.f32 %v414_v10, %v385_v9 }
  0xd3   : > { %v443_v13 = vpop.f32.mrf.mxu2 }
  0xd4   : > { %v444_v14 = vadd.f32 %v443_v13, %v415_v11 }
  0xd6   : > { %v455_v15 = vadd.f32 %v444_v14, %v304_v12  ;;  %v388_v16 = vpop.f32.mrf.mxu3 }
  0xd7   : > { %v417_v17 = vpop.f32.mrf.mxu1 }
  0xd8   : > { %460 = vst.msk [vmem:[#allocation2] sm:$0xff] %vm459_vm1, %v455_v15  ;;  %v418_v18 = vadd.f32 %v417_v17, %v388_v16 }
  0xdb   : > { %v446_v20 = vpop.f32.mrf.mxu2 }
  0xdc   : > { %v447_v21 = vadd.f32 %v446_v20, %v418_v18 }
  0xde   : > { %v456_v22 = vadd.f32 %v447_v21, %v305_v19  ;;  %v391_v23 = vpop.f32.mrf.mxu3 }
  0xdf   : > { %v420_v24 = vpop.f32.mrf.mxu1 }
  0xe0   : > { %461 = vst.msk [vmem:[#allocation2 + $0x8] sm:$0xff] %vm459_vm1, %v456_v22  ;;  %v421_v25 = vadd.f32 %v420_v24, %v391_v23 }
  0xe3   : > { %v449_v27 = vpop.f32.mrf.mxu2 }
  0xe4   : > { %v450_v28 = vadd.f32 %v449_v27, %v421_v25 }
  0xe6   : > { %v457_v29 = vadd.f32 %v450_v28, %v306_v26  ;;  %v394_v30 = vpop.f32.mrf.mxu3 }
  0xe7   : > { %v423_v31 = vpop.f32.mrf.mxu1 }
  0xe8   : > { %462 = vst.msk [vmem:[#allocation2 + $0x10] sm:$0xff] %vm459_vm1, %v457_v29  ;;  %v424_v32 = vadd.f32 %v423_v31, %v394_v30 }
  0xeb   : > { %v452_v34 = vpop.f32.mrf.mxu2 }
  0xec   : > { %v453_v35 = vadd.f32 %v452_v34, %v424_v32  ;;  %467 = sbr.rel (%p603_p11) target bundleno = 251 (0xfb), region = 63 }
  0xee   : > { %v458_v36 = vadd.f32 %v453_v35, %v307_v33 }
  0xf0   : > { %463 = vst.msk [vmem:[#allocation2 + $0x18] sm:$0xff] %vm459_vm1, %v458_v36 }
  0xf1   : > { %v468_v37 = vld [vmem:[#allocation2] sm:$0xff]  ;;  %v469_v39 = vld [vmem:[#allocation2 + $0x8] sm:$0xff]  ;;  %v470_v40 = vld [vmem:[#allocation2 + $0x10] sm:$0xff] }
  0xf2   : > { %v668_v38 = vld [vmem:[%s886_s2] ss:$0 sm:$0xff] }
  0xf3   : > { %v476_v42 = vadd.f32 %v668_v38, %v468_v37  ;;  %v477_v43 = vadd.f32 %v668_v38, %v469_v39  ;;  %v478_v44 = vadd.f32 %v668_v38, %v470_v40 }
  0xf5   : > { %480 = vst.msk [vmem:[%s887_s3] sm:$0xff] %vm459_vm1, %v476_v42 }
  0xf6   : > { %481 = vst.msk [vmem:[%s887_s3 + $0x8] sm:$0xff] %vm459_vm1, %v477_v43 }
  0xf7   : > { %v471_v41 = vld [vmem:[#allocation2 + $0x18] sm:$0xff]  ;;  %482 = vst.msk [vmem:[%s887_s3 + $0x10] sm:$0xff] %vm459_vm1, %v478_v44 }
  0xf8   : > { %v479_v45 = vadd.f32 %v668_v38, %v471_v41 }
  0xfa   : > { %483 = vst.msk [vmem:[%s887_s3 + $0x18] sm:$0xff] %vm459_vm1, %v479_v45 }
  0xfb PF: > { %s13_s16 = sadd.s32 1, %s707_s16   ;;  %s888_s12 = smov %s695_s13 }
  0xfc   : > { %p10_p12 = scmp.ge.s32.totalorder %s13_s16, 4   ;;  %s889_s13 = smov %s765_s20 }
  0xfd   : > { %s890_s14 = smov %s703_s15  ;;  %s891_s15 = smov %s893_s17 }
  0xfe   :  { %12 = sbr.rel (!%p10_p12) target bundleno = 3 (0x3), region = 104 }

// kernel: image_encoder_vit.21
= control target key start
LH: loop header
LB: loop body
LE: loop exit
PB: predicated region body
PF: predicated region fallthrough
CT: control target
= control target key end

     0   :  { %vm18_vm0 = vcmask 785408   ;;  %v127_v2 = vmov 0.0   ;;  %vm35_vm1 = vcmask 261120   ;;  %s199_s1 = inlined_call_operand.vmem [shape: f32[32,96], index: 1, kind: input, shape index: {}]   ;;  %s200_s2 = inlined_call_operand.vmem [shape: f32[1,96], index: 2, kind: input, shape index: {}]   ;;  %s201_s0 = inlined_call_operand.vmem [shape: f32[32,32], index: 0, kind: input, shape index: {}]   ;;  %s202_s3 = inlined_call_operand.vmem [shape: f32[32,96], index: 3, kind: output, shape index: {}]  }
   0x1   :  { %v34_v0 = vld [vmem:[%s199_s1 + $0x18] sm:$0xff]  ;;  %v33_v1 = vld [vmem:[%s199_s1 + $0x10] sm:$0xff]  ;;  %19 = vst.msk [vmem:[#allocation2] sm:$0xff] %vm18_vm0, %v127_v2  ;;  %v32_v3 = vld [vmem:[%s199_s1 + $0x8] sm:$0xff] }
   0x2   :  { %114 = vmatpush.msra.mxu2 %v34_v0  ;;  %115 = vmatpush.msra.mxu3 %v34_v0  ;;  %20 = vst.msk [vmem:[#allocation2 + $0x8] sm:$0xff] %vm18_vm0, %v127_v2  ;;  %v31_v4 = vld [vmem:[%s199_s1] sm:$0xff]  ;;  %v29_v5 = vld [vmem:[%s201_s0 + $0x10] sm:$0xff]  ;;  %v30_v6 = vld [vmem:[%s201_s0 + $0x18] sm:$0xff] }
   0x3   :  { %60 = vmatpush.msra.mxu0 %v34_v0  ;;  %113 = vmatpush.msra.mxu1 %v34_v0  ;;  %21 = vst.msk [vmem:[#allocation2 + $0x10] sm:$0xff] %vm18_vm0, %v127_v2  ;;  %v27_v7 = vld [vmem:[%s201_s0] sm:$0xff]  ;;  %v28_v8 = vld [vmem:[%s201_s0 + $0x8] sm:$0xff] }
   0x4   :  { %117 = vmatpush.msra.mxu2 %v33_v1  ;;  %118 = vmatpush.msra.mxu3 %v33_v1  ;;  %22 = vst.msk [vmem:[#allocation2 + $0x18] sm:$0xff] %vm18_vm0, %v127_v2  ;;  %v126_v21 = vld [vmem:[%s200_s2] ss:$0 sm:$0xff] }
   0x5   :  { %61 = vmatpush.msra.mxu0 %v33_v1  ;;  %116 = vmatpush.msra.mxu1 %v33_v1 }
   0x6   :  { %120 = vmatpush.msra.mxu2 %v32_v3  ;;  %121 = vmatpush.msra.mxu3 %v32_v3 }
   0x7   :  { %62 = vmatpush.msra.mxu0 %v32_v3  ;;  %119 = vmatpush.msra.mxu1 %v32_v3 }
   0x8   :  { %123 = vmatpush.msra.mxu2 %v31_v4  ;;  %124 = vmatpush.msra.mxu3 %v31_v4  ;;  %v23_v9 = vld [vmem:[#allocation2] sm:$0xff] }
   0x9   :  { %111 = vmatmul.msk.f32.vlgmr.msra.gmra.mxu2 %vm35_vm1, %v29_v5  ;;  %112 = vmatmul.msk.f32.vlgmr.msra.gmra.mxu3 %vm35_vm1, %v30_v6  ;;  %v24_v10 = vld [vmem:[#allocation2 + $0x8] sm:$0xff] }
   0xa   :  { %63 = vmatpush.msra.mxu0 %v31_v4  ;;  %122 = vmatpush.msra.mxu1 %v31_v4  ;;  %v25_v15 = vld [vmem:[#allocation2 + $0x10] sm:$0xff] }
   0xb   :  { %109 = vmatmul.msk.f32.vlgmr.msra.gmra.mxu0 %vm35_vm1, %v27_v7  ;;  %110 = vmatmul.msk.f32.vlgmr.msra.gmra.mxu1 %vm35_vm1, %v28_v8  ;;  %v26_v16 = vld [vmem:[#allocation2 + $0x18] sm:$0xff] }
  0x88   :  { %v65_v11 = vpop.f32.mrf.mxu0  ;;  %v68_v12 = vpop.f32.mrf.mxu1 }
  0x89   :  { %v77_v13 = vadd.f32 %v65_v11, %v23_v9  ;;  %v78_v14 = vadd.f32 %v68_v12, %v24_v10 }
  0x8b   :  { %82 = vst.msk [vmem:[#allocation2] sm:$0xff] %vm18_vm0, %v77_v13 }
  0x8c   :  { %83 = vst.msk [vmem:[#allocation2 + $0x8] sm:$0xff] %vm18_vm0, %v78_v14  ;;  %v71_v17 = vpop.f32.mrf.mxu2  ;;  %v74_v18 = vpop.f32.mrf.mxu3 }
  0x8d   :  { %v79_v19 = vadd.f32 %v71_v17, %v25_v15  ;;  %v80_v20 = vadd.f32 %v74_v18, %v26_v16 }
  0x8f   :  { %84 = vst.msk [vmem:[#allocation2 + $0x10] sm:$0xff] %vm18_vm0, %v79_v19 }
  0x90   :  { %85 = vst.msk [vmem:[#allocation2 + $0x18] sm:$0xff] %vm18_vm0, %v80_v20 }
  0x92   :  { %v89_v22 = vld [vmem:[#allocation2] sm:$0xff] }
  0x93   :  { %v97_v23 = vadd.f32 %v126_v21, %v89_v22  ;;  %v90_v24 = vld [vmem:[#allocation2 + $0x8] sm:$0xff] }
  0x94   :  { %v98_v25 = vadd.f32 %v126_v21, %v90_v24 }
  0x95   :  { %101 = vst.msk [vmem:[%s202_s3] sm:$0xff] %vm18_vm0, %v97_v23 }
  0x96   :  { %102 = vst.msk [vmem:[%s202_s3 + $0x8] sm:$0xff] %vm18_vm0, %v98_v25  ;;  %v91_v26 = vld [vmem:[#allocation2 + $0x10] sm:$0xff] }
  0x97   :  { %v99_v27 = vadd.f32 %v126_v21, %v91_v26  ;;  %v92_v28 = vld [vmem:[#allocation2 + $0x18] sm:$0xff] }
  0x98   :  { %v100_v29 = vadd.f32 %v126_v21, %v92_v28 }
  0x99   :  { %103 = vst.msk [vmem:[%s202_s3 + $0x10] sm:$0xff] %vm18_vm0, %v99_v27 }
  0x9a   :  { %104 = vst.msk [vmem:[%s202_s3 + $0x18] sm:$0xff] %vm18_vm0, %v100_v29 }

// kernel: image_encoder_vit.25
= control target key start
LH: loop header
LB: loop body
LE: loop exit
PB: predicated region body
PF: predicated region fallthrough
CT: control target
= control target key end

     0   :  { %vm34_vm0 = vcmask 261120   ;;  %v301_v15 = vmov 1.0   ;;  %s417_s1 = inlined_call_operand.vmem [shape: f32[32,128], index: 1, kind: input, shape index: {}]   ;;  %s418_s2 = inlined_call_operand.vmem [shape: f32[1,128], index: 2, kind: input, shape index: {}]   ;;  %s419_s0 = inlined_call_operand.vmem [shape: f32[32,32], index: 0, kind: input, shape index: {}]   ;;  %s420_s3 = inlined_call_operand.vmem [shape: f32[32,128], index: 3, kind: output, shape index: {}]  }
   0x1   :  { %v33_v0 = vld [vmem:[%s417_s1 + $0x18] sm:$0xff]  ;;  %v32_v1 = vld [vmem:[%s417_s1 + $0x10] sm:$0xff]  ;;  %v31_v2 = vld [vmem:[%s417_s1 + $0x8] sm:$0xff] }
   0x2   :  { %59 = vmatpush.msra.mxu0 %v33_v0  ;;  %271 = vmatpush.msra.mxu1 %v33_v0  ;;  %v30_v3 = vld [vmem:[%s417_s1] sm:$0xff]  ;;  %v27_v5 = vld [vmem:[%s419_s0 + $0x8] sm:$0xff]  ;;  %v28_v6 = vld [vmem:[%s419_s0 + $0x10] sm:$0xff] }
   0x3   :  { %272 = vmatpush.msra.mxu2 %v33_v0  ;;  %273 = vmatpush.msra.mxu3 %v33_v0  ;;  %v26_v4 = vld [vmem:[%s419_s0] sm:$0xff]  ;;  %v29_v7 = vld [vmem:[%s419_s0 + $0x18] sm:$0xff] }
   0x4   :  { %60 = vmatpush.msra.mxu0 %v32_v1  ;;  %274 = vmatpush.msra.mxu1 %v32_v1  ;;  %v284_v8 = vld [vmem:[%s418_s2] ss:$0 sm:$0xff] }
   0x5   :  { %275 = vmatpush.msra.mxu2 %v32_v1  ;;  %276 = vmatpush.msra.mxu3 %v32_v1 }
   0x6   :  { %61 = vmatpush.msra.mxu0 %v31_v2  ;;  %277 = vmatpush.msra.mxu1 %v31_v2 }
   0x7   :  { %278 = vmatpush.msra.mxu2 %v31_v2  ;;  %279 = vmatpush.msra.mxu3 %v31_v2 }
   0x8   :  { %62 = vmatpush.msra.mxu0 %v30_v3  ;;  %280 = vmatpush.msra.mxu1 %v30_v3 }
   0x9   :  { %281 = vmatpush.msra.mxu2 %v30_v3  ;;  %282 = vmatpush.msra.mxu3 %v30_v3 }
   0xa   :  { %267 = vmatmul.msk.f32.vlgmr.msra.gmra.mxu0 %vm34_vm0, %v26_v4  ;;  %268 = vmatmul.msk.f32.vlgmr.msra.gmra.mxu1 %vm34_vm0, %v27_v5 }
   0xb   :  { %269 = vmatmul.msk.f32.vlgmr.msra.gmra.mxu2 %vm34_vm0, %v28_v6  ;;  %270 = vmatmul.msk.f32.vlgmr.msra.gmra.mxu3 %vm34_vm0, %v29_v7 }
  0x87   :  { %v64_v9 = vpop.f32.mrf.mxu0  ;;  %v67_v10 = vpop.f32.mrf.mxu1 }
  0x88   :  { %v349_v11 = vadd.f32 %v284_v8, %v64_v9  ;;  %v351_v12 = vadd.f32 %v284_v8, %v67_v10 }
  0x8a   :  { %v99_v13 = vmul.f32 0.70710677, %v349_v11  ;;  %v100_v14 = vmul.f32 0.70710677, %v351_v12 }
  0x8c   :  { %vm103_vm1 = vcmp.lt.f32.partialorder %v99_v13, 0.0  ;;  %vm104_vm2 = vcmp.lt.f32.partialorder %v100_v14, 0.0 }
  0x8d   :  { %v355_v16 = vsel %vm103_vm1, -1.0, %v301_v15  ;;  %v357_v17 = vsel %vm104_vm2, -1.0, %v301_v15 }
  0x8e   :  { %v111_v18 = vmul.f32 %v355_v16, %v99_v13  ;;  %v112_v19 = vmul.f32 %v357_v17, %v100_v14  ;;  %v70_v20 = vpop.f32.mrf.mxu2  ;;  %v73_v21 = vpop.f32.mrf.mxu3 }
  0x8f   :  { %v361_v22 = vadd.f32 %v284_v8, %v70_v20  ;;  %v363_v23 = vadd.f32 %v284_v8, %v73_v21 }
  0x90   :  { %v115_v24 = vmul.f32 0.3275911, %v111_v18  ;;  %v116_v25 = vmul.f32 0.3275911, %v112_v19  ;;  %v219_v42 = vsub.f32 0.0, %v111_v18  ;;  %v220_v43 = vsub.f32 0.0, %v112_v19 }
  0x91   :  { %v101_v26 = vmul.f32 0.70710677, %v361_v22  ;;  %v102_v27 = vmul.f32 0.70710677, %v363_v23 }
  0x92   :  { %v119_v28 = vadd.f32 1.0, %v115_v24  ;;  %v120_v29 = vadd.f32 1.0, %v116_v25  ;;  %v223_v54 = vmul.f32 %v219_v42, %v111_v18  ;;  %v224_v58 = vmul.f32 %v220_v43, %v112_v19 }
  0x93   :  { %vm105_vm3 = vcmp.lt.f32.partialorder %v101_v26, 0.0  ;;  %vm106_vm4 = vcmp.lt.f32.partialorder %v102_v27, 0.0 }
  0x94   :  { %285 = vrcp.f32 %v119_v28  ;;  %v367_v30 = vsel %vm105_vm3, -1.0, %v301_v15  ;;  %v369_v31 = vsel %vm106_vm4, -1.0, %v301_v15  ;;  %v132_v45 = vand.u32 2147483647, %v119_v28 }
  0x95   :  { %287 = vrcp.f32 %v120_v29  ;;  %v372_v32 = vmul.f32 %v367_v30, %v101_v26  ;;  %v375_v33 = vmul.f32 %v369_v31, %v102_v27  ;;  %v134_v46 = vand.u32 2147483648, %v119_v28 }
  0x96   :  { %v149_v49 = vand.u32 2147483648, %v120_v29  ;;  %v147_v51 = vand.u32 2147483647, %v120_v29  ;;  %vm128_vm7 = vweird.f32 %v119_v28  ;;  %vm143_vm9 = vweird.f32 %v120_v29 }
  0x97   :  { %v117_v35 = vmul.f32 0.3275911, %v372_v32  ;;  %v118_v36 = vmul.f32 0.3275911, %v375_v33  ;;  %v135_v53 = vor.u32 1.1754944e-38, %v134_v46  ;;  %vm133_vm10 = vcmp.eq.f32.partialorder %v132_v45, 8.507059e+37 }
  0x98   :  { %v150_v57 = vor.u32 1.1754944e-38, %v149_v49  ;;  %vm148_vm12 = vcmp.eq.f32.partialorder %v147_v51, 8.507059e+37  ;;  %v227_v2 = vmul.f32 1.442695, %v223_v54  ;;  %v229_v6 = vmul.f32 1.442695, %v224_v58 }
  0x99   :  { %v379_v40 = vadd.f32 1.0, %v117_v35  ;;  %v381_v44 = vadd.f32 1.0, %v118_v36  ;;  %v221_v26 = vsub.f32 0.0, %v372_v32  ;;  %v222_v43 = vsub.f32 0.0, %v375_v33 }
  0x9a   :  { %v286_v34 = vpop.eup %285 }
  0x9b   :  { %v288_v37 = vpop.eup %287  ;;  %v124_v38 = vmul.f32 %v286_v34, %v119_v28  ;;  %289 = vrcp.f32 %v379_v40  ;;  %vm129_vm5 = vweird.f32 %v286_v34  ;;  %v162_v9 = vand.u32 2147483647, %v379_v40 }
  0x9c   :  { %v139_v39 = vmul.f32 %v288_v37, %v120_v29  ;;  %291 = vrcp.f32 %v381_v44  ;;  %vm144_vm6 = vweird.f32 %v288_v37  ;;  %vm130_vm8 = vmor %vm128_vm7, %vm129_vm5  ;;  %v164_v10 = vand.u32 2147483648, %v379_v40 }
  0x9d   :  { %v125_v41 = vsub.f32 1.0, %v124_v38  ;;  %vm145_vm11 = vmor %vm143_vm9, %vm144_vm6  ;;  %v179_v18 = vand.u32 2147483648, %v381_v44  ;;  %v177_v21 = vand.u32 2147483647, %v381_v44  ;;  %vm158_vm15 = vweird.f32 %v379_v40 }
  0x9e   :  { %v140_v47 = vsub.f32 1.0, %v139_v39  ;;  %v165_v28 = vor.u32 1.1754944e-38, %v164_v10  ;;  %vm173_vm1 = vweird.f32 %v381_v44  ;;  %vm163_vm2 = vcmp.eq.f32.partialorder %v162_v9, 8.507059e+37 }
  0x9f   :  { %v126_v48 = vmul.f32 %v286_v34, %v125_v41  ;;  %v180_v36 = vor.u32 1.1754944e-38, %v179_v18  ;;  %vm178_vm4 = vcmp.eq.f32.partialorder %v177_v21, 8.507059e+37  ;;  %293 = vpow2.f32 %v227_v2 }
  0xa0   :  { %v141_v50 = vmul.f32 %v288_v37, %v140_v47  ;;  %295 = vpow2.f32 %v229_v6  ;;  %v225_v49 = vmul.f32 %v221_v26, %v372_v32  ;;  %v247_v10 = vmul.f32 0.5, %v349_v11 }
  0xa1   :  { %v127_v52 = vadd.f32 %v286_v34, %v126_v48  ;;  %v290_v59 = vpop.eup %289 }
  0xa2   :  { %v142_v55 = vadd.f32 %v288_v37, %v141_v50  ;;  %v292_v62 = vpop.eup %291  ;;  %v154_v1 = vmul.f32 %v290_v59, %v379_v40  ;;  %vm159_vm13 = vweird.f32 %v290_v59 }
  0xa3   :  { %v131_v56 = vsel %vm130_vm8, %v286_v34, %v127_v52  ;;  %v169_v4 = vmul.f32 %v292_v62, %v381_v44  ;;  %vm174_vm14 = vweird.f32 %v292_v62  ;;  %vm160_vm0 = vmor %vm158_vm15, %vm159_vm13 }
  0xa4   :  { %v136_v60 = vsel %vm133_vm10, %v135_v53, %v131_v56  ;;  %v146_v61 = vsel %vm145_vm11, %v288_v37, %v142_v55  ;;  %v155_v7 = vsub.f32 1.0, %v154_v1  ;;  %vm175_vm3 = vmor %vm173_vm1, %vm174_vm14  ;;  %v226_v53 = vmul.f32 %v222_v43, %v375_v33 }
  0xa5   :  { %v183_v63 = vmul.f32 1.0614054, %v136_v60  ;;  %v151_v0 = vsel %vm148_vm12, %v150_v57, %v146_v61  ;;  %v170_v13 = vsub.f32 1.0, %v169_v4  ;;  %v294_v58 = vpop.eup %293  ;;  %v231_v61 = vmul.f32 1.442695, %v225_v49 }
  0xa6   :  { %v184_v3 = vmul.f32 1.0614054, %v151_v0  ;;  %v156_v15 = vmul.f32 %v290_v59, %v155_v7 }
  0xa7   :  { %v187_v5 = vadd.f32 -1.4531521, %v183_v63  ;;  %v171_v20 = vmul.f32 %v292_v62, %v170_v13  ;;  %v296_v63 = vpop.eup %295  ;;  %297 = vpow2.f32 %v231_v61 }
  0xa8   :  { %v188_v8 = vadd.f32 -1.4531521, %v184_v3  ;;  %v157_v25 = vadd.f32 %v290_v59, %v156_v15  ;;  %v233_v3 = vmul.f32 1.442695, %v226_v53  ;;  %v248_v15 = vmul.f32 0.5, %v351_v12 }
  0xa9   :  { %v191_v14 = vmul.f32 %v187_v5, %v136_v60  ;;  %v172_v29 = vadd.f32 %v292_v62, %v171_v20 }
  0xaa   :  { %v192_v19 = vmul.f32 %v188_v8, %v151_v0  ;;  %v161_v35 = vsel %vm160_vm0, %v290_v59, %v157_v25  ;;  %299 = vpow2.f32 %v233_v3 }
  0xab   :  { %v195_v24 = vadd.f32 1.4214138, %v191_v14  ;;  %v166_v38 = vsel %vm163_vm2, %v165_v28, %v161_v35  ;;  %v176_v39 = vsel %vm175_vm3, %v292_v62, %v172_v29 }
  0xac   :  { %v196_v27 = vadd.f32 1.4214138, %v192_v19  ;;  %v185_v42 = vmul.f32 1.0614054, %v166_v38  ;;  %v181_v40 = vsel %vm178_vm4, %v180_v36, %v176_v39  ;;  %v250_v36 = vmul.f32 0.5, %v363_v23 }
  0xad   :  { %v199_v34 = vmul.f32 %v195_v24, %v136_v60  ;;  %v186_v46 = vmul.f32 1.0614054, %v181_v40  ;;  %v298_v24 = vpop.eup %297 }
  0xae   :  { %v200_v37 = vmul.f32 %v196_v27, %v151_v0  ;;  %v189_v44 = vadd.f32 -1.4531521, %v185_v42 }
  0xaf   :  { %v203_v41 = vadd.f32 -0.28449672, %v199_v34  ;;  %v190_v50 = vadd.f32 -1.4531521, %v186_v46  ;;  %v249_v34 = vmul.f32 0.5, %v361_v22 }
  0xb0   :  { %v204_v45 = vadd.f32 -0.28449672, %v200_v37  ;;  %v193_v52 = vmul.f32 %v189_v44, %v166_v38  ;;  %v300_v27 = vpop.eup %299 }
  0xb1   :  { %v207_v47 = vmul.f32 %v203_v41, %v136_v60  ;;  %v194_v55 = vmul.f32 %v190_v50, %v181_v40 }
  0xb2   :  { %v208_v48 = vmul.f32 %v204_v45, %v151_v0  ;;  %v197_v57 = vadd.f32 1.4214138, %v193_v52 }
  0xb3   :  { %v211_v51 = vadd.f32 0.2548296, %v207_v47  ;;  %v198_v62 = vadd.f32 1.4214138, %v194_v55 }
  0xb4   :  { %v212_v54 = vadd.f32 0.2548296, %v208_v48  ;;  %v201_v2 = vmul.f32 %v197_v57, %v166_v38 }
  0xb5   :  { %v215_v56 = vmul.f32 %v211_v51, %v136_v60  ;;  %v202_v5 = vmul.f32 %v198_v62, %v181_v40 }
  0xb6   :  { %v216_v59 = vmul.f32 %v212_v54, %v151_v0  ;;  %v205_v6 = vadd.f32 -0.28449672, %v201_v2 }
  0xb7   :  { %v235_v1 = vmul.f32 %v294_v58, %v215_v56  ;;  %v206_v8 = vadd.f32 -0.28449672, %v202_v5 }
  0xb8   :  { %v236_v4 = vmul.f32 %v296_v63, %v216_v59  ;;  %v209_v9 = vmul.f32 %v205_v6, %v166_v38 }
  0xb9   :  { %v239_v32 = vsub.f32 1.0, %v235_v1  ;;  %v210_v0 = vmul.f32 %v206_v8, %v181_v40 }
  0xba   :  { %v240_v7 = vsub.f32 1.0, %v236_v4  ;;  %v213_v14 = vadd.f32 0.2548296, %v209_v9 }
  0xbb   :  { %v243_v33 = vmul.f32 %v239_v32, %v355_v16  ;;  %v214_v19 = vadd.f32 0.2548296, %v210_v0 }
  0xbc   :  { %v244_v60 = vmul.f32 %v240_v7, %v357_v17  ;;  %v217_v21 = vmul.f32 %v213_v14, %v166_v38 }
  0xbd   :  { %v251_v13 = vadd.f32 1.0, %v243_v33  ;;  %v218_v26 = vmul.f32 %v214_v19, %v181_v40 }
  0xbe   :  { %v252_v18 = vadd.f32 1.0, %v244_v60  ;;  %v237_v16 = vmul.f32 %v298_v24, %v217_v21 }
  0xbf   :  { %v255_v20 = vmul.f32 %v251_v13, %v247_v10  ;;  %v238_v11 = vmul.f32 %v300_v27, %v218_v26 }
  0xc0   :  { %v256_v25 = vmul.f32 %v252_v18, %v248_v15  ;;  %v241_v17 = vsub.f32 1.0, %v237_v16 }
  0xc1   :  { %259 = vst [vmem:[%s420_s3] sm:$0xff] %v255_v20  ;;  %v242_v12 = vsub.f32 1.0, %v238_v11 }
  0xc2   :  { %260 = vst [vmem:[%s420_s3 + $0x8] sm:$0xff] %v256_v25  ;;  %v245_v28 = vmul.f32 %v241_v17, %v367_v30 }
  0xc3   :  { %v246_v29 = vmul.f32 %v242_v12, %v369_v31 }
  0xc4   :  { %v253_v35 = vadd.f32 1.0, %v245_v28 }
  0xc5   :  { %v254_v37 = vadd.f32 1.0, %v246_v29 }
  0xc6   :  { %v257_v38 = vmul.f32 %v253_v35, %v249_v34 }
  0xc7   :  { %v258_v39 = vmul.f32 %v254_v37, %v250_v36 }
  0xc8   :  { %261 = vst [vmem:[%s420_s3 + $0x10] sm:$0xff] %v257_v38 }
  0xc9   :  { %262 = vst [vmem:[%s420_s3 + $0x18] sm:$0xff] %v258_v39 }

// kernel: image_encoder_vit.22
= control target key start
LH: loop header
LB: loop body
LE: loop exit
PB: predicated region body
PF: predicated region fallthrough
CT: control target
= control target key end

     0   :  { %s709_s12 = smov 0   ;;  %s711_s13 = smov 0   ;;  %s780_s0 = inlined_call_operand.vmem [shape: f32[8,16,8], index: 0, kind: input, shape index: {}]   ;;  %s781_s1 = inlined_call_operand.vmem [shape: f32[8,16,8], index: 1, kind: input, shape index: {}]   ;;  %s782_s2 = inlined_call_operand.vmem [shape: f32[8,16,8], index: 2, kind: input, shape index: {}]   ;;  %s783_s3 = inlined_call_operand.vmem [shape: f32[8,16,8], index: 3, kind: output, shape index: {}]  }
   0x1   :  { %s713_s14 = smov 0  }
   0x2 LB: > { %s32_s15 = sadd.s32 1, %s680_s13  ;;  %p595_p0 = scmp.ge.s32.totalorder %s684_s14, 1  ;;  %s684_s14 = sphi %s713_s14, %s13_s14   ;;  %s680_s13 = sphi %s711_s13, %s785_s13   ;;  %s676_s12 = sphi %s709_s12, %s784_s12  }
   0x3   : > { %p34_p1 = scmp.ge.s32.totalorder %s32_s15, 8  ;;  %p199_p2 = scmp.lt.s32.totalorder %s684_s14, 9 }
   0x5   : > { %s787_s15 = smov (%p34_p1, %s32_s15), 0  ;;  %p200_p3 = pnand %p595_p0, %p199_p2 }
   0x6   : > { %p250_p4 = scmp.lt.s32.totalorder (!%p200_p3), %s676_s12, 7 }
   0x7   : > { %203 = sbr.rel (%p200_p3) target bundleno = 668 (0x29c), region = 32 }
   0xc   : > { %s789_s12 = smov (!%p250_p4, %s676_s12), 7  ;;  %vm298_vm0 = vcmask 64512   ;;  %vm293_vm1 = vcmask 7168   ;;  %v686_v6 = vmov -inf   ;;  %vm347_vm2 = vcmask 130048  }
   0xd   : > { %s727_s16 = sshll.u32 %s789_s12, 4  ;;  %295 = vst.msk [vmem:[#allocation2 + $0x8] sm:$0xff] %vm293_vm1, %v686_v6  ;;  %v687_v11 = vmov 0   ;;  %v688_v12 = vmov 0.0  }
   0xe   : > { %s267_s19 = scalar_lea.vmem %s781_s1, %s727_s16  ;;  %s257_s22 = scalar_lea.vmem %s780_s0, %s727_s16  ;;  %294 = vst.msk [vmem:[#allocation2] sm:$0xff] %vm293_vm1, %v686_v6  ;;  %647 = vset.pattern.permute.xlu1 %v687_v11  ;;  %648 = vset.pattern.permute.xlu0 %v687_v11 }
   0xf   : > { %v306_v0 = vld [vmem:[%s267_s19 + $0x8] sm:$0xff]  ;;  %v301_v2 = vld [vmem:[%s257_s22] sm:$0xff]  ;;  %649 = vset.pattern.permute.xlu2 %v687_v11  ;;  %300 = vst.msk [vmem:[#allocation4 + $0x8] sm:$0xff] %vm298_vm0, %v688_v12  ;;  %s277_s25 = scalar_lea.vmem %s782_s2, %s727_s16  ;;  %s287_s28 = scalar_lea.vmem %s783_s3, %s727_s16 }
  0x10   : > { %616 = vmatpush.xpose.msk.msra.mxu2 %vm298_vm0, %v306_v0  ;;  %v302_v1 = vld [vmem:[%s257_s22 + $0x8] sm:$0xff]  ;;  %604 = vmatpush.xpose.msk.msra.mxu0 %vm298_vm0, %v306_v0  ;;  %v305_v3 = vld [vmem:[%s267_s19] sm:$0xff]  ;;  %v303_v5 = vmul.f32 0.35355338, %v301_v2  ;;  %296 = vst.msk [vmem:[#allocation3] sm:$0xff] %vm293_vm1, %v688_v12 }
  0x11   : > { %v304_v4 = vmul.f32 0.35355338, %v302_v1  ;;  %297 = vst.msk [vmem:[#allocation3 + $0x8] sm:$0xff] %vm293_vm1, %v688_v12  ;;  %v308_v25 = vld [vmem:[%s277_s25 + $0x8] sm:$0xff]  ;;  %v307_v26 = vld [vmem:[%s277_s25] sm:$0xff] }
  0x12   : > { %299 = vst.msk [vmem:[#allocation4] sm:$0xff] %vm298_vm0, %v688_v12  ;;  %618 = vmatpush.msra.mxu3 %v308_v25  ;;  %427 = vmatpush.msra.mxu1 %v308_v25 }
  0x14   : > { %617 = vmatpush.xpose.msk.msra.mxu2 %vm298_vm0, %v305_v3  ;;  %605 = vmatpush.xpose.msk.msra.mxu0 %vm298_vm0, %v305_v3  ;;  %v346_v13 = vld [vmem:[#allocation2 + $0x8] sm:$0xff] }
  0x15   : > { %v345_v17 = vld [vmem:[#allocation2] sm:$0xff]  ;;  %619 = vmatpush.msra.mxu3 %v307_v26  ;;  %428 = vmatpush.msra.mxu1 %v307_v26 }
  0x16   : > { %v394_v41 = vld [vmem:[#allocation4 + $0x8] sm:$0xff] }
  0x17   : > { %607 = vmatmul.msk.f32.vlgmr.msra.gmra.mxu2 %vm298_vm0, %v304_v4  ;;  %606 = vmatmul.msk.f32.vlgmr.msra.gmra.mxu0 %vm298_vm0, %v303_v5  ;;  %v378_v37 = vld [vmem:[#allocation3] sm:$0xff] }
  0x18   : > { %v379_v43 = vld [vmem:[#allocation3 + $0x8] sm:$0xff] }
  0x19   : > { %v393_v44 = vld [vmem:[#allocation4] sm:$0xff] }
  0x94   : > { %v339_v9 = vpop.f32.mrf.mxu0 }
  0x95   : > { %v348_v10 = vsel %vm347_vm2, %v339_v9, -inf }
  0x9a   : > { %v342_v7 = vpop.f32.mrf.mxu2 }
  0x9b   : > { %v351_v8 = vsel %vm347_vm2, %v342_v7, -inf }
  0x9c   : > { %352 = vmax.xlane.f32.xlu0 %v351_v8 }
  0xa4   : > { %349 = vmax.xlane.f32.xlu0 %v348_v10 }
 0x10f   : > { %v353_v14 = vpop.xlane.xlu0 %352 }
 0x110   : > { %v355_v15 = vmax.f32 %v346_v13, %v353_v14 }
 0x112   : > { %441 = vst.msk [vmem:[#allocation2 + $0x8] sm:$0xff] %vm293_vm1, %v355_v15  ;;  %369 = vperm.xlu1 %647, %v355_v15   ;;  %v357_v16 = vsub.f32 %v346_v13, %v355_v15 }
 0x114   : > { %v360_v18 = vmul.f32 1.442695, %v357_v16 }
 0x116   : > { %650 = vpow2.f32 %v360_v18 }
 0x117   : > { %v350_v19 = vpop.xlane.xlu0 %349 }
 0x118   : > { %v354_v20 = vmax.f32 %v345_v17, %v350_v19 }
 0x11a   : > { %v356_v21 = vsub.f32 %v345_v17, %v354_v20  ;;  %440 = vst.msk [vmem:[#allocation2] sm:$0xff] %vm293_vm1, %v354_v20  ;;  %364 = vperm.xlu1 %647, %v354_v20  }
 0x11c   : > { %v358_v22 = vmul.f32 1.442695, %v356_v21  ;;  %v651_v23 = vpop.eup %650 }
 0x11d   : > { %v381_v48 = vmul.f32 %v651_v23, %v379_v43 }
 0x11e   : > { %652 = vpow2.f32 %v358_v22 }
 0x122   : > { %402 = vperm.xlu1 %647, %v651_v23  }
 0x124   : > { %v653_v24 = vpop.eup %652 }
 0x125   : > { %397 = vperm.xlu0 %648, %v653_v24   ;;  %v380_v38 = vmul.f32 %v653_v24, %v378_v37 }
 0x184   : > { %v370_v27 = vpop.permute.xlu1 %369 }
 0x185   : > { %v373_v28 = vsub.f32 %v342_v7, %v370_v27 }
 0x187   : > { %v376_v29 = vmul.f32 1.442695, %v373_v28 }
 0x189   : > { %654 = vpow2.f32 %v376_v29 }
 0x18c   : > { %v365_v30 = vpop.permute.xlu1 %364 }
 0x18d   : > { %v372_v31 = vsub.f32 %v339_v9, %v365_v30 }
 0x18f   : > { %v655_v32 = vpop.eup %654  ;;  %v374_v33 = vmul.f32 1.442695, %v372_v31 }
 0x190   : > { %609 = vmatmul.msk.f32.vlgmr.msra.gmra.mxu3 %vm347_vm2, %v655_v32  ;;  %v385_v36 = vsel %vm347_vm2, %v655_v32, 0.0 }
 0x191   : > { %656 = vpow2.f32 %v374_v33 }
 0x194   : > { %v403_v42 = vpop.permute.xlu1 %402 }
 0x195   : > { %v406_v46 = vmul.f32 %v403_v42, %v394_v41 }
 0x197   : > { %v657_v34 = vpop.eup %656  ;;  %v398_v45 = vpop.permute.xlu0 %397 }
 0x198   : > { %608 = vmatmul.msk.f32.vlgmr.msra.gmra.mxu1 %vm347_vm2, %v657_v34  ;;  %v382_v35 = vsel %vm347_vm2, %v657_v34, 0.0  ;;  %v405_v49 = vmul.f32 %v398_v45, %v393_v44 }
 0x199   : > { %383 = vadd.xlane.f32.xlu2 %v382_v35 }
 0x1a1   : > { %386 = vadd.xlane.f32.xlu2 %v385_v36 }
 0x20c   : > { %v384_v39 = vpop.xlane.xlu2 %383 }
 0x20d   : > { %v388_v40 = vadd.f32 %v384_v39, %v380_v38 }
 0x20f   : > { %391 = vst.msk [vmem:[#allocation3] sm:$0xff] %vm293_vm1, %v388_v40 }
 0x213   : > { %v433_v47 = vpop.f32.mrf.mxu3 }
 0x214   : > { %v437_v50 = vadd.f32 %v433_v47, %v406_v46  ;;  %v387_v51 = vpop.xlane.xlu2 %386 }
 0x215   : > { %v389_v52 = vadd.f32 %v387_v51, %v381_v48  ;;  %v430_v53 = vpop.f32.mrf.mxu1 }
 0x216   : > { %439 = vst.msk [vmem:[#allocation4 + $0x8] sm:$0xff] %vm298_vm0, %v437_v50  ;;  %v436_v54 = vadd.f32 %v430_v53, %v405_v49  ;;  %v447_v55 = vld [vmem:[#allocation3] sm:$0xff] }
 0x217   : > { %392 = vst.msk [vmem:[#allocation3 + $0x8] sm:$0xff] %vm293_vm1, %v389_v52  ;;  %658 = vrcp.f32 %v447_v55 }
 0x218   : > { %438 = vst.msk [vmem:[#allocation4] sm:$0xff] %vm298_vm0, %v436_v54 }
 0x21d   : > { %v659_v56 = vpop.eup %658  ;;  %v446_v62 = vld [vmem:[#allocation4 + $0x8] sm:$0xff] }
 0x21e   : > { %453 = vperm.xlu2 %649, %v659_v56   ;;  %v448_v57 = vld [vmem:[#allocation3 + $0x8] sm:$0xff] }
 0x21f   : > { %660 = vrcp.f32 %v448_v57  ;;  %v445_v59 = vld [vmem:[#allocation4] sm:$0xff] }
 0x225   : > { %v661_v58 = vpop.eup %660 }
 0x226   : > { %458 = vperm.xlu1 %647, %v661_v58  }
 0x278   : > { %v454_v60 = vpop.permute.xlu2 %453 }
 0x279   : > { %v461_v61 = vmul.f32 %v454_v60, %v445_v59 }
 0x27b   : > { %463 = vst.msk [vmem:[%s287_s28] sm:$0xff] %vm298_vm0, %v461_v61 }
 0x298   : > { %v459_v63 = vpop.permute.xlu1 %458 }
 0x299   : > { %v462_v0 = vmul.f32 %v459_v63, %v446_v62 }
 0x29b   : > { %464 = vst.msk [vmem:[%s287_s28 + $0x8] sm:$0xff] %vm298_vm0, %v462_v0 }
 0x29c PF: > { %s13_s14 = sadd.s32 1, %s684_s14   ;;  %s784_s12 = smov %s680_s13 }
 0x29d   : > { %p10_p5 = scmp.ge.s32.totalorder %s13_s14, 10   ;;  %s785_s13 = smov %s787_s15 }
 0x29f   :  { %12 = sbr.rel (!%p10_p5) target bundleno = 2 (0x2), region = 76 }

// kernel: image_encoder_vit.26
= control target key start
LH: loop header
LB: loop body
LE: loop exit
PB: predicated region body
PF: predicated region fallthrough
CT: control target
= control target key end

     0   :  { %vm21_vm0 = vcmask 261120   ;;  %v169_v3 = vmov 0.0   ;;  %s294_s1 = inlined_call_operand.vmem [shape: f32[128,32], index: 1, kind: input, shape index: {}]   ;;  %s295_s2 = inlined_call_operand.vmem [shape: f32[1,32], index: 2, kind: input, shape index: {}]   ;;  %s296_s0 = inlined_call_operand.vmem [shape: f32[32,128], index: 0, kind: input, shape index: {}]   ;;  %s297_s3 = inlined_call_operand.vmem [shape: f32[32,32], index: 3, kind: input, shape index: {}]   ;;  %s298_s4 = inlined_call_operand.vmem [shape: f32[32,32], index: 4, kind: output, shape index: {}]  }
   0x1   :  { %v49_v0 = vld [vmem:[%s294_s1 + $0x78] sm:$0xff]  ;;  %v48_v1 = vld [vmem:[%s294_s1 + $0x70] sm:$0xff]  ;;  %v47_v2 = vld [vmem:[%s294_s1 + $0x68] sm:$0xff]  ;;  %22 = vst.msk [vmem:[#allocation2] sm:$0xff] %vm21_vm0, %v169_v3 }
   0x2   :  { %120 = vmatpush.msra.mxu2 %v49_v0  ;;  %121 = vmatpush.msra.mxu3 %v49_v0  ;;  %v46_v4 = vld [vmem:[%s294_s1 + $0x60] sm:$0xff]  ;;  %23 = vst.msk [vmem:[#allocation2 + $0x8] sm:$0xff] %vm21_vm0, %v169_v3  ;;  %v45_v5 = vld [vmem:[%s294_s1 + $0x58] sm:$0xff]  ;;  %v44_v6 = vld [vmem:[%s294_s1 + $0x50] sm:$0xff] }
   0x3   :  { %50 = vmatpush.msra.mxu0 %v49_v0  ;;  %119 = vmatpush.msra.mxu1 %v49_v0  ;;  %24 = vst.msk [vmem:[#allocation2 + $0x10] sm:$0xff] %vm21_vm0, %v169_v3  ;;  %v43_v7 = vld [vmem:[%s294_s1 + $0x48] sm:$0xff]  ;;  %v42_v8 = vld [vmem:[%s294_s1 + $0x40] sm:$0xff]  ;;  %v41_v9 = vld [vmem:[%s294_s1 + $0x38] sm:$0xff] }
   0x4   :  { %123 = vmatpush.msra.mxu2 %v48_v1  ;;  %124 = vmatpush.msra.mxu3 %v48_v1  ;;  %25 = vst.msk [vmem:[#allocation2 + $0x18] sm:$0xff] %vm21_vm0, %v169_v3  ;;  %v40_v10 = vld [vmem:[%s294_s1 + $0x30] sm:$0xff]  ;;  %v39_v11 = vld [vmem:[%s294_s1 + $0x28] sm:$0xff]  ;;  %v38_v12 = vld [vmem:[%s294_s1 + $0x20] sm:$0xff] }
   0x5   :  { %51 = vmatpush.msra.mxu0 %v48_v1  ;;  %122 = vmatpush.msra.mxu1 %v48_v1  ;;  %v37_v13 = vld [vmem:[%s294_s1 + $0x18] sm:$0xff]  ;;  %v36_v14 = vld [vmem:[%s294_s1 + $0x10] sm:$0xff]  ;;  %v35_v15 = vld [vmem:[%s294_s1 + $0x8] sm:$0xff] }
   0x6   :  { %126 = vmatpush.msra.mxu2 %v47_v2  ;;  %127 = vmatpush.msra.mxu3 %v47_v2  ;;  %v34_v16 = vld [vmem:[%s294_s1] sm:$0xff]  ;;  %v32_v17 = vld [vmem:[%s296_s0 + $0x10] sm:$0xff]  ;;  %v33_v18 = vld [vmem:[%s296_s0 + $0x18] sm:$0xff] }
   0x7   :  { %52 = vmatpush.msra.mxu0 %v47_v2  ;;  %125 = vmatpush.msra.mxu1 %v47_v2  ;;  %v30_v19 = vld [vmem:[%s296_s0] sm:$0xff]  ;;  %v31_v20 = vld [vmem:[%s296_s0 + $0x8] sm:$0xff]  ;;  %v105_v43 = vld [vmem:[%s297_s3 + $0x10] sm:$0xff] }
   0x8   :  { %129 = vmatpush.msra.mxu2 %v46_v4  ;;  %130 = vmatpush.msra.mxu3 %v46_v4  ;;  %v26_v21 = vld [vmem:[#allocation2] sm:$0xff]  ;;  %v104_v38 = vld [vmem:[%s297_s3 + $0x8] sm:$0xff]  ;;  %v106_v46 = vld [vmem:[%s297_s3 + $0x18] sm:$0xff] }
   0x9   :  { %53 = vmatpush.msra.mxu0 %v46_v4  ;;  %128 = vmatpush.msra.mxu1 %v46_v4  ;;  %v27_v22 = vld [vmem:[#allocation2 + $0x8] sm:$0xff]  ;;  %v168_v33 = vld [vmem:[%s295_s2] ss:$0 sm:$0xff] }
   0xa   :  { %132 = vmatpush.msra.mxu2 %v45_v5  ;;  %133 = vmatpush.msra.mxu3 %v45_v5  ;;  %v28_v27 = vld [vmem:[#allocation2 + $0x10] sm:$0xff]  ;;  %v103_v35 = vld [vmem:[%s297_s3] sm:$0xff] }
   0xb   :  { %54 = vmatpush.msra.mxu0 %v45_v5  ;;  %131 = vmatpush.msra.mxu1 %v45_v5  ;;  %v29_v28 = vld [vmem:[#allocation2 + $0x18] sm:$0xff] }
   0xc   :  { %135 = vmatpush.msra.mxu2 %v44_v6  ;;  %136 = vmatpush.msra.mxu3 %v44_v6 }
   0xd   :  { %55 = vmatpush.msra.mxu0 %v44_v6  ;;  %134 = vmatpush.msra.mxu1 %v44_v6 }
   0xe   :  { %138 = vmatpush.msra.mxu2 %v43_v7  ;;  %139 = vmatpush.msra.mxu3 %v43_v7 }
   0xf   :  { %56 = vmatpush.msra.mxu0 %v43_v7  ;;  %137 = vmatpush.msra.mxu1 %v43_v7 }
  0x10   :  { %141 = vmatpush.msra.mxu2 %v42_v8  ;;  %142 = vmatpush.msra.mxu3 %v42_v8 }
  0x11   :  { %57 = vmatpush.msra.mxu0 %v42_v8  ;;  %140 = vmatpush.msra.mxu1 %v42_v8 }
  0x12   :  { %144 = vmatpush.msra.mxu2 %v41_v9  ;;  %145 = vmatpush.msra.mxu3 %v41_v9 }
  0x13   :  { %58 = vmatpush.msra.mxu0 %v41_v9  ;;  %143 = vmatpush.msra.mxu1 %v41_v9 }
  0x14   :  { %147 = vmatpush.msra.mxu2 %v40_v10  ;;  %148 = vmatpush.msra.mxu3 %v40_v10 }
  0x15   :  { %59 = vmatpush.msra.mxu0 %v40_v10  ;;  %146 = vmatpush.msra.mxu1 %v40_v10 }
  0x16   :  { %150 = vmatpush.msra.mxu2 %v39_v11  ;;  %151 = vmatpush.msra.mxu3 %v39_v11 }
  0x17   :  { %60 = vmatpush.msra.mxu0 %v39_v11  ;;  %149 = vmatpush.msra.mxu1 %v39_v11 }
  0x18   :  { %153 = vmatpush.msra.mxu2 %v38_v12  ;;  %154 = vmatpush.msra.mxu3 %v38_v12 }
  0x19   :  { %61 = vmatpush.msra.mxu0 %v38_v12  ;;  %152 = vmatpush.msra.mxu1 %v38_v12 }
  0x1a   :  { %156 = vmatpush.msra.mxu2 %v37_v13  ;;  %157 = vmatpush.msra.mxu3 %v37_v13 }
  0x1b   :  { %62 = vmatpush.msra.mxu0 %v37_v13  ;;  %155 = vmatpush.msra.mxu1 %v37_v13 }
  0x1c   :  { %159 = vmatpush.msra.mxu2 %v36_v14  ;;  %160 = vmatpush.msra.mxu3 %v36_v14 }
  0x1d   :  { %63 = vmatpush.msra.mxu0 %v36_v14  ;;  %158 = vmatpush.msra.mxu1 %v36_v14 }
  0x1e   :  { %162 = vmatpush.msra.mxu2 %v35_v15  ;;  %163 = vmatpush.msra.mxu3 %v35_v15 }
  0x1f   :  { %64 = vmatpush.msra.mxu0 %v35_v15  ;;  %161 = vmatpush.msra.mxu1 %v35_v15 }
  0x20   :  { %165 = vmatpush.msra.mxu2 %v34_v16  ;;  %166 = vmatpush.msra.mxu3 %v34_v16 }
  0x21   :  { %72 = vmatmul.f32.vlgmr.msra.gmra.mxu2 %v32_v17  ;;  %75 = vmatmul.f32.vlgmr.msra.gmra.mxu3 %v33_v18 }
  0x22   :  { %65 = vmatpush.msra.mxu0 %v34_v16  ;;  %164 = vmatpush.msra.mxu1 %v34_v16 }
  0x23   :  { %66 = vmatmul.f32.vlgmr.msra.gmra.mxu0 %v30_v19  ;;  %69 = vmatmul.f32.vlgmr.msra.gmra.mxu1 %v31_v20 }
  0xa0   :  { %v67_v23 = vpop.f32.mrf.mxu0  ;;  %v70_v24 = vpop.f32.mrf.mxu1 }
  0xa1   :  { %v79_v25 = vadd.f32 %v67_v23, %v26_v21  ;;  %v80_v26 = vadd.f32 %v70_v24, %v27_v22 }
  0xa3   :  { %84 = vst.msk [vmem:[#allocation2] sm:$0xff] %vm21_vm0, %v79_v25 }
  0xa4   :  { %85 = vst.msk [vmem:[#allocation2 + $0x8] sm:$0xff] %vm21_vm0, %v80_v26  ;;  %v73_v29 = vpop.f32.mrf.mxu2  ;;  %v76_v30 = vpop.f32.mrf.mxu3 }
  0xa5   :  { %v81_v31 = vadd.f32 %v73_v29, %v28_v27  ;;  %v82_v32 = vadd.f32 %v76_v30, %v29_v28 }
  0xa7   :  { %86 = vst.msk [vmem:[#allocation2 + $0x10] sm:$0xff] %vm21_vm0, %v81_v31 }
  0xa8   :  { %87 = vst.msk [vmem:[#allocation2 + $0x18] sm:$0xff] %vm21_vm0, %v82_v32 }
  0xaa   :  { %v91_v34 = vld [vmem:[#allocation2] sm:$0xff] }
  0xab   :  { %v99_v36 = vadd.f32 %v168_v33, %v91_v34  ;;  %v92_v37 = vld [vmem:[#allocation2 + $0x8] sm:$0xff] }
  0xac   :  { %v100_v39 = vadd.f32 %v168_v33, %v92_v37 }
  0xad   :  { %v107_v40 = vadd.f32 %v103_v35, %v99_v36 }
  0xae   :  { %v108_v41 = vadd.f32 %v104_v38, %v100_v39  ;;  %v93_v42 = vld [vmem:[#allocation2 + $0x10] sm:$0xff] }
  0xaf   :  { %111 = vst.msk [vmem:[%s298_s4] sm:$0xff] %vm21_vm0, %v107_v40  ;;  %v101_v44 = vadd.f32 %v168_v33, %v93_v42  ;;  %v94_v45 = vld [vmem:[#allocation2 + $0x18] sm:$0xff] }
  0xb0   :  { %112 = vst.msk [vmem:[%s298_s4 + $0x8] sm:$0xff] %vm21_vm0, %v108_v41  ;;  %v102_v47 = vadd.f32 %v168_v33, %v94_v45 }
  0xb1   :  { %v109_v48 = vadd.f32 %v105_v43, %v101_v44 }
  0xb2   :  { %v110_v49 = vadd.f32 %v106_v46, %v102_v47 }
  0xb3   :  { %113 = vst.msk [vmem:[%s298_s4 + $0x10] sm:$0xff] %vm21_vm0, %v109_v48 }
  0xb4   :  { %114 = vst.msk [vmem:[%s298_s4 + $0x18] sm:$0xff] %vm21_vm0, %v110_v49 }

// kernel: image_encoder_vit.23
= control target key start
LH: loop header
LB: loop body
LE: loop exit
PB: predicated region body
PF: predicated region fallthrough
CT: control target
= control target key end

     0   :  { %vm21_vm0 = vcmask 261120   ;;  %v137_v2 = vmov 0.0   ;;  %s230_s1 = inlined_call_operand.vmem [shape: f32[32,32], index: 1, kind: input, shape index: {}]   ;;  %s231_s2 = inlined_call_operand.vmem [shape: f32[1,32], index: 2, kind: input, shape index: {}]   ;;  %s232_s0 = inlined_call_operand.vmem [shape: f32[32,32], index: 0, kind: input, shape index: {}]   ;;  %s233_s3 = inlined_call_operand.vmem [shape: f32[32,32], index: 3, kind: input, shape index: {}]   ;;  %s234_s4 = inlined_call_operand.vmem [shape: f32[32,32], index: 4, kind: output, shape index: {}]  }
   0x1   :  { %v37_v0 = vld [vmem:[%s230_s1 + $0x18] sm:$0xff]  ;;  %v36_v1 = vld [vmem:[%s230_s1 + $0x10] sm:$0xff]  ;;  %22 = vst.msk [vmem:[#allocation2] sm:$0xff] %vm21_vm0, %v137_v2  ;;  %v35_v3 = vld [vmem:[%s230_s1 + $0x8] sm:$0xff] }
   0x2   :  { %124 = vmatpush.msra.mxu2 %v37_v0  ;;  %125 = vmatpush.msra.mxu3 %v37_v0  ;;  %23 = vst.msk [vmem:[#allocation2 + $0x8] sm:$0xff] %vm21_vm0, %v137_v2  ;;  %v34_v4 = vld [vmem:[%s230_s1] sm:$0xff]  ;;  %v32_v5 = vld [vmem:[%s232_s0 + $0x10] sm:$0xff]  ;;  %v33_v6 = vld [vmem:[%s232_s0 + $0x18] sm:$0xff] }
   0x3   :  { %63 = vmatpush.msra.mxu0 %v37_v0  ;;  %123 = vmatpush.msra.mxu1 %v37_v0  ;;  %24 = vst.msk [vmem:[#allocation2 + $0x10] sm:$0xff] %vm21_vm0, %v137_v2  ;;  %v30_v7 = vld [vmem:[%s232_s0] sm:$0xff]  ;;  %v31_v8 = vld [vmem:[%s232_s0 + $0x8] sm:$0xff]  ;;  %v105_v31 = vld [vmem:[%s233_s3 + $0x10] sm:$0xff] }
   0x4   :  { %127 = vmatpush.msra.mxu2 %v36_v1  ;;  %128 = vmatpush.msra.mxu3 %v36_v1  ;;  %25 = vst.msk [vmem:[#allocation2 + $0x18] sm:$0xff] %vm21_vm0, %v137_v2  ;;  %v136_v21 = vld [vmem:[%s231_s2] ss:$0 sm:$0xff]  ;;  %v104_v26 = vld [vmem:[%s233_s3 + $0x8] sm:$0xff]  ;;  %v106_v34 = vld [vmem:[%s233_s3 + $0x18] sm:$0xff] }
   0x5   :  { %64 = vmatpush.msra.mxu0 %v36_v1  ;;  %126 = vmatpush.msra.mxu1 %v36_v1  ;;  %v103_v23 = vld [vmem:[%s233_s3] sm:$0xff] }
   0x6   :  { %130 = vmatpush.msra.mxu2 %v35_v3  ;;  %131 = vmatpush.msra.mxu3 %v35_v3 }
   0x7   :  { %65 = vmatpush.msra.mxu0 %v35_v3  ;;  %129 = vmatpush.msra.mxu1 %v35_v3 }
   0x8   :  { %133 = vmatpush.msra.mxu2 %v34_v4  ;;  %134 = vmatpush.msra.mxu3 %v34_v4  ;;  %v26_v9 = vld [vmem:[#allocation2] sm:$0xff] }
   0x9   :  { %121 = vmatmul.msk.f32.vlgmr.msra.gmra.mxu2 %vm21_vm0, %v32_v5  ;;  %122 = vmatmul.msk.f32.vlgmr.msra.gmra.mxu3 %vm21_vm0, %v33_v6  ;;  %v27_v10 = vld [vmem:[#allocation2 + $0x8] sm:$0xff] }
   0xa   :  { %66 = vmatpush.msra.mxu0 %v34_v4  ;;  %132 = vmatpush.msra.mxu1 %v34_v4  ;;  %v28_v15 = vld [vmem:[#allocation2 + $0x10] sm:$0xff] }
   0xb   :  { %119 = vmatmul.msk.f32.vlgmr.msra.gmra.mxu0 %vm21_vm0, %v30_v7  ;;  %120 = vmatmul.msk.f32.vlgmr.msra.gmra.mxu1 %vm21_vm0, %v31_v8  ;;  %v29_v16 = vld [vmem:[#allocation2 + $0x18] sm:$0xff] }
  0x88   :  { %v68_v11 = vpop.f32.mrf.mxu0  ;;  %v71_v12 = vpop.f32.mrf.mxu1 }
  0x89   :  { %v80_v13 = vadd.f32 %v68_v11, %v26_v9  ;;  %v81_v14 = vadd.f32 %v71_v12, %v27_v10 }
  0x8b   :  { %84 = vst.msk [vmem:[#allocation2] sm:$0xff] %vm21_vm0, %v80_v13 }
  0x8c   :  { %85 = vst.msk [vmem:[#allocation2 + $0x8] sm:$0xff] %vm21_vm0, %v81_v14  ;;  %v74_v17 = vpop.f32.mrf.mxu2  ;;  %v77_v18 = vpop.f32.mrf.mxu3 }
  0x8d   :  { %v82_v19 = vadd.f32 %v74_v17, %v28_v15  ;;  %v83_v20 = vadd.f32 %v77_v18, %v29_v16 }
  0x8f   :  { %86 = vst.msk [vmem:[#allocation2 + $0x10] sm:$0xff] %vm21_vm0, %v82_v19 }
  0x90   :  { %87 = vst.msk [vmem:[#allocation2 + $0x18] sm:$0xff] %vm21_vm0, %v83_v20 }
  0x92   :  { %v91_v22 = vld [vmem:[#allocation2] sm:$0xff] }
  0x93   :  { %v99_v24 = vadd.f32 %v136_v21, %v91_v22  ;;  %v92_v25 = vld [vmem:[#allocation2 + $0x8] sm:$0xff] }
  0x94   :  { %v100_v27 = vadd.f32 %v136_v21, %v92_v25 }
  0x95   :  { %v107_v28 = vadd.f32 %v103_v23, %v99_v24 }
  0x96   :  { %v108_v29 = vadd.f32 %v104_v26, %v100_v27  ;;  %v93_v30 = vld [vmem:[#allocation2 + $0x10] sm:$0xff] }
  0x97   :  { %111 = vst.msk [vmem:[%s234_s4] sm:$0xff] %vm21_vm0, %v107_v28  ;;  %v101_v32 = vadd.f32 %v136_v21, %v93_v30  ;;  %v94_v33 = vld [vmem:[#allocation2 + $0x18] sm:$0xff] }
  0x98   :  { %112 = vst.msk [vmem:[%s234_s4 + $0x8] sm:$0xff] %vm21_vm0, %v108_v29  ;;  %v102_v35 = vadd.f32 %v136_v21, %v94_v33 }
  0x99   :  { %v109_v36 = vadd.f32 %v105_v31, %v101_v32 }
  0x9a   :  { %v110_v37 = vadd.f32 %v106_v34, %v102_v35 }
  0x9b   :  { %113 = vst.msk [vmem:[%s234_s4 + $0x10] sm:$0xff] %vm21_vm0, %v109_v36 }
  0x9c   :  { %114 = vst.msk [vmem:[%s234_s4 + $0x18] sm:$0xff] %vm21_vm0, %v110_v37 }

// kernel: image_encoder_vit.34
= control target key start
LH: loop header
LB: loop body
LE: loop exit
PB: predicated region body
PF: predicated region fallthrough
CT: control target
= control target key end

     0   :  { %vm15_vm0 = vcmask 261120   ;;  %v114_v2 = vmov 0.0   ;;  %s182_s1 = inlined_call_operand.vmem [shape: f32[32,32], index: 1, kind: input, shape index: {}]   ;;  %s183_s0 = inlined_call_operand.vmem [shape: f32[32,32], index: 0, kind: input, shape index: {}]   ;;  %s184_s2 = inlined_call_operand.vmem [shape: f32[32,32], index: 2, kind: output, shape index: {}]  }
   0x1   :  { %v31_v0 = vld [vmem:[%s182_s1 + $0x18] sm:$0xff]  ;;  %v30_v1 = vld [vmem:[%s182_s1 + $0x10] sm:$0xff]  ;;  %16 = vst.msk [vmem:[#allocation2] sm:$0xff] %vm15_vm0, %v114_v2  ;;  %v29_v3 = vld [vmem:[%s182_s1 + $0x8] sm:$0xff] }
   0x2   :  { %102 = vmatpush.msra.mxu2 %v31_v0  ;;  %103 = vmatpush.msra.mxu3 %v31_v0  ;;  %17 = vst.msk [vmem:[#allocation2 + $0x8] sm:$0xff] %vm15_vm0, %v114_v2  ;;  %v28_v4 = vld [vmem:[%s182_s1] sm:$0xff]  ;;  %v26_v5 = vld [vmem:[%s183_s0 + $0x10] sm:$0xff]  ;;  %v27_v6 = vld [vmem:[%s183_s0 + $0x18] sm:$0xff] }
   0x3   :  { %57 = vmatpush.msra.mxu0 %v31_v0  ;;  %101 = vmatpush.msra.mxu1 %v31_v0  ;;  %18 = vst.msk [vmem:[#allocation2 + $0x10] sm:$0xff] %vm15_vm0, %v114_v2  ;;  %v24_v7 = vld [vmem:[%s183_s0] sm:$0xff]  ;;  %v25_v8 = vld [vmem:[%s183_s0 + $0x8] sm:$0xff] }
   0x4   :  { %105 = vmatpush.msra.mxu2 %v30_v1  ;;  %106 = vmatpush.msra.mxu3 %v30_v1  ;;  %19 = vst.msk [vmem:[#allocation2 + $0x18] sm:$0xff] %vm15_vm0, %v114_v2 }
   0x5   :  { %58 = vmatpush.msra.mxu0 %v30_v1  ;;  %104 = vmatpush.msra.mxu1 %v30_v1 }
   0x6   :  { %108 = vmatpush.msra.mxu2 %v29_v3  ;;  %109 = vmatpush.msra.mxu3 %v29_v3 }
   0x7   :  { %59 = vmatpush.msra.mxu0 %v29_v3  ;;  %107 = vmatpush.msra.mxu1 %v29_v3 }
   0x8   :  { %111 = vmatpush.msra.mxu2 %v28_v4  ;;  %112 = vmatpush.msra.mxu3 %v28_v4  ;;  %v20_v9 = vld [vmem:[#allocation2] sm:$0xff] }
   0x9   :  { %99 = vmatmul.msk.f32.vlgmr.msra.gmra.mxu2 %vm15_vm0, %v26_v5  ;;  %100 = vmatmul.msk.f32.vlgmr.msra.gmra.mxu3 %vm15_vm0, %v27_v6  ;;  %v21_v10 = vld [vmem:[#allocation2 + $0x8] sm:$0xff] }
   0xa   :  { %60 = vmatpush.msra.mxu0 %v28_v4  ;;  %110 = vmatpush.msra.mxu1 %v28_v4  ;;  %v22_v15 = vld [vmem:[#allocation2 + $0x10] sm:$0xff] }
   0xb   :  { %97 = vmatmul.msk.f32.vlgmr.msra.gmra.mxu0 %vm15_vm0, %v24_v7  ;;  %98 = vmatmul.msk.f32.vlgmr.msra.gmra.mxu1 %vm15_vm0, %v25_v8  ;;  %v23_v16 = vld [vmem:[#allocation2 + $0x18] sm:$0xff] }
  0x88   :  { %v62_v11 = vpop.f32.mrf.mxu0  ;;  %v65_v12 = vpop.f32.mrf.mxu1 }
  0x89   :  { %v74_v13 = vadd.f32 %v62_v11, %v20_v9  ;;  %v75_v14 = vadd.f32 %v65_v12, %v21_v10 }
  0x8b   :  { %78 = vst.msk [vmem:[#allocation2] sm:$0xff] %vm15_vm0, %v74_v13 }
  0x8c   :  { %79 = vst.msk [vmem:[#allocation2 + $0x8] sm:$0xff] %vm15_vm0, %v75_v14  ;;  %v68_v17 = vpop.f32.mrf.mxu2  ;;  %v71_v18 = vpop.f32.mrf.mxu3 }
  0x8d   :  { %v76_v19 = vadd.f32 %v68_v17, %v22_v15  ;;  %v77_v20 = vadd.f32 %v71_v18, %v23_v16 }
  0x8f   :  { %80 = vst.msk [vmem:[#allocation2 + $0x10] sm:$0xff] %vm15_vm0, %v76_v19 }
  0x90   :  { %81 = vst.msk [vmem:[#allocation2 + $0x18] sm:$0xff] %vm15_vm0, %v77_v20 }
  0x92   :  { %v85_v21 = vld [vmem:[#allocation2] sm:$0xff] }
  0x93   :  { %89 = vst.msk [vmem:[%s184_s2] sm:$0xff] %vm15_vm0, %v85_v21  ;;  %v86_v22 = vld [vmem:[#allocation2 + $0x8] sm:$0xff] }
  0x94   :  { %90 = vst.msk [vmem:[%s184_s2 + $0x8] sm:$0xff] %vm15_vm0, %v86_v22 }
  0x96   :  { %v87_v23 = vld [vmem:[#allocation2 + $0x10] sm:$0xff] }
  0x97   :  { %91 = vst.msk [vmem:[%s184_s2 + $0x10] sm:$0xff] %vm15_vm0, %v87_v23  ;;  %v88_v24 = vld [vmem:[#allocation2 + $0x18] sm:$0xff] }
  0x98   :  { %92 = vst.msk [vmem:[%s184_s2 + $0x18] sm:$0xff] %vm15_vm0, %v88_v24 }

// kernel: image_encoder_vit.35
= control target key start
LH: loop header
LB: loop body
LE: loop exit
PB: predicated region body
PF: predicated region fallthrough
CT: control target
= control target key end

     0   :  { %vm18_vm0 = vcmask 261120   ;;  %v151_v8 = vmov 32.0   ;;  %s229_s0 = inlined_call_operand.vmem [shape: f32[32,32], index: 0, kind: input, shape index: {}]   ;;  %s230_s1 = inlined_call_operand.vmem [shape: f32[1,32], index: 1, kind: input, shape index: {}]   ;;  %s231_s2 = inlined_call_operand.vmem [shape: f32[1,32], index: 2, kind: input, shape index: {}]   ;;  %s232_s3 = inlined_call_operand.vmem [shape: f32[32,32], index: 3, kind: output, shape index: {}]  }
   0x1   :  { %v16_v0 = vld [vmem:[%s229_s0 + $0x10] sm:$0xff]  ;;  %v14_v1 = vld [vmem:[%s229_s0] sm:$0xff]  ;;  %v17_v4 = vld [vmem:[%s229_s0 + $0x18] sm:$0xff]  ;;  %141 = vrcp.f32 %v151_v8 }
   0x2   :  { %v25_v2 = vsel %vm18_vm0, %v16_v0, 0.0  ;;  %v19_v3 = vsel %vm18_vm0, %v14_v1, 0.0  ;;  %v15_v5 = vld [vmem:[%s229_s0 + $0x8] sm:$0xff]  ;;  %v28_v6 = vsel %vm18_vm0, %v17_v4, 0.0  ;;  %v139_v61 = vld [vmem:[%s230_s1] ss:$0 sm:$0xff] }
   0x3   :  { %26 = vadd.xlane.f32.xlu1 %v25_v2  ;;  %20 = vadd.xlane.f32.xlu0 %v19_v3  ;;  %v22_v7 = vsel %vm18_vm0, %v15_v5, 0.0  ;;  %v140_v2 = vld [vmem:[%s231_s2] ss:$0 sm:$0xff] }
   0x7   :  { %v142_v9 = vpop.eup %141 }
   0x8   :  { %v32_v10 = vmul.f32 32.0, %v142_v9  ;;  %vm36_vm1 = vweird.f32 %v142_v9 }
   0xa   :  { %v33_v11 = vsub.f32 1.0, %v32_v10 }
   0xb   :  { %29 = vadd.xlane.f32.xlu1 %v28_v6  ;;  %23 = vadd.xlane.f32.xlu0 %v22_v7 }
   0xc   :  { %v34_v12 = vmul.f32 %v142_v9, %v33_v11 }
   0xe   :  { %v35_v13 = vadd.f32 %v142_v9, %v34_v12 }
  0x10   :  { %v37_v14 = vsel %vm36_vm1, %v142_v9, %v35_v13 }
  0x76   :  { %v27_v15 = vpop.xlane.xlu1 %26  ;;  %v21_v16 = vpop.xlane.xlu0 %20 }
  0x77   :  { %v40_v17 = vmul.f32 %v37_v14, %v27_v15  ;;  %v38_v18 = vmul.f32 %v37_v14, %v21_v16 }
  0x79   :  { %v188_v19 = vsub.f32 %v16_v0, %v40_v17  ;;  %v42_v20 = vsub.f32 %v14_v1, %v38_v18 }
  0x7b   :  { %v48_v21 = vmul.f32 %v188_v19, %v188_v19  ;;  %v46_v22 = vmul.f32 %v42_v20, %v42_v20 }
  0x7d   :  { %v56_v23 = vsel %vm18_vm0, %v48_v21, 0.0  ;;  %v50_v24 = vsel %vm18_vm0, %v46_v22, 0.0 }
  0x7e   :  { %v30_v25 = vpop.xlane.xlu1 %29  ;;  %57 = vadd.xlane.f32.xlu0 %v56_v23  ;;  %51 = vadd.xlane.f32.xlu2 %v50_v24  ;;  %v24_v26 = vpop.xlane.xlu0 %23 }
  0x7f   :  { %v41_v27 = vmul.f32 %v37_v14, %v30_v25  ;;  %v39_v28 = vmul.f32 %v37_v14, %v24_v26 }
  0x81   :  { %v194_v29 = vsub.f32 %v17_v4, %v41_v27  ;;  %v196_v30 = vsub.f32 %v15_v5, %v39_v28 }
  0x83   :  { %v49_v31 = vmul.f32 %v194_v29, %v194_v29  ;;  %v47_v32 = vmul.f32 %v196_v30, %v196_v30 }
  0x85   :  { %v59_v33 = vsel %vm18_vm0, %v49_v31, 0.0  ;;  %v53_v34 = vsel %vm18_vm0, %v47_v32, 0.0 }
  0x86   :  { %60 = vadd.xlane.f32.xlu1 %v59_v33  ;;  %54 = vadd.xlane.f32.xlu2 %v53_v34 }
  0xf1   :  { %v52_v35 = vpop.xlane.xlu2 %51  ;;  %v58_v36 = vpop.xlane.xlu0 %57 }
  0xf2   :  { %v62_v37 = vmul.f32 %v52_v35, %v37_v14  ;;  %v64_v38 = vmul.f32 %v58_v36, %v37_v14 }
  0xf4   :  { %v66_v39 = vadd.f32 1e-06, %v62_v37  ;;  %v68_v40 = vadd.f32 1e-06, %v64_v38 }
  0xf6   :  { %143 = vrsqrt.f32 %v66_v39  ;;  %vm76_vm4 = vweird.f32 %v66_v39  ;;  %vm96_vm6 = vweird.f32 %v68_v40 }
  0xf7   :  { %145 = vrsqrt.f32 %v68_v40 }
  0xf9   :  { %v61_v41 = vpop.xlane.xlu1 %60  ;;  %v55_v42 = vpop.xlane.xlu2 %54 }
  0xfa   :  { %v65_v43 = vmul.f32 %v61_v41, %v37_v14  ;;  %v63_v44 = vmul.f32 %v55_v42, %v37_v14 }
  0xfc   :  { %v144_v45 = vpop.eup %143  ;;  %v69_v46 = vadd.f32 1e-06, %v65_v43  ;;  %v67_v47 = vadd.f32 1e-06, %v63_v44 }
  0xfd   :  { %v146_v48 = vpop.eup %145  ;;  %v71_v49 = vmul.f32 %v144_v45, %v66_v39  ;;  %vm77_vm2 = vweird.f32 %v144_v45 }
  0xfe   :  { %v91_v50 = vmul.f32 %v146_v48, %v68_v40  ;;  %147 = vrsqrt.f32 %v69_v46  ;;  %vm97_vm3 = vweird.f32 %v146_v48  ;;  %vm78_vm5 = vmor %vm76_vm4, %vm77_vm2  ;;  %vm106_vm10 = vweird.f32 %v69_v46 }
  0xff   :  { %v72_v51 = vmul.f32 %v144_v45, %v71_v49  ;;  %149 = vrsqrt.f32 %v67_v47  ;;  %vm98_vm7 = vmor %vm96_vm6, %vm97_vm3  ;;  %vm86_vm12 = vweird.f32 %v67_v47 }
 0x100   :  { %v92_v52 = vmul.f32 %v146_v48, %v91_v50 }
 0x101   :  { %v73_v53 = vmul.f32 0.5, %v72_v51 }
 0x102   :  { %v93_v54 = vmul.f32 0.5, %v92_v52 }
 0x103   :  { %v74_v55 = vsub.f32 1.5, %v73_v53 }
 0x104   :  { %v148_v56 = vpop.eup %147  ;;  %v94_v57 = vsub.f32 1.5, %v93_v54 }
 0x105   :  { %v150_v58 = vpop.eup %149  ;;  %v75_v59 = vmul.f32 %v144_v45, %v74_v55  ;;  %v101_v60 = vmul.f32 %v148_v56, %v69_v46  ;;  %vm107_vm8 = vweird.f32 %v148_v56 }
 0x106   :  { %v95_v62 = vmul.f32 %v146_v48, %v94_v57  ;;  %v81_v63 = vmul.f32 %v150_v58, %v67_v47  ;;  %vm87_vm9 = vweird.f32 %v150_v58  ;;  %vm108_vm11 = vmor %vm106_vm10, %vm107_vm8 }
 0x107   :  { %v79_v0 = vsel %vm78_vm5, %v144_v45, %v75_v59  ;;  %v102_v1 = vmul.f32 %v148_v56, %v101_v60  ;;  %vm88_vm13 = vmor %vm86_vm12, %vm87_vm9 }
 0x108   :  { %v110_v3 = vmul.f32 %v79_v0, %v42_v20  ;;  %v99_v4 = vsel %vm98_vm7, %v146_v48, %v95_v62  ;;  %v82_v5 = vmul.f32 %v150_v58, %v81_v63 }
 0x109   :  { %v112_v6 = vmul.f32 %v99_v4, %v188_v19  ;;  %v103_v7 = vmul.f32 0.5, %v102_v1 }
 0x10a   :  { %v118_v8 = vmul.f32 %v139_v61, %v110_v3  ;;  %v83_v9 = vmul.f32 0.5, %v82_v5 }
 0x10b   :  { %v120_v10 = vmul.f32 %v139_v61, %v112_v6  ;;  %v104_v11 = vsub.f32 1.5, %v103_v7 }
 0x10c   :  { %v126_v12 = vadd.f32 %v140_v2, %v118_v8  ;;  %v84_v13 = vsub.f32 1.5, %v83_v9 }
 0x10d   :  { %v128_v14 = vadd.f32 %v140_v2, %v120_v10  ;;  %v105_v15 = vmul.f32 %v148_v56, %v104_v11 }
 0x10e   :  { %130 = vst.msk [vmem:[%s232_s3] sm:$0xff] %vm18_vm0, %v126_v12  ;;  %v85_v16 = vmul.f32 %v150_v58, %v84_v13 }
 0x10f   :  { %132 = vst.msk [vmem:[%s232_s3 + $0x10] sm:$0xff] %vm18_vm0, %v128_v14  ;;  %v109_v17 = vsel %vm108_vm11, %v148_v56, %v105_v15 }
 0x110   :  { %v113_v18 = vmul.f32 %v109_v17, %v194_v29  ;;  %v89_v19 = vsel %vm88_vm13, %v150_v58, %v85_v16 }
 0x111   :  { %v111_v20 = vmul.f32 %v89_v19, %v196_v30 }
 0x112   :  { %v121_v21 = vmul.f32 %v139_v61, %v113_v18 }
 0x113   :  { %v119_v22 = vmul.f32 %v139_v61, %v111_v20 }
 0x114   :  { %v129_v23 = vadd.f32 %v140_v2, %v121_v21 }
 0x115   :  { %v127_v24 = vadd.f32 %v140_v2, %v119_v22 }
 0x116   :  { %133 = vst.msk [vmem:[%s232_s3 + $0x18] sm:$0xff] %vm18_vm0, %v129_v23 }
 0x117   :  { %131 = vst.msk [vmem:[%s232_s3 + $0x8] sm:$0xff] %vm18_vm0, %v127_v24 }

// kernel: image_encoder_vit.36
= control target key start
LH: loop header
LB: loop body
LE: loop exit
PB: predicated region body
PF: predicated region fallthrough
CT: control target
= control target key end

     0   :  { %vm15_vm0 = vcmask 261120   ;;  %v216_v48 = vmov 0.0   ;;  %s404_s1 = inlined_call_operand.vmem [shape: f32[288,32], index: 1, kind: input, shape index: {}]   ;;  %s405_s0 = inlined_call_operand.vmem [shape: f32[32,288], index: 0, kind: input, shape index: {}]   ;;  %s406_s2 = inlined_call_operand.vmem [shape: f32[32,32], index: 2, kind: output, shape index: {}]  }
   0x1   :  { %v51_v0 = vld [vmem:[%s404_s1 + $0x78] sm:$0xff]  ;;  %v50_v2 = vld [vmem:[%s404_s1 + $0x70] sm:$0xff]  ;;  %v49_v4 = vld [vmem:[%s404_s1 + $0x68] sm:$0xff]  ;;  %16 = vst.msk [vmem:[#allocation2] sm:$0xff] %vm15_vm0, %v216_v48 }
   0x2   :  { %v67_v1 = vld [vmem:[%s404_s1 + $0xf8] sm:$0xff]  ;;  %85 = vmatpush.msra.mxu0 %v51_v0  ;;  %v66_v3 = vld [vmem:[%s404_s1 + $0xf0] sm:$0xff]  ;;  %199 = vmatpush.msra.mxu3 %v51_v0  ;;  %v65_v5 = vld [vmem:[%s404_s1 + $0xe8] sm:$0xff]  ;;  %17 = vst.msk [vmem:[#allocation2 + $0x8] sm:$0xff] %vm15_vm0, %v216_v48 }
   0x3   :  { %114 = vmatpush.msra.mxu1 %v67_v1  ;;  %v48_v6 = vld [vmem:[%s404_s1 + $0x60] sm:$0xff]  ;;  %v47_v8 = vld [vmem:[%s404_s1 + $0x58] sm:$0xff]  ;;  %v46_v11 = vld [vmem:[%s404_s1 + $0x50] sm:$0xff]  ;;  %18 = vst.msk [vmem:[#allocation2 + $0x10] sm:$0xff] %vm15_vm0, %v216_v48 }
   0x4   :  { %86 = vmatpush.msra.mxu0 %v50_v2  ;;  %200 = vmatpush.msra.mxu3 %v50_v2  ;;  %v64_v7 = vld [vmem:[%s404_s1 + $0xe0] sm:$0xff]  ;;  %v63_v9 = vld [vmem:[%s404_s1 + $0xd8] sm:$0xff]  ;;  %v62_v12 = vld [vmem:[%s404_s1 + $0xd0] sm:$0xff]  ;;  %19 = vst.msk [vmem:[#allocation2 + $0x18] sm:$0xff] %vm15_vm0, %v216_v48 }
   0x5   :  { %115 = vmatpush.msra.mxu1 %v66_v3  ;;  %v71_v10 = vld [vmem:[%s404_s1 + $0x118] sm:$0xff]  ;;  %v70_v13 = vld [vmem:[%s404_s1 + $0x110] sm:$0xff]  ;;  %v69_v14 = vld [vmem:[%s404_s1 + $0x108] sm:$0xff] }
   0x6   :  { %87 = vmatpush.msra.mxu0 %v49_v4  ;;  %201 = vmatpush.msra.mxu3 %v49_v4  ;;  %v45_v15 = vld [vmem:[%s404_s1 + $0x48] sm:$0xff]  ;;  %v68_v17 = vld [vmem:[%s404_s1 + $0x100] sm:$0xff]  ;;  %v26_v20 = vld [vmem:[%s405_s0 + $0x10] sm:$0xff] }
   0x7   :  { %116 = vmatpush.msra.mxu1 %v65_v5  ;;  %155 = vmatpush.msra.mxu2 %v71_v10  ;;  %v61_v16 = vld [vmem:[%s404_s1 + $0xc8] sm:$0xff]  ;;  %v44_v18 = vld [vmem:[%s404_s1 + $0x40] sm:$0xff]  ;;  %v43_v21 = vld [vmem:[%s404_s1 + $0x38] sm:$0xff] }
   0x8   :  { %88 = vmatpush.msra.mxu0 %v48_v6  ;;  %202 = vmatpush.msra.mxu3 %v48_v6  ;;  %v60_v19 = vld [vmem:[%s404_s1 + $0xc0] sm:$0xff]  ;;  %v59_v22 = vld [vmem:[%s404_s1 + $0xb8] sm:$0xff]  ;;  %v42_v23 = vld [vmem:[%s404_s1 + $0x30] sm:$0xff] }
   0x9   :  { %117 = vmatpush.msra.mxu1 %v64_v7  ;;  %156 = vmatpush.msra.mxu2 %v70_v13  ;;  %v58_v24 = vld [vmem:[%s404_s1 + $0xb0] sm:$0xff]  ;;  %v41_v25 = vld [vmem:[%s404_s1 + $0x28] sm:$0xff]  ;;  %v40_v27 = vld [vmem:[%s404_s1 + $0x20] sm:$0xff] }
   0xa   :  { %89 = vmatpush.msra.mxu0 %v47_v8  ;;  %203 = vmatpush.msra.mxu3 %v47_v8  ;;  %v57_v26 = vld [vmem:[%s404_s1 + $0xa8] sm:$0xff]  ;;  %v56_v28 = vld [vmem:[%s404_s1 + $0xa0] sm:$0xff]  ;;  %v39_v30 = vld [vmem:[%s404_s1 + $0x18] sm:$0xff] }
   0xb   :  { %118 = vmatpush.msra.mxu1 %v63_v9  ;;  %157 = vmatpush.msra.mxu2 %v69_v14  ;;  %v29_v29 = vld [vmem:[%s405_s0 + $0x28] sm:$0xff]  ;;  %v55_v31 = vld [vmem:[%s404_s1 + $0x98] sm:$0xff]  ;;  %v38_v32 = vld [vmem:[%s404_s1 + $0x10] sm:$0xff] }
   0xc   :  { %90 = vmatpush.msra.mxu0 %v46_v11  ;;  %204 = vmatpush.msra.mxu3 %v46_v11  ;;  %v54_v33 = vld [vmem:[%s404_s1 + $0x90] sm:$0xff]  ;;  %v37_v34 = vld [vmem:[%s404_s1 + $0x8] sm:$0xff]  ;;  %v36_v36 = vld [vmem:[%s404_s1] sm:$0xff] }
   0xd   :  { %119 = vmatpush.msra.mxu1 %v62_v12  ;;  %158 = vmatpush.msra.mxu2 %v68_v17  ;;  %v53_v35 = vld [vmem:[%s404_s1 + $0x88] sm:$0xff]  ;;  %v52_v37 = vld [vmem:[%s404_s1 + $0x80] sm:$0xff]  ;;  %v27_v41 = vld [vmem:[%s405_s0 + $0x18] sm:$0xff] }
   0xe   :  { %91 = vmatpush.msra.mxu0 %v45_v15  ;;  %205 = vmatpush.msra.mxu3 %v45_v15  ;;  %v24_v38 = vld [vmem:[%s405_s0] sm:$0xff]  ;;  %v25_v39 = vld [vmem:[%s405_s0 + $0x8] sm:$0xff]  ;;  %v35_v43 = vld [vmem:[%s405_s0 + $0x58] sm:$0xff] }
   0xf   :  { %120 = vmatpush.msra.mxu1 %v61_v16  ;;  %195 = vmatmul.msk.f32.vlgmr.msra.gmra.mxu2 %vm15_vm0, %v26_v20  ;;  %v32_v40 = vld [vmem:[%s405_s0 + $0x40] sm:$0xff]  ;;  %v30_v44 = vld [vmem:[%s405_s0 + $0x30] sm:$0xff]  ;;  %v31_v45 = vld [vmem:[%s405_s0 + $0x38] sm:$0xff] }
  0x10   :  { %92 = vmatpush.msra.mxu0 %v44_v18  ;;  %206 = vmatpush.msra.mxu3 %v44_v18  ;;  %v28_v42 = vld [vmem:[%s405_s0 + $0x20] sm:$0xff]  ;;  %v33_v46 = vld [vmem:[%s405_s0 + $0x48] sm:$0xff]  ;;  %v34_v47 = vld [vmem:[%s405_s0 + $0x50] sm:$0xff] }
  0x11   :  { %121 = vmatpush.msra.mxu1 %v60_v19  ;;  %v20_v53 = vld [vmem:[#allocation2] sm:$0xff]  ;;  %v21_v60 = vld [vmem:[#allocation2 + $0x8] sm:$0xff]  ;;  %v22_v4 = vld [vmem:[#allocation2 + $0x10] sm:$0xff] }
  0x12   :  { %93 = vmatpush.msra.mxu0 %v43_v21  ;;  %207 = vmatpush.msra.mxu3 %v43_v21  ;;  %v23_v12 = vld [vmem:[#allocation2 + $0x18] sm:$0xff] }
  0x13   :  { %122 = vmatpush.msra.mxu1 %v59_v22 }
  0x14   :  { %94 = vmatpush.msra.mxu0 %v42_v23  ;;  %208 = vmatpush.msra.mxu3 %v42_v23 }
  0x15   :  { %123 = vmatpush.msra.mxu1 %v58_v24 }
  0x16   :  { %95 = vmatpush.msra.mxu0 %v41_v25  ;;  %209 = vmatpush.msra.mxu3 %v41_v25 }
  0x17   :  { %124 = vmatpush.msra.mxu1 %v57_v26  ;;  %196 = vmatmul.msk.f32.gmra.mxu2 %vm15_vm0, %v29_v29 }
  0x18   :  { %96 = vmatpush.msra.mxu0 %v40_v27  ;;  %210 = vmatpush.msra.mxu3 %v40_v27 }
  0x19   :  { %125 = vmatpush.msra.mxu1 %v56_v28 }
  0x1a   :  { %97 = vmatpush.msra.mxu0 %v39_v30  ;;  %211 = vmatpush.msra.mxu3 %v39_v30 }
  0x1b   :  { %126 = vmatpush.msra.mxu1 %v55_v31 }
  0x1c   :  { %98 = vmatpush.msra.mxu0 %v38_v32  ;;  %212 = vmatpush.msra.mxu3 %v38_v32 }
  0x1d   :  { %127 = vmatpush.msra.mxu1 %v54_v33 }
  0x1e   :  { %99 = vmatpush.msra.mxu0 %v37_v34  ;;  %213 = vmatpush.msra.mxu3 %v37_v34 }
  0x1f   :  { %128 = vmatpush.msra.mxu1 %v53_v35  ;;  %197 = vmatmul.msk.f32.gmra.mxu2 %vm15_vm0, %v32_v40 }
  0x20   :  { %100 = vmatpush.msra.mxu0 %v36_v36  ;;  %214 = vmatpush.msra.mxu3 %v36_v36 }
  0x21   :  { %129 = vmatpush.msra.mxu1 %v52_v37  ;;  %101 = vmatmul.f32.vlgmr.msra.gmra.mxu0 %v24_v38 }
  0x22   :  { %130 = vmatmul.f32.vlgmr.msra.gmra.mxu1 %v25_v39  ;;  %104 = vmatmul.f32.vlgmr.msra.gmra.mxu3 %v27_v41 }
  0x27   :  { %198 = vmatmul.msk.f32.gmra.mxu2 %vm15_vm0, %v35_v43 }
  0x2a   :  { %133 = vmatmul.f32.gmra.mxu1 %v28_v42  ;;  %107 = vmatmul.f32.gmra.mxu3 %v30_v44 }
  0x32   :  { %136 = vmatmul.f32.gmra.mxu1 %v31_v45  ;;  %110 = vmatmul.f32.gmra.mxu3 %v33_v46 }
  0x3a   :  { %139 = vmatmul.f32.gmra.mxu1 %v34_v47 }
  0x92   :  { %v160_v49 = vpop.f32.mrf.mxu2 }
  0x9a   :  { %v163_v55 = vpop.f32.mrf.mxu2 }
  0x9e   :  { %v102_v50 = vpop.f32.mrf.mxu0 }
  0x9f   :  { %v131_v51 = vpop.f32.mrf.mxu1 }
  0xa0   :  { %v132_v52 = vadd.f32 %v131_v51, %v102_v50 }
  0xa2   :  { %v161_v54 = vadd.f32 %v160_v49, %v132_v52  ;;  %v166_v63 = vpop.f32.mrf.mxu2 }
  0xa4   :  { %v172_v56 = vadd.f32 %v161_v54, %v20_v53 }
  0xa5   :  { %v105_v57 = vpop.f32.mrf.mxu3 }
  0xa6   :  { %176 = vst.msk [vmem:[#allocation2] sm:$0xff] %vm15_vm0, %v172_v56 }
  0xa7   :  { %v134_v58 = vpop.f32.mrf.mxu1 }
  0xa8   :  { %v135_v59 = vadd.f32 %v134_v58, %v105_v57 }
  0xaa   :  { %v164_v61 = vadd.f32 %v163_v55, %v135_v59  ;;  %v169_v8 = vpop.f32.mrf.mxu2 }
  0xac   :  { %v173_v62 = vadd.f32 %v164_v61, %v21_v60 }
  0xad   :  { %v183_v0 = vld [vmem:[#allocation2] sm:$0xff]  ;;  %v108_v1 = vpop.f32.mrf.mxu3 }
  0xae   :  { %187 = vst.msk [vmem:[%s406_s2] sm:$0xff] %vm15_vm0, %v183_v0 }
  0xaf   :  { %177 = vst.msk [vmem:[#allocation2 + $0x8] sm:$0xff] %vm15_vm0, %v173_v62  ;;  %v137_v2 = vpop.f32.mrf.mxu1 }
  0xb0   :  { %v138_v3 = vadd.f32 %v137_v2, %v108_v1 }
  0xb2   :  { %v167_v5 = vadd.f32 %v166_v63, %v138_v3 }
  0xb4   :  { %v174_v6 = vadd.f32 %v167_v5, %v22_v4 }
  0xb5   :  { %v111_v9 = vpop.f32.mrf.mxu3 }
  0xb6   :  { %v184_v7 = vld [vmem:[#allocation2 + $0x8] sm:$0xff]  ;;  %178 = vst.msk [vmem:[#allocation2 + $0x10] sm:$0xff] %vm15_vm0, %v174_v6 }
  0xb7   :  { %188 = vst.msk [vmem:[%s406_s2 + $0x8] sm:$0xff] %vm15_vm0, %v184_v7  ;;  %v140_v10 = vpop.f32.mrf.mxu1 }
  0xb8   :  { %v141_v11 = vadd.f32 %v140_v10, %v111_v9 }
  0xba   :  { %v170_v13 = vadd.f32 %v169_v8, %v141_v11 }
  0xbc   :  { %v175_v14 = vadd.f32 %v170_v13, %v23_v12 }
  0xbd   :  { %v185_v15 = vld [vmem:[#allocation2 + $0x10] sm:$0xff] }
  0xbe   :  { %189 = vst.msk [vmem:[%s406_s2 + $0x10] sm:$0xff] %vm15_vm0, %v185_v15 }
  0xbf   :  { %179 = vst.msk [vmem:[#allocation2 + $0x18] sm:$0xff] %vm15_vm0, %v175_v14 }
  0xc6   :  { %v186_v16 = vld [vmem:[#allocation2 + $0x18] sm:$0xff] }
  0xc7   :  { %190 = vst.msk [vmem:[%s406_s2 + $0x18] sm:$0xff] %vm15_vm0, %v186_v16 }

// kernel: image_encoder_vit.37
= control target key start
LH: loop header
LB: loop body
LE: loop exit
PB: predicated region body
PF: predicated region fallthrough
CT: control target
= control target key end

     0   :  { %vm19_vm0 = vcmask 261120   ;;  %s267_s0 = inlined_call_operand.vmem [shape: f32[32,32], index: 0, kind: input, shape index: {}]   ;;  %s268_s1 = inlined_call_operand.vmem [shape: f32[1,32], index: 1, kind: input, shape index: {}]   ;;  %s269_s2 = inlined_call_operand.vmem [shape: f32[1,32], index: 2, kind: input, shape index: {}]   ;;  %s270_s3 = inlined_call_operand.hbm [shape: f32[32,32], index: 3, kind: output, shape index: {}]  }
   0x1   :  { %v17_v0 = vld [vmem:[%s267_s0 + $0x10] sm:$0xff]  ;;  %v15_v1 = vld [vmem:[%s267_s0] sm:$0xff] }
   0x2   :  { %v26_v2 = vsel %vm19_vm0, %v17_v0, 0.0  ;;  %v20_v3 = vsel %vm19_vm0, %v15_v1, 0.0 }
   0x3   :  { %27 = vadd.xlane.f32.xlu1 %v26_v2  ;;  %21 = vadd.xlane.f32.xlu0 %v20_v3 }
   0x4   :  { %8 = vsyncpa [#allocation3], 0  ;;  %v18_v4 = vld [vmem:[%s267_s0 + $0x18] sm:$0xff]  ;;  %v16_v5 = vld [vmem:[%s267_s0 + $0x8] sm:$0xff]  ;;  %v195_v8 = vmov 32.0   ;;  %s141_s25 = sshll.u32 %s270_s3, 4  ;;  %s142_s25 = int_to_ptr.hbm [resolvable:$true] %s141_s25 }
   0x5   :  { %v29_v6 = vsel %vm19_vm0, %v18_v4, 0.0  ;;  %v23_v7 = vsel %vm19_vm0, %v16_v5, 0.0  ;;  %159 = vrcp.f32 %v195_v8  ;;  %v157_v61 = vld [vmem:[%s268_s1] ss:$0 sm:$0xff]  ;;  %s196_s1 = smov [#allocation2]   ;;  %s197_s26 = smov 128  }
   0x6   :  { %v158_v2 = vld [vmem:[%s269_s2] ss:$0 sm:$0xff]  ;;  %s139_s2 = sshll.u32 %s196_s1, 4  ;;  %s198_s27 = smov 8   ;;  %s140_s2 = int_to_ptr.vmem [resolvable:$true] %s139_s2 }
   0xb   :  { %30 = vadd.xlane.f32.xlu1 %v29_v6  ;;  %24 = vadd.xlane.f32.xlu0 %v23_v7  ;;  %v160_v9 = vpop.eup %159 }
   0xc   :  { %v33_v10 = vmul.f32 32.0, %v160_v9  ;;  %vm37_vm1 = vweird.f32 %v160_v9 }
   0xe   :  { %v34_v11 = vsub.f32 1.0, %v33_v10 }
  0x10   :  { %v35_v12 = vmul.f32 %v160_v9, %v34_v11 }
  0x12   :  { %v36_v13 = vadd.f32 %v160_v9, %v35_v12 }
  0x14   :  { %v38_v14 = vsel %vm37_vm1, %v160_v9, %v36_v13 }
  0x76   :  { %v28_v15 = vpop.xlane.xlu1 %27  ;;  %v22_v16 = vpop.xlane.xlu0 %21 }
  0x77   :  { %v41_v17 = vmul.f32 %v38_v14, %v28_v15  ;;  %v39_v18 = vmul.f32 %v38_v14, %v22_v16 }
  0x79   :  { %v235_v19 = vsub.f32 %v17_v0, %v41_v17  ;;  %v43_v20 = vsub.f32 %v15_v1, %v39_v18 }
  0x7b   :  { %v49_v21 = vmul.f32 %v235_v19, %v235_v19  ;;  %v47_v22 = vmul.f32 %v43_v20, %v43_v20 }
  0x7d   :  { %v57_v23 = vsel %vm19_vm0, %v49_v21, 0.0  ;;  %v51_v24 = vsel %vm19_vm0, %v47_v22, 0.0 }
  0x7e   :  { %v31_v25 = vpop.xlane.xlu1 %30  ;;  %58 = vadd.xlane.f32.xlu0 %v57_v23  ;;  %52 = vadd.xlane.f32.xlu2 %v51_v24  ;;  %v25_v26 = vpop.xlane.xlu0 %24 }
  0x7f   :  { %v42_v27 = vmul.f32 %v38_v14, %v31_v25  ;;  %v40_v28 = vmul.f32 %v38_v14, %v25_v26 }
  0x81   :  { %v241_v29 = vsub.f32 %v18_v4, %v42_v27  ;;  %v243_v30 = vsub.f32 %v16_v5, %v40_v28 }
  0x83   :  { %v50_v31 = vmul.f32 %v241_v29, %v241_v29  ;;  %v48_v32 = vmul.f32 %v243_v30, %v243_v30 }
  0x85   :  { %v60_v33 = vsel %vm19_vm0, %v50_v31, 0.0  ;;  %v54_v34 = vsel %vm19_vm0, %v48_v32, 0.0 }
  0x86   :  { %61 = vadd.xlane.f32.xlu1 %v60_v33  ;;  %55 = vadd.xlane.f32.xlu2 %v54_v34 }
  0xf1   :  { %v53_v35 = vpop.xlane.xlu2 %52  ;;  %v59_v36 = vpop.xlane.xlu0 %58 }
  0xf2   :  { %v63_v37 = vmul.f32 %v53_v35, %v38_v14  ;;  %v65_v38 = vmul.f32 %v59_v36, %v38_v14 }
  0xf4   :  { %v67_v39 = vadd.f32 1e-06, %v63_v37  ;;  %v69_v40 = vadd.f32 1e-06, %v65_v38 }
  0xf6   :  { %161 = vrsqrt.f32 %v67_v39  ;;  %vm77_vm4 = vweird.f32 %v67_v39  ;;  %vm97_vm6 = vweird.f32 %v69_v40 }
  0xf7   :  { %163 = vrsqrt.f32 %v69_v40 }
  0xf9   :  { %v62_v41 = vpop.xlane.xlu1 %61  ;;  %v56_v42 = vpop.xlane.xlu2 %55 }
  0xfa   :  { %v66_v43 = vmul.f32 %v62_v41, %v38_v14  ;;  %v64_v44 = vmul.f32 %v56_v42, %v38_v14 }
  0xfc   :  { %v162_v45 = vpop.eup %161  ;;  %v70_v46 = vadd.f32 1e-06, %v66_v43  ;;  %v68_v47 = vadd.f32 1e-06, %v64_v44 }
  0xfd   :  { %v164_v48 = vpop.eup %163  ;;  %v72_v49 = vmul.f32 %v162_v45, %v67_v39  ;;  %vm78_vm2 = vweird.f32 %v162_v45 }
  0xfe   :  { %v92_v50 = vmul.f32 %v164_v48, %v69_v40  ;;  %165 = vrsqrt.f32 %v70_v46  ;;  %vm98_vm3 = vweird.f32 %v164_v48  ;;  %vm79_vm5 = vmor %vm77_vm4, %vm78_vm2  ;;  %vm107_vm10 = vweird.f32 %v70_v46 }
  0xff   :  { %v73_v51 = vmul.f32 %v162_v45, %v72_v49  ;;  %167 = vrsqrt.f32 %v68_v47  ;;  %vm99_vm7 = vmor %vm97_vm6, %vm98_vm3  ;;  %vm87_vm12 = vweird.f32 %v68_v47 }
 0x100   :  { %v93_v52 = vmul.f32 %v164_v48, %v92_v50 }
 0x101   :  { %v74_v53 = vmul.f32 0.5, %v73_v51 }
 0x102   :  { %v94_v54 = vmul.f32 0.5, %v93_v52 }
 0x103   :  { %v75_v55 = vsub.f32 1.5, %v74_v53 }
 0x104   :  { %v166_v56 = vpop.eup %165  ;;  %v95_v57 = vsub.f32 1.5, %v94_v54 }
 0x105   :  { %v168_v58 = vpop.eup %167  ;;  %v76_v59 = vmul.f32 %v162_v45, %v75_v55  ;;  %v102_v60 = vmul.f32 %v166_v56, %v70_v46  ;;  %vm108_vm8 = vweird.f32 %v166_v56 }
 0x106   :  { %v96_v62 = vmul.f32 %v164_v48, %v95_v57  ;;  %v82_v63 = vmul.f32 %v168_v58, %v68_v47  ;;  %vm88_vm9 = vweird.f32 %v168_v58  ;;  %vm109_vm11 = vmor %vm107_vm10, %vm108_vm8 }
 0x107   :  { %v80_v0 = vsel %vm79_vm5, %v162_v45, %v76_v59  ;;  %v103_v1 = vmul.f32 %v166_v56, %v102_v60  ;;  %vm89_vm13 = vmor %vm87_vm12, %vm88_vm9 }
 0x108   :  { %v111_v3 = vmul.f32 %v80_v0, %v43_v20  ;;  %v100_v4 = vsel %vm99_vm7, %v164_v48, %v96_v62  ;;  %v83_v5 = vmul.f32 %v168_v58, %v82_v63 }
 0x109   :  { %v113_v6 = vmul.f32 %v100_v4, %v235_v19  ;;  %v104_v7 = vmul.f32 0.5, %v103_v1 }
 0x10a   :  { %v119_v8 = vmul.f32 %v157_v61, %v111_v3  ;;  %v84_v9 = vmul.f32 0.5, %v83_v5 }
 0x10b   :  { %v121_v10 = vmul.f32 %v157_v61, %v113_v6  ;;  %v105_v11 = vsub.f32 1.5, %v104_v7 }
 0x10c   :  { %v127_v12 = vadd.f32 %v158_v2, %v119_v8  ;;  %v85_v13 = vsub.f32 1.5, %v84_v9 }
 0x10d   :  { %v129_v14 = vadd.f32 %v158_v2, %v121_v10  ;;  %v106_v15 = vmul.f32 %v166_v56, %v105_v11 }
 0x10e   :  { %131 = vst.msk [vmem:[#allocation2] sm:$0xff] %vm19_vm0, %v127_v12  ;;  %v86_v16 = vmul.f32 %v168_v58, %v85_v13 }
 0x10f   :  { %133 = vst.msk [vmem:[#allocation2 + $0x10] sm:$0xff] %vm19_vm0, %v129_v14  ;;  %v110_v17 = vsel %vm109_vm11, %v166_v56, %v106_v15 }
 0x110   :  { %v114_v18 = vmul.f32 %v110_v17, %v241_v29  ;;  %v90_v19 = vsel %vm89_vm13, %v168_v58, %v86_v16 }
 0x111   :  { %v112_v20 = vmul.f32 %v90_v19, %v243_v30 }
 0x112   :  { %v122_v21 = vmul.f32 %v157_v61, %v114_v18 }
 0x113   :  { %v120_v22 = vmul.f32 %v157_v61, %v112_v20 }
 0x114   :  { %v130_v23 = vadd.f32 %v158_v2, %v122_v21 }
 0x115   :  { %v128_v24 = vadd.f32 %v158_v2, %v120_v22 }
 0x116   :  { %134 = vst.msk [vmem:[#allocation2 + $0x18] sm:$0xff] %vm19_vm0, %v130_v23 }
 0x117   :  { %132 = vst.msk [vmem:[#allocation2 + $0x8] sm:$0xff] %vm19_vm0, %v128_v24 }
 0x118   :  { %147 = dma.vmem_to_hbm [thread:$0]  %s140_s2, 512, %s142_s25, [#allocation3], %s197_s26, %s197_s26, %s198_s27  }
 0x119   :  { %193 = dma.done.wait [#allocation3], 512  }
 0x11a   :  { %194 = vsyncadd [#allocation3], 4294966784 }
 0x11b   :  { %152 = vsyncpa [#allocation3], 1 }

</bundles_post_ra>
